<compile_context>
chip_gen: v6e
topology: v6e:2x2x1
jax: 0.10.0
libtpu: 0.0.40
codegen_flags: <defaults>
</compile_context>

<pallas_src>
import functools

import jax
import jax.numpy as jnp
import numpy as np
from jax import lax
from jax.experimental import pallas as pl
from jax.experimental.pallas import tpu as pltpu

LANE = 128  # TPU lane width: logits padded to this for unmasked stores


# ----------------------------------------------------------------------------
# Fused forward kernel: block_b images per grid step.
# Activations live as (rows = b*h*w on sublanes, channels on lanes).
# ----------------------------------------------------------------------------
def fused_forward_kernel(x_ref, w1_ref, b1_ref, w2_ref, b2_ref,
                         wa_ref, ba_ref, wl_ref, bl_ref,
                         s1e_ref, s1o_ref, s2e_ref, s2o_ref,
                         e_ref, mask_ref, sumsel_ref,
                         o_ref,
                         pat1_ref, pat2_ref, h1pad_ref):
    # x_ref:   (B, H+2, W+2, Cin)  zero-padded NHWC input block
    # w1_ref:  (9*Cin, C)   b1_ref: (1, C)
    # w2_ref:  (9*C,   C)   b2_ref: (1, C)
    # wa_ref:  (C, C)       ba_ref: (1, C)
    # wl_ref:  (P*C, 128)   bl_ref: (1, 128)   (NCHW flatten folded, lane-padded)
    # s1*_ref / s2*_ref: precomputed 2x1 max-pool selection matrices
    # e_ref / mask_ref / sumsel_ref: precomputed flatten constants
    # o_ref:   (B, 1, 128)  lane-dense logits
    # pat1_ref/pat2_ref: im2col VMEM scratches; h1pad_ref: padded conv1 output
    B, Hp, Wp, Cin = x_ref.shape
    H, W = Hp - 2, Wp - 2
    C = b1_ref.shape[1]
    H2, W2 = H // 2, W // 2

    # ---------------- conv_block_1: 3x3 conv (pad=1) as ONE im2col matmul ---
    xp = x_ref[...]                                        # (B, H+2, W+2, Cin)
    for dx in range(3):                                    # 3 sublane shifts only
        xdx = xp[:, :, dx:dx + W, :]                       # (B, H+2, W, Cin)
        for dy in range(3):                                # leading-dim slices: free
            t = dy * 3 + dx
            pat1_ref[:, t * Cin:(t + 1) * Cin] = (
                xdx[:, dy:dy + H, :, :].reshape(B * H * W, Cin))
    h1 = jnp.dot(pat1_ref[...], w1_ref[...],
                 preferred_element_type=jnp.float32) + b1_ref[...]
    h1 = jnp.maximum(h1, 0.0)                              # ReLU

    # ---------------- maxpool 2x2 #1 -----------------------------------------
    # H-pair max on the VPU (aligned slices), W-pair via precomputed one-hot
    # selection matmuls on the MXU.
    v = h1.reshape(B * H2, 2 * W, C)
    hm = jnp.maximum(v[:, :W, :], v[:, W:, :]).reshape(B * H2 * W, C)
    p1 = jnp.maximum(
        jnp.dot(s1e_ref[...], hm, preferred_element_type=jnp.float32),
        jnp.dot(s1o_ref[...], hm, preferred_element_type=jnp.float32))
    # p1: (B*H2*W2, C)

    # Padded copy for conv2.  Only the 1-px border must be zero; re-zero it
    # every step (cheap) instead of once under program_id==0 so the kernel
    # stays correct when the "parallel" grid is sharded across TensorCores.
    h1pad_ref[:, 0:1, :, :] = jnp.zeros((B, 1, W2 + 2, C), jnp.float32)
    h1pad_ref[:, H2 + 1:H2 + 2, :, :] = jnp.zeros((B, 1, W2 + 2, C), jnp.float32)
    h1pad_ref[:, :, 0:1, :] = jnp.zeros((B, H2 + 2, 1, C), jnp.float32)
    h1pad_ref[:, :, W2 + 1:W2 + 2, :] = jnp.zeros((B, H2 + 2, 1, C), jnp.float32)
    h1pad_ref[:, 1:H2 + 1, 1:W2 + 1, :] = p1.reshape(B, H2, W2, C)

    # ---------------- conv_block_2: ONE im2col matmul -------------------------
    h1p = h1pad_ref[...]                                   # (B, H2+2, W2+2, C)
    for dx in range(3):
        hdx = h1p[:, :, dx:dx + W2, :]
        for dy in range(3):
            t = dy * 3 + dx
            pat2_ref[:, t * C:(t + 1) * C] = (
                hdx[:, dy:dy + H2, :, :].reshape(B * H2 * W2, C))
    h2 = jnp.dot(pat2_ref[...], w2_ref[...],
                 preferred_element_type=jnp.float32) + b2_ref[...]
    h2 = jnp.maximum(h2, 0.0)

    # ---------------- maxpool 2x2 #2 ------------------------------------------
    v2 = h2.reshape(B * (H2 // 2), 2 * W2, C)
    hm2 = jnp.maximum(v2[:, :W2, :], v2[:, W2:, :]).reshape(B * (H2 // 2) * W2, C)
    y = jnp.maximum(
        jnp.dot(s2e_ref[...], hm2, preferred_element_type=jnp.float32),
        jnp.dot(s2o_ref[...], hm2, preferred_element_type=jnp.float32))
    # y: (B*P, C)

    # ---------------- attention: x * sigmoid(conv1x1(x)) ----------------------
    z = jnp.dot(y, wa_ref[...], preferred_element_type=jnp.float32) + ba_ref[...]
    y = y * (1.0 / (1.0 + jnp.exp(-z)))

    # ---------------- flatten + classifier (single weight matmul) -------------
    # Matmul-based flatten (avoids a sublane->lane value reshape):
    #   yt[m, j]   = y[m, j % C]                       (one-hot E)
    #   ybd[m, j]  = yt[m, j] * [j//C == m % P]        (block-diagonal mask)
    #   yflat[b,:] = sum over rows of image b          (one-hot SumSel)
    yt = jnp.dot(y, e_ref[...], preferred_element_type=jnp.float32)   # (B*P, P*C)
    yflat = jnp.dot(sumsel_ref[...], yt * mask_ref[...],
                    preferred_element_type=jnp.float32)               # (B, P*C)
    out = jnp.dot(yflat, wl_ref[...],
                  preferred_element_type=jnp.float32) + bl_ref[...]   # (B, 128)
    o_ref[:, 0, :] = out                                              # lane-dense


# ----------------------------------------------------------------------------
# Wrapper: layout prep + single fused pallas_call over the batch.
# ----------------------------------------------------------------------------
def garbage_classifier_attention_forward(x_nchw, kp, *, block_b=1):
    N, Cin, H, W = x_nchw.shape
    C = kp["b1"].shape[1]
    o_pad = kp["bl"].shape[1]
    H2, W2 = H // 2, W // 2
    P = (H2 // 2) * (W2 // 2)

    # Pad batch to a multiple of block_b (keep grid even for v7x megacore).
    grid_n = -(-N // block_b)
    n_pad = grid_n * block_b
    if n_pad != N:
        x_nchw = jnp.pad(x_nchw, ((0, n_pad - N), (0, 0), (0, 0), (0, 0)))

    x = jnp.transpose(x_nchw, (0, 2, 3, 1))                # NCHW -> NHWC
    xpad = jnp.pad(x, ((0, 0), (1, 1), (1, 1), (0, 0)))    # conv1 zero pad

    const2d = pl.BlockSpec  # all constants are 2-D, fetched once
    cspec = lambda shp: const2d(shp, lambda n: (0, 0))     # noqa: E731

    out = pl.pallas_call(
        fused_forward_kernel,
        out_shape=jax.ShapeDtypeStruct((n_pad, 1, o_pad), jnp.float32),
        grid=(grid_n,),
        in_specs=[
            pl.BlockSpec((block_b, H + 2, W + 2, Cin), lambda n: (n, 0, 0, 0)),
            cspec(kp["w1"].shape), cspec(kp["b1"].shape),
            cspec(kp["w2"].shape), cspec(kp["b2"].shape),
            cspec(kp["wa"].shape), cspec(kp["ba"].shape),
            cspec(kp["wl"].shape), cspec(kp["bl"].shape),
            cspec(kp["s1e"].shape), cspec(kp["s1o"].shape),
            cspec(kp["s2e"].shape), cspec(kp["s2o"].shape),
            cspec(kp["E"].shape), cspec(kp["mask"].shape),
            cspec(kp["sumsel"].shape),
        ],
        out_specs=pl.BlockSpec((block_b, 1, o_pad), lambda n: (n, 0, 0)),
        scratch_shapes=[
            pltpu.VMEM((block_b * H * W, 9 * Cin), jnp.float32),     # im2col #1
            pltpu.VMEM((block_b * H2 * W2, 9 * C), jnp.float32),     # im2col #2
            pltpu.VMEM((block_b, H2 + 2, W2 + 2, C), jnp.float32),   # padded h1
        ],
        compiler_params=pltpu.CompilerParams(
            dimension_semantics=("parallel",)),            # batch across TCs
    )(xpad, kp["w1"], kp["b1"], kp["w2"], kp["b2"], kp["wa"], kp["ba"],
      kp["wl"], kp["bl"], kp["s1e"], kp["s1o"], kp["s2e"], kp["s2o"],
      kp["E"], kp["mask"], kp["sumsel"])
    return out.reshape(n_pad, o_pad)[:N]                   # caller slices classes


# ----------------------------------------------------------------------------
# One-time parameter / constant preparation (PyTorch layouts -> kernel layouts).
# ----------------------------------------------------------------------------
def prepare_params(w1, b1, w2, b2, wa, ba, wl, bl, *, H, W, block_b=1,
                   o_pad=LANE):
    C, Cin = w1.shape[0], w1.shape[1]
    H2, W2 = H // 2, W // 2
    H4, W4 = H2 // 2, W2 // 2
    P = H4 * W4
    O = wl.shape[0]

    def pool_sel(n_out, n_in):                             # even / odd row picks
        r = np.arange(n_out)[:, None]
        c = np.arange(n_in)[None, :]
        return (jnp.asarray((c == 2 * r).astype(np.float32)),
                jnp.asarray((c == 2 * r + 1).astype(np.float32)))

    s1e, s1o = pool_sel(block_b * H2 * W2, block_b * H2 * W)
    s2e, s2o = pool_sel(block_b * H4 * W4, block_b * H4 * W2)

    j = np.arange(P * C)
    m = np.arange(block_b * P)
    E = jnp.asarray((j[None, :] % C == np.arange(C)[:, None]).astype(np.float32))
    mask = jnp.asarray(((j[None, :] // C) == (m[:, None] % P)).astype(np.float32))
    sumsel = jnp.asarray(
        ((m[None, :] // P) == np.arange(block_b)[:, None]).astype(np.float32))

    # Fold the NCHW flatten into the linear weight: row index = p*C + c.
    wl2 = wl.reshape(O, C, H4, W4).transpose(2, 3, 1, 0).reshape(P * C, O)
    wl2 = jnp.pad(wl2, ((0, 0), (0, o_pad - O)))
    blp = jnp.pad(bl.reshape(1, O), ((0, 0), (0, o_pad - O)))

    return {
        "w1": jnp.transpose(w1, (2, 3, 1, 0)).reshape(9 * Cin, C),
        "b1": b1.reshape(1, C),
        "w2": jnp.transpose(w2, (2, 3, 1, 0)).reshape(9 * C, C),
        "b2": b2.reshape(1, C),
        "wa": wa[:, :, 0, 0].T,
        "ba": ba.reshape(1, C),
        "wl": wl2, "bl": blp,
        "s1e": s1e, "s1o": s1o, "s2e": s2e, "s2o": s2o,
        "E": E, "mask": mask, "sumsel": sumsel,
    }


# ----------------------------------------------------------------------------
# Pure-JAX reference (same deterministic weights) for validation.
# ----------------------------------------------------------------------------
def reference_forward(x_nchw, p):
    def conv2d(x, w, b, pad):
        y = lax.conv_general_dilated(
            x, w, window_strides=(1, 1), padding=((pad, pad), (pad, pad)),
            dimension_numbers=("NCHW", "OIHW", "NCHW"))
        return y + b.reshape(1, -1, 1, 1)

    def maxpool2(x):
        return lax.reduce_window(x, -jnp.inf, lax.max,
                                 (1, 1, 2, 2), (1, 1, 2, 2), "VALID")

    y = maxpool2(jax.nn.relu(conv2d(x_nchw, p["w1"], p["b1"], 1)))
    y = maxpool2(jax.nn.relu(conv2d(y, p["w2"], p["b2"], 1)))
    att = jax.nn.sigmoid(conv2d(y, p["wa"], p["ba"], 0))
    y = y * att
    flat = y.reshape(y.shape[0], -1)
    return flat @ p["wl"].T + p["bl"]


if __name__ == "__main__":
    # Small shapes consistent with the module's forward.
    N, Cin, H, W = 2, 3, 16, 16
    hidden = 8
    num_classes = 6
    H4, W4 = H // 4, W // 4
    P = H4 * W4
    # TODO(synk): the module hardcodes in_features=hidden*56*56 (224x224 input);
    # here in_features = hidden*(H//4)*(W//4) so the toy shapes are consistent.
    F = hidden * P

    key = jax.random.PRNGKey(0)
    ks = jax.random.split(key, 9)

    # Deterministic parameters in PyTorch layouts.
    w1 = jax.random.normal(ks[0], (hidden, Cin, 3, 3), jnp.float32) * 0.1
    b1 = jax.random.normal(ks[1], (hidden,), jnp.float32) * 0.1
    w2 = jax.random.normal(ks[2], (hidden, hidden, 3, 3), jnp.float32) * 0.1
    b2 = jax.random.normal(ks[3], (hidden,), jnp.float32) * 0.1
    wa = jax.random.normal(ks[4], (hidden, hidden, 1, 1), jnp.float32) * 0.1
    ba = jax.random.normal(ks[5], (hidden,), jnp.float32) * 0.1
    wl = jax.random.normal(ks[6], (num_classes, F), jnp.float32) * 0.02
    bl = jax.random.normal(ks[7], (num_classes,), jnp.float32) * 0.02

    ref_params = {"w1": w1, "b1": b1, "w2": w2, "b2": b2,
                  "wa": wa, "ba": ba, "wl": wl, "bl": bl}

    # Kernel-layout parameters + precomputed pooling/flatten constants.
    block_b = 1  # keeps grid=(2,) even so both v7x TensorCores are used
    kernel_params = prepare_params(w1, b1, w2, b2, wa, ba, wl, bl,
                                   H=H, W=W, block_b=block_b)

    x = jax.random.normal(ks[8], (N, Cin, H, W), jnp.float32)

    forward = jax.jit(functools.partial(garbage_classifier_attention_forward,
                                        block_b=block_b))
    out_padded = jax.block_until_ready(forward(x, kernel_params))
    out = out_padded[:, :num_classes]                      # drop lane padding

    ref = jax.block_until_ready(reference_forward(x, ref_params))
    max_err = float(jnp.max(jnp.abs(out - ref)))
    assert out.shape == (N, num_classes), out.shape
    assert max_err < 1e-3, f"mismatch vs reference: {max_err}"

    print("KERNEL_OK")
</pallas_src>

<mosaic_0001>
module attributes {stable_mosaic.version = 11 : i64} {
  func.func @fused_forward_kernel(%arg0: i32, %arg1: memref<1x18x18x3xf32, #tpu.memory_space<vmem>>, %arg2: memref<27x8xf32, #tpu.memory_space<vmem>>, %arg3: memref<1x8xf32, #tpu.memory_space<vmem>>, %arg4: memref<72x8xf32, #tpu.memory_space<vmem>>, %arg5: memref<1x8xf32, #tpu.memory_space<vmem>>, %arg6: memref<8x8xf32, #tpu.memory_space<vmem>>, %arg7: memref<1x8xf32, #tpu.memory_space<vmem>>, %arg8: memref<128x128xf32, #tpu.memory_space<vmem>>, %arg9: memref<1x128xf32, #tpu.memory_space<vmem>>, %arg10: memref<64x128xf32, #tpu.memory_space<vmem>>, %arg11: memref<64x128xf32, #tpu.memory_space<vmem>>, %arg12: memref<16x32xf32, #tpu.memory_space<vmem>>, %arg13: memref<16x32xf32, #tpu.memory_space<vmem>>, %arg14: memref<8x128xf32, #tpu.memory_space<vmem>>, %arg15: memref<16x128xf32, #tpu.memory_space<vmem>>, %arg16: memref<1x16xf32, #tpu.memory_space<vmem>>, %arg17: memref<1x1x128xf32, #tpu.memory_space<vmem>>, %arg18: memref<256x27xf32, #tpu.memory_space<vmem>>, %arg19: memref<64x72xf32, #tpu.memory_space<vmem>>, %arg20: memref<1x10x10x8xf32, #tpu.memory_space<vmem>>) attributes {dimension_semantics = [#tpu.dimension_semantics<parallel>], iteration_bounds = array<i64: 2>, scalar_prefetch = 0 : i64, scratch_operands = 3 : i64, tpu.core_type = #tpu.core_type<tc>, window_params = [{transform_indices = @transform_0, window_bounds = array<i64: 1, 18, 18, 3>}, {pipeline_mode = #tpu.pipeline_mode<synchronous>, transform_indices = @transform_1, window_bounds = array<i64: 27, 8>}, {pipeline_mode = #tpu.pipeline_mode<synchronous>, transform_indices = @transform_2, window_bounds = array<i64: 1, 8>}, {pipeline_mode = #tpu.pipeline_mode<synchronous>, transform_indices = @transform_3, window_bounds = array<i64: 72, 8>}, {pipeline_mode = #tpu.pipeline_mode<synchronous>, transform_indices = @transform_4, window_bounds = array<i64: 1, 8>}, {pipeline_mode = #tpu.pipeline_mode<synchronous>, transform_indices = @transform_5, window_bounds = array<i64: 8, 8>}, {pipeline_mode = #tpu.pipeline_mode<synchronous>, transform_indices = @transform_6, window_bounds = array<i64: 1, 8>}, {pipeline_mode = #tpu.pipeline_mode<synchronous>, transform_indices = @transform_7, window_bounds = array<i64: 128, 128>}, {pipeline_mode = #tpu.pipeline_mode<synchronous>, transform_indices = @transform_8, window_bounds = array<i64: 1, 128>}, {pipeline_mode = #tpu.pipeline_mode<synchronous>, transform_indices = @transform_9, window_bounds = array<i64: 64, 128>}, {pipeline_mode = #tpu.pipeline_mode<synchronous>, transform_indices = @transform_10, window_bounds = array<i64: 64, 128>}, {pipeline_mode = #tpu.pipeline_mode<synchronous>, transform_indices = @transform_11, window_bounds = array<i64: 16, 32>}, {pipeline_mode = #tpu.pipeline_mode<synchronous>, transform_indices = @transform_12, window_bounds = array<i64: 16, 32>}, {pipeline_mode = #tpu.pipeline_mode<synchronous>, transform_indices = @transform_13, window_bounds = array<i64: 8, 128>}, {pipeline_mode = #tpu.pipeline_mode<synchronous>, transform_indices = @transform_14, window_bounds = array<i64: 16, 128>}, {pipeline_mode = #tpu.pipeline_mode<synchronous>, transform_indices = @transform_15, window_bounds = array<i64: 1, 16>}, {transform_indices = @transform_16, window_bounds = array<i64: 1, 1, 128>}]} {
    %c0 = arith.constant 0 : index
    %c0_0 = arith.constant 0 : index
    %c0_1 = arith.constant 0 : index
    %c0_2 = arith.constant 0 : index
    %0 = vector.load %arg1[%c0, %c0_0, %c0_1, %c0_2] : memref<1x18x18x3xf32, #tpu.memory_space<vmem>>, vector<1x18x18x3xf32>
    %1 = vector.extract_strided_slice %0 {offsets = [0, 0, 0, 0], sizes = [1, 18, 16, 3], strides = [1, 1, 1, 1]} : vector<1x18x18x3xf32> to vector<1x18x16x3xf32>
    %2 = vector.extract_strided_slice %1 {offsets = [0, 0, 0, 0], sizes = [1, 16, 16, 3], strides = [1, 1, 1, 1]} : vector<1x18x16x3xf32> to vector<1x16x16x3xf32>
    %3 = vector.shape_cast %2 : vector<1x16x16x3xf32> to vector<256x3xf32>
    %c0_3 = arith.constant 0 : index
    %c0_4 = arith.constant 0 : index
    %4 = vector.load %arg18[%c0_3, %c0_4] : memref<256x27xf32, #tpu.memory_space<vmem>>, vector<256x3xf32>
    tpu.vector_store %arg18[%c0_3, %c0_4], %3 {strides = array<i32>} : memref<256x27xf32, #tpu.memory_space<vmem>>, vector<256x3xf32>,
    %5 = vector.extract_strided_slice %1 {offsets = [0, 1, 0, 0], sizes = [1, 16, 16, 3], strides = [1, 1, 1, 1]} : vector<1x18x16x3xf32> to vector<1x16x16x3xf32>
    %6 = vector.shape_cast %5 : vector<1x16x16x3xf32> to vector<256x3xf32>
    %c0_5 = arith.constant 0 : index
    %c9 = arith.constant 9 : index
    %7 = vector.load %arg18[%c0_5, %c9] : memref<256x27xf32, #tpu.memory_space<vmem>>, vector<256x3xf32>
    tpu.vector_store %arg18[%c0_5, %c9], %6 {strides = array<i32>} : memref<256x27xf32, #tpu.memory_space<vmem>>, vector<256x3xf32>,
    %8 = vector.extract_strided_slice %1 {offsets = [0, 2, 0, 0], sizes = [1, 16, 16, 3], strides = [1, 1, 1, 1]} : vector<1x18x16x3xf32> to vector<1x16x16x3xf32>
    %9 = vector.shape_cast %8 : vector<1x16x16x3xf32> to vector<256x3xf32>
    %c0_6 = arith.constant 0 : index
    %c18 = arith.constant 18 : index
    %10 = vector.load %arg18[%c0_6, %c18] : memref<256x27xf32, #tpu.memory_space<vmem>>, vector<256x3xf32>
    tpu.vector_store %arg18[%c0_6, %c18], %9 {strides = array<i32>} : memref<256x27xf32, #tpu.memory_space<vmem>>, vector<256x3xf32>,
    %11 = vector.extract_strided_slice %0 {offsets = [0, 0, 1, 0], sizes = [1, 18, 16, 3], strides = [1, 1, 1, 1]} : vector<1x18x18x3xf32> to vector<1x18x16x3xf32>
    %12 = vector.extract_strided_slice %11 {offsets = [0, 0, 0, 0], sizes = [1, 16, 16, 3], strides = [1, 1, 1, 1]} : vector<1x18x16x3xf32> to vector<1x16x16x3xf32>
    %13 = vector.shape_cast %12 : vector<1x16x16x3xf32> to vector<256x3xf32>
    %c0_7 = arith.constant 0 : index
    %c3 = arith.constant 3 : index
    %14 = vector.load %arg18[%c0_7, %c3] : memref<256x27xf32, #tpu.memory_space<vmem>>, vector<256x3xf32>
    tpu.vector_store %arg18[%c0_7, %c3], %13 {strides = array<i32>} : memref<256x27xf32, #tpu.memory_space<vmem>>, vector<256x3xf32>,
    %15 = vector.extract_strided_slice %11 {offsets = [0, 1, 0, 0], sizes = [1, 16, 16, 3], strides = [1, 1, 1, 1]} : vector<1x18x16x3xf32> to vector<1x16x16x3xf32>
    %16 = vector.shape_cast %15 : vector<1x16x16x3xf32> to vector<256x3xf32>
    %c0_8 = arith.constant 0 : index
    %c12 = arith.constant 12 : index
    %17 = vector.load %arg18[%c0_8, %c12] : memref<256x27xf32, #tpu.memory_space<vmem>>, vector<256x3xf32>
    tpu.vector_store %arg18[%c0_8, %c12], %16 {strides = array<i32>} : memref<256x27xf32, #tpu.memory_space<vmem>>, vector<256x3xf32>,
    %18 = vector.extract_strided_slice %11 {offsets = [0, 2, 0, 0], sizes = [1, 16, 16, 3], strides = [1, 1, 1, 1]} : vector<1x18x16x3xf32> to vector<1x16x16x3xf32>
    %19 = vector.shape_cast %18 : vector<1x16x16x3xf32> to vector<256x3xf32>
    %c0_9 = arith.constant 0 : index
    %c21 = arith.constant 21 : index
    %20 = vector.load %arg18[%c0_9, %c21] : memref<256x27xf32, #tpu.memory_space<vmem>>, vector<256x3xf32>
    tpu.vector_store %arg18[%c0_9, %c21], %19 {strides = array<i32>} : memref<256x27xf32, #tpu.memory_space<vmem>>, vector<256x3xf32>,
    %21 = vector.extract_strided_slice %0 {offsets = [0, 0, 2, 0], sizes = [1, 18, 16, 3], strides = [1, 1, 1, 1]} : vector<1x18x18x3xf32> to vector<1x18x16x3xf32>
    %22 = vector.extract_strided_slice %21 {offsets = [0, 0, 0, 0], sizes = [1, 16, 16, 3], strides = [1, 1, 1, 1]} : vector<1x18x16x3xf32> to vector<1x16x16x3xf32>
    %23 = vector.shape_cast %22 : vector<1x16x16x3xf32> to vector<256x3xf32>
    %c0_10 = arith.constant 0 : index
    %c6 = arith.constant 6 : index
    %24 = vector.load %arg18[%c0_10, %c6] : memref<256x27xf32, #tpu.memory_space<vmem>>, vector<256x3xf32>
    tpu.vector_store %arg18[%c0_10, %c6], %23 {strides = array<i32>} : memref<256x27xf32, #tpu.memory_space<vmem>>, vector<256x3xf32>,
    %25 = vector.extract_strided_slice %21 {offsets = [0, 1, 0, 0], sizes = [1, 16, 16, 3], strides = [1, 1, 1, 1]} : vector<1x18x16x3xf32> to vector<1x16x16x3xf32>
    %26 = vector.shape_cast %25 : vector<1x16x16x3xf32> to vector<256x3xf32>
    %c0_11 = arith.constant 0 : index
    %c15 = arith.constant 15 : index
    %27 = vector.load %arg18[%c0_11, %c15] : memref<256x27xf32, #tpu.memory_space<vmem>>, vector<256x3xf32>
    tpu.vector_store %arg18[%c0_11, %c15], %26 {strides = array<i32>} : memref<256x27xf32, #tpu.memory_space<vmem>>, vector<256x3xf32>,
    %28 = vector.extract_strided_slice %21 {offsets = [0, 2, 0, 0], sizes = [1, 16, 16, 3], strides = [1, 1, 1, 1]} : vector<1x18x16x3xf32> to vector<1x16x16x3xf32>
    %29 = vector.shape_cast %28 : vector<1x16x16x3xf32> to vector<256x3xf32>
    %c0_12 = arith.constant 0 : index
    %c24 = arith.constant 24 : index
    %30 = vector.load %arg18[%c0_12, %c24] : memref<256x27xf32, #tpu.memory_space<vmem>>, vector<256x3xf32>
    tpu.vector_store %arg18[%c0_12, %c24], %29 {strides = array<i32>} : memref<256x27xf32, #tpu.memory_space<vmem>>, vector<256x3xf32>,
    %c0_13 = arith.constant 0 : index
    %c0_14 = arith.constant 0 : index
    %31 = vector.load %arg18[%c0_13, %c0_14] : memref<256x27xf32, #tpu.memory_space<vmem>>, vector<256x27xf32>
    %c0_15 = arith.constant 0 : index
    %c0_16 = arith.constant 0 : index
    %32 = vector.load %arg2[%c0_15, %c0_16] : memref<27x8xf32, #tpu.memory_space<vmem>>, vector<27x8xf32>
    %cst = arith.constant dense<0.000000e+00> : vector<256x8xf32>
    %33 = tpu.matmul %31, %32, %cst {dimension_numbers = #tpu.dot_dimension_numbers<[1], [0], [0], [1], [0, 0, 1, 1], [], []>} : vector<256x27xf32>, vector<27x8xf32>, vector<256x8xf32> -> vector<256x8xf32>
    %c0_17 = arith.constant 0 : index
    %c0_18 = arith.constant 0 : index
    %34 = vector.load %arg3[%c0_17, %c0_18] : memref<1x8xf32, #tpu.memory_space<vmem>>, vector<1x8xf32>
    %35 = vector.broadcast %34 : vector<1x8xf32> to vector<256x8xf32>
    %36 = arith.addf %33, %35 : vector<256x8xf32>
    %cst_19 = arith.constant 0.000000e+00 : f32
    %37 = vector.broadcast %cst_19 : f32 to vector<256x8xf32>
    %38 = arith.maximumf %36, %37 : vector<256x8xf32>
    %39 = vector.shape_cast %38 : vector<256x8xf32> to vector<8x32x8xf32>
    %40 = vector.extract_strided_slice %39 {offsets = [0, 0, 0], sizes = [8, 16, 8], strides = [1, 1, 1]} : vector<8x32x8xf32> to vector<8x16x8xf32>
    %41 = vector.extract_strided_slice %39 {offsets = [0, 16, 0], sizes = [8, 16, 8], strides = [1, 1, 1]} : vector<8x32x8xf32> to vector<8x16x8xf32>
    %42 = arith.maximumf %40, %41 : vector<8x16x8xf32>
    %43 = vector.shape_cast %42 : vector<8x16x8xf32> to vector<128x8xf32>
    %c0_20 = arith.constant 0 : index
    %c0_21 = arith.constant 0 : index
    %44 = vector.load %arg10[%c0_20, %c0_21] : memref<64x128xf32, #tpu.memory_space<vmem>>, vector<64x128xf32>
    %cst_22 = arith.constant dense<0.000000e+00> : vector<64x8xf32>
    %45 = tpu.matmul %44, %43, %cst_22 {dimension_numbers = #tpu.dot_dimension_numbers<[1], [0], [0], [1], [0, 0, 1, 1], [], []>} : vector<64x128xf32>, vector<128x8xf32>, vector<64x8xf32> -> vector<64x8xf32>
    %c0_23 = arith.constant 0 : index
    %c0_24 = arith.constant 0 : index
    %46 = vector.load %arg11[%c0_23, %c0_24] : memref<64x128xf32, #tpu.memory_space<vmem>>, vector<64x128xf32>
    %cst_25 = arith.constant dense<0.000000e+00> : vector<64x8xf32>
    %47 = tpu.matmul %46, %43, %cst_25 {dimension_numbers = #tpu.dot_dimension_numbers<[1], [0], [0], [1], [0, 0, 1, 1], [], []>} : vector<64x128xf32>, vector<128x8xf32>, vector<64x8xf32> -> vector<64x8xf32>
    %48 = arith.maximumf %45, %47 : vector<64x8xf32>
    %cst_26 = arith.constant 0.000000e+00 : f32
    %49 = vector.broadcast %cst_26 : f32 to vector<1x1x10x8xf32>
    %c0_27 = arith.constant 0 : index
    %c0_28 = arith.constant 0 : index
    %c0_29 = arith.constant 0 : index
    %c0_30 = arith.constant 0 : index
    %50 = vector.load %arg20[%c0_27, %c0_28, %c0_29, %c0_30] : memref<1x10x10x8xf32, #tpu.memory_space<vmem>>, vector<1x1x10x8xf32>
    tpu.vector_store %arg20[%c0_27, %c0_28, %c0_29, %c0_30], %49 {strides = array<i32>} : memref<1x10x10x8xf32, #tpu.memory_space<vmem>>, vector<1x1x10x8xf32>,
    %cst_31 = arith.constant 0.000000e+00 : f32
    %51 = vector.broadcast %cst_31 : f32 to vector<1x1x10x8xf32>
    %c0_32 = arith.constant 0 : index
    %c9_33 = arith.constant 9 : index
    %c0_34 = arith.constant 0 : index
    %c0_35 = arith.constant 0 : index
    %52 = vector.load %arg20[%c0_32, %c9_33, %c0_34, %c0_35] : memref<1x10x10x8xf32, #tpu.memory_space<vmem>>, vector<1x1x10x8xf32>
    tpu.vector_store %arg20[%c0_32, %c9_33, %c0_34, %c0_35], %51 {strides = array<i32>} : memref<1x10x10x8xf32, #tpu.memory_space<vmem>>, vector<1x1x10x8xf32>,
    %cst_36 = arith.constant 0.000000e+00 : f32
    %53 = vector.broadcast %cst_36 : f32 to vector<1x10x1x8xf32>
    %c0_37 = arith.constant 0 : index
    %c0_38 = arith.constant 0 : index
    %c0_39 = arith.constant 0 : index
    %c0_40 = arith.constant 0 : index
    %54 = vector.load %arg20[%c0_37, %c0_38, %c0_39, %c0_40] : memref<1x10x10x8xf32, #tpu.memory_space<vmem>>, vector<1x10x1x8xf32>
    tpu.vector_store %arg20[%c0_37, %c0_38, %c0_39, %c0_40], %53 {strides = array<i32>} : memref<1x10x10x8xf32, #tpu.memory_space<vmem>>, vector<1x10x1x8xf32>,
    %cst_41 = arith.constant 0.000000e+00 : f32
    %55 = vector.broadcast %cst_41 : f32 to vector<1x10x1x8xf32>
    %c0_42 = arith.constant 0 : index
    %c0_43 = arith.constant 0 : index
    %c9_44 = arith.constant 9 : index
    %c0_45 = arith.constant 0 : index
    %56 = vector.load %arg20[%c0_42, %c0_43, %c9_44, %c0_45] : memref<1x10x10x8xf32, #tpu.memory_space<vmem>>, vector<1x10x1x8xf32>
    tpu.vector_store %arg20[%c0_42, %c0_43, %c9_44, %c0_45], %55 {strides = array<i32>} : memref<1x10x10x8xf32, #tpu.memory_space<vmem>>, vector<1x10x1x8xf32>,
    %57 = vector.shape_cast %48 : vector<64x8xf32> to vector<1x8x8x8xf32>
    %c0_46 = arith.constant 0 : index
    %c1 = arith.constant 1 : index
    %c1_47 = arith.constant 1 : index
    %c0_48 = arith.constant 0 : index
    %58 = vector.load %arg20[%c0_46, %c1, %c1_47, %c0_48] : memref<1x10x10x8xf32, #tpu.memory_space<vmem>>, vector<1x8x8x8xf32>
    tpu.vector_store %arg20[%c0_46, %c1, %c1_47, %c0_48], %57 {strides = array<i32>} : memref<1x10x10x8xf32, #tpu.memory_space<vmem>>, vector<1x8x8x8xf32>,
    %c0_49 = arith.constant 0 : index
    %c0_50 = arith.constant 0 : index
    %c0_51 = arith.constant 0 : index
    %c0_52 = arith.constant 0 : index
    %59 = vector.load %arg20[%c0_49, %c0_50, %c0_51, %c0_52] : memref<1x10x10x8xf32, #tpu.memory_space<vmem>>, vector<1x10x10x8xf32>
    %60 = vector.extract_strided_slice %59 {offsets = [0, 0, 0, 0], sizes = [1, 10, 8, 8], strides = [1, 1, 1, 1]} : vector<1x10x10x8xf32> to vector<1x10x8x8xf32>
    %61 = vector.extract_strided_slice %60 {offsets = [0, 0, 0, 0], sizes = [1, 8, 8, 8], strides = [1, 1, 1, 1]} : vector<1x10x8x8xf32> to vector<1x8x8x8xf32>
    %62 = vector.shape_cast %61 : vector<1x8x8x8xf32> to vector<64x8xf32>
    %c0_53 = arith.constant 0 : index
    %c0_54 = arith.constant 0 : index
    %63 = vector.load %arg19[%c0_53, %c0_54] : memref<64x72xf32, #tpu.memory_space<vmem>>, vector<64x8xf32>
    tpu.vector_store %arg19[%c0_53, %c0_54], %62 {strides = array<i32>} : memref<64x72xf32, #tpu.memory_space<vmem>>, vector<64x8xf32>,
    %64 = vector.extract_strided_slice %60 {offsets = [0, 1, 0, 0], sizes = [1, 8, 8, 8], strides = [1, 1, 1, 1]} : vector<1x10x8x8xf32> to vector<1x8x8x8xf32>
    %65 = vector.shape_cast %64 : vector<1x8x8x8xf32> to vector<64x8xf32>
    %c0_55 = arith.constant 0 : index
    %c24_56 = arith.constant 24 : index
    %66 = vector.load %arg19[%c0_55, %c24_56] : memref<64x72xf32, #tpu.memory_space<vmem>>, vector<64x8xf32>
    tpu.vector_store %arg19[%c0_55, %c24_56], %65 {strides = array<i32>} : memref<64x72xf32, #tpu.memory_space<vmem>>, vector<64x8xf32>,
    %67 = vector.extract_strided_slice %60 {offsets = [0, 2, 0, 0], sizes = [1, 8, 8, 8], strides = [1, 1, 1, 1]} : vector<1x10x8x8xf32> to vector<1x8x8x8xf32>
    %68 = vector.shape_cast %67 : vector<1x8x8x8xf32> to vector<64x8xf32>
    %c0_57 = arith.constant 0 : index
    %c48 = arith.constant 48 : index
    %69 = vector.load %arg19[%c0_57, %c48] : memref<64x72xf32, #tpu.memory_space<vmem>>, vector<64x8xf32>
    tpu.vector_store %arg19[%c0_57, %c48], %68 {strides = array<i32>} : memref<64x72xf32, #tpu.memory_space<vmem>>, vector<64x8xf32>,
    %70 = vector.extract_strided_slice %59 {offsets = [0, 0, 1, 0], sizes = [1, 10, 8, 8], strides = [1, 1, 1, 1]} : vector<1x10x10x8xf32> to vector<1x10x8x8xf32>
    %71 = vector.extract_strided_slice %70 {offsets = [0, 0, 0, 0], sizes = [1, 8, 8, 8], strides = [1, 1, 1, 1]} : vector<1x10x8x8xf32> to vector<1x8x8x8xf32>
    %72 = vector.shape_cast %71 : vector<1x8x8x8xf32> to vector<64x8xf32>
    %c0_58 = arith.constant 0 : index
    %c8 = arith.constant 8 : index
    %73 = vector.load %arg19[%c0_58, %c8] : memref<64x72xf32, #tpu.memory_space<vmem>>, vector<64x8xf32>
    tpu.vector_store %arg19[%c0_58, %c8], %72 {strides = array<i32>} : memref<64x72xf32, #tpu.memory_space<vmem>>, vector<64x8xf32>,
    %74 = vector.extract_strided_slice %70 {offsets = [0, 1, 0, 0], sizes = [1, 8, 8, 8], strides = [1, 1, 1, 1]} : vector<1x10x8x8xf32> to vector<1x8x8x8xf32>
    %75 = vector.shape_cast %74 : vector<1x8x8x8xf32> to vector<64x8xf32>
    %c0_59 = arith.constant 0 : index
    %c32 = arith.constant 32 : index
    %76 = vector.load %arg19[%c0_59, %c32] : memref<64x72xf32, #tpu.memory_space<vmem>>, vector<64x8xf32>
    tpu.vector_store %arg19[%c0_59, %c32], %75 {strides = array<i32>} : memref<64x72xf32, #tpu.memory_space<vmem>>, vector<64x8xf32>,
    %77 = vector.extract_strided_slice %70 {offsets = [0, 2, 0, 0], sizes = [1, 8, 8, 8], strides = [1, 1, 1, 1]} : vector<1x10x8x8xf32> to vector<1x8x8x8xf32>
    %78 = vector.shape_cast %77 : vector<1x8x8x8xf32> to vector<64x8xf32>
    %c0_60 = arith.constant 0 : index
    %c56 = arith.constant 56 : index
    %79 = vector.load %arg19[%c0_60, %c56] : memref<64x72xf32, #tpu.memory_space<vmem>>, vector<64x8xf32>
    tpu.vector_store %arg19[%c0_60, %c56], %78 {strides = array<i32>} : memref<64x72xf32, #tpu.memory_space<vmem>>, vector<64x8xf32>,
    %80 = vector.extract_strided_slice %59 {offsets = [0, 0, 2, 0], sizes = [1, 10, 8, 8], strides = [1, 1, 1, 1]} : vector<1x10x10x8xf32> to vector<1x10x8x8xf32>
    %81 = vector.extract_strided_slice %80 {offsets = [0, 0, 0, 0], sizes = [1, 8, 8, 8], strides = [1, 1, 1, 1]} : vector<1x10x8x8xf32> to vector<1x8x8x8xf32>
    %82 = vector.shape_cast %81 : vector<1x8x8x8xf32> to vector<64x8xf32>
    %c0_61 = arith.constant 0 : index
    %c16 = arith.constant 16 : index
    %83 = vector.load %arg19[%c0_61, %c16] : memref<64x72xf32, #tpu.memory_space<vmem>>, vector<64x8xf32>
    tpu.vector_store %arg19[%c0_61, %c16], %82 {strides = array<i32>} : memref<64x72xf32, #tpu.memory_space<vmem>>, vector<64x8xf32>,
    %84 = vector.extract_strided_slice %80 {offsets = [0, 1, 0, 0], sizes = [1, 8, 8, 8], strides = [1, 1, 1, 1]} : vector<1x10x8x8xf32> to vector<1x8x8x8xf32>
    %85 = vector.shape_cast %84 : vector<1x8x8x8xf32> to vector<64x8xf32>
    %c0_62 = arith.constant 0 : index
    %c40 = arith.constant 40 : index
    %86 = vector.load %arg19[%c0_62, %c40] : memref<64x72xf32, #tpu.memory_space<vmem>>, vector<64x8xf32>
    tpu.vector_store %arg19[%c0_62, %c40], %85 {strides = array<i32>} : memref<64x72xf32, #tpu.memory_space<vmem>>, vector<64x8xf32>,
    %87 = vector.extract_strided_slice %80 {offsets = [0, 2, 0, 0], sizes = [1, 8, 8, 8], strides = [1, 1, 1, 1]} : vector<1x10x8x8xf32> to vector<1x8x8x8xf32>
    %88 = vector.shape_cast %87 : vector<1x8x8x8xf32> to vector<64x8xf32>
    %c0_63 = arith.constant 0 : index
    %c64 = arith.constant 64 : index
    %89 = vector.load %arg19[%c0_63, %c64] : memref<64x72xf32, #tpu.memory_space<vmem>>, vector<64x8xf32>
    tpu.vector_store %arg19[%c0_63, %c64], %88 {strides = array<i32>} : memref<64x72xf32, #tpu.memory_space<vmem>>, vector<64x8xf32>,
    %c0_64 = arith.constant 0 : index
    %c0_65 = arith.constant 0 : index
    %90 = vector.load %arg19[%c0_64, %c0_65] : memref<64x72xf32, #tpu.memory_space<vmem>>, vector<64x72xf32>
    %c0_66 = arith.constant 0 : index
    %c0_67 = arith.constant 0 : index
    %91 = vector.load %arg4[%c0_66, %c0_67] : memref<72x8xf32, #tpu.memory_space<vmem>>, vector<72x8xf32>
    %cst_68 = arith.constant dense<0.000000e+00> : vector<64x8xf32>
    %92 = tpu.matmul %90, %91, %cst_68 {dimension_numbers = #tpu.dot_dimension_numbers<[1], [0], [0], [1], [0, 0, 1, 1], [], []>} : vector<64x72xf32>, vector<72x8xf32>, vector<64x8xf32> -> vector<64x8xf32>
    %c0_69 = arith.constant 0 : index
    %c0_70 = arith.constant 0 : index
    %93 = vector.load %arg5[%c0_69, %c0_70] : memref<1x8xf32, #tpu.memory_space<vmem>>, vector<1x8xf32>
    %94 = vector.broadcast %93 : vector<1x8xf32> to vector<64x8xf32>
    %95 = arith.addf %92, %94 : vector<64x8xf32>
    %cst_71 = arith.constant 0.000000e+00 : f32
    %96 = vector.broadcast %cst_71 : f32 to vector<64x8xf32>
    %97 = arith.maximumf %95, %96 : vector<64x8xf32>
    %98 = vector.shape_cast %97 : vector<64x8xf32> to vector<4x16x8xf32>
    %99 = vector.extract_strided_slice %98 {offsets = [0, 0, 0], sizes = [4, 8, 8], strides = [1, 1, 1]} : vector<4x16x8xf32> to vector<4x8x8xf32>
    %100 = vector.extract_strided_slice %98 {offsets = [0, 8, 0], sizes = [4, 8, 8], strides = [1, 1, 1]} : vector<4x16x8xf32> to vector<4x8x8xf32>
    %101 = arith.maximumf %99, %100 : vector<4x8x8xf32>
    %102 = vector.shape_cast %101 : vector<4x8x8xf32> to vector<32x8xf32>
    %c0_72 = arith.constant 0 : index
    %c0_73 = arith.constant 0 : index
    %103 = vector.load %arg12[%c0_72, %c0_73] : memref<16x32xf32, #tpu.memory_space<vmem>>, vector<16x32xf32>
    %cst_74 = arith.constant dense<0.000000e+00> : vector<16x8xf32>
    %104 = tpu.matmul %103, %102, %cst_74 {dimension_numbers = #tpu.dot_dimension_numbers<[1], [0], [0], [1], [0, 0, 1, 1], [], []>} : vector<16x32xf32>, vector<32x8xf32>, vector<16x8xf32> -> vector<16x8xf32>
    %c0_75 = arith.constant 0 : index
    %c0_76 = arith.constant 0 : index
    %105 = vector.load %arg13[%c0_75, %c0_76] : memref<16x32xf32, #tpu.memory_space<vmem>>, vector<16x32xf32>
    %cst_77 = arith.constant dense<0.000000e+00> : vector<16x8xf32>
    %106 = tpu.matmul %105, %102, %cst_77 {dimension_numbers = #tpu.dot_dimension_numbers<[1], [0], [0], [1], [0, 0, 1, 1], [], []>} : vector<16x32xf32>, vector<32x8xf32>, vector<16x8xf32> -> vector<16x8xf32>
    %107 = arith.maximumf %104, %106 : vector<16x8xf32>
    %c0_78 = arith.constant 0 : index
    %c0_79 = arith.constant 0 : index
    %108 = vector.load %arg6[%c0_78, %c0_79] : memref<8x8xf32, #tpu.memory_space<vmem>>, vector<8x8xf32>
    %cst_80 = arith.constant dense<0.000000e+00> : vector<16x8xf32>
    %109 = tpu.matmul %107, %108, %cst_80 {dimension_numbers = #tpu.dot_dimension_numbers<[1], [0], [0], [1], [0, 0, 1, 1], [], []>} : vector<16x8xf32>, vector<8x8xf32>, vector<16x8xf32> -> vector<16x8xf32>
    %c0_81 = arith.constant 0 : index
    %c0_82 = arith.constant 0 : index
    %110 = vector.load %arg7[%c0_81, %c0_82] : memref<1x8xf32, #tpu.memory_space<vmem>>, vector<1x8xf32>
    %111 = vector.broadcast %110 : vector<1x8xf32> to vector<16x8xf32>
    %112 = arith.addf %109, %111 : vector<16x8xf32>
    %cst_83 = arith.constant 0.000000e+00 : f32
    %113 = vector.broadcast %cst_83 : f32 to vector<16x8xf32>
    %114 = arith.subf %113, %112 : vector<16x8xf32>
    %115 = math.exp %114 : vector<16x8xf32>
    %cst_84 = arith.constant 1.000000e+00 : f32
    %116 = vector.broadcast %cst_84 : f32 to vector<16x8xf32>
    %117 = arith.addf %116, %115 : vector<16x8xf32>
    %cst_85 = arith.constant 1.000000e+00 : f32
    %118 = vector.broadcast %cst_85 : f32 to vector<16x8xf32>
    %119 = arith.divf %118, %117 : vector<16x8xf32>
    %120 = arith.mulf %107, %119 : vector<16x8xf32>
    %c0_86 = arith.constant 0 : index
    %c0_87 = arith.constant 0 : index
    %121 = vector.load %arg14[%c0_86, %c0_87] : memref<8x128xf32, #tpu.memory_space<vmem>>, vector<8x128xf32>
    %cst_88 = arith.constant dense<0.000000e+00> : vector<16x128xf32>
    %122 = tpu.matmul %120, %121, %cst_88 {dimension_numbers = #tpu.dot_dimension_numbers<[1], [0], [0], [1], [0, 0, 1, 1], [], []>} : vector<16x8xf32>, vector<8x128xf32>, vector<16x128xf32> -> vector<16x128xf32>
    %c0_89 = arith.constant 0 : index
    %c0_90 = arith.constant 0 : index
    %123 = vector.load %arg16[%c0_89, %c0_90] : memref<1x16xf32, #tpu.memory_space<vmem>>, vector<1x16xf32>
    %c0_91 = arith.constant 0 : index
    %c0_92 = arith.constant 0 : index
    %124 = vector.load %arg15[%c0_91, %c0_92] : memref<16x128xf32, #tpu.memory_space<vmem>>, vector<16x128xf32>
    %125 = arith.mulf %122, %124 : vector<16x128xf32>
    %cst_93 = arith.constant dense<0.000000e+00> : vector<1x128xf32>
    %126 = tpu.matmul %123, %125, %cst_93 {dimension_numbers = #tpu.dot_dimension_numbers<[1], [0], [0], [1], [0, 0, 1, 1], [], []>} : vector<1x16xf32>, vector<16x128xf32>, vector<1x128xf32> -> vector<1x128xf32>
    %c0_94 = arith.constant 0 : index
    %c0_95 = arith.constant 0 : index
    %127 = vector.load %arg8[%c0_94, %c0_95] : memref<128x128xf32, #tpu.memory_space<vmem>>, vector<128x128xf32>
    %cst_96 = arith.constant dense<0.000000e+00> : vector<1x128xf32>
    %128 = tpu.matmul %126, %127, %cst_96 {dimension_numbers = #tpu.dot_dimension_numbers<[1], [0], [0], [1], [0, 0, 1, 1], [], []>} : vector<1x128xf32>, vector<128x128xf32>, vector<1x128xf32> -> vector<1x128xf32>
    %c0_97 = arith.constant 0 : index
    %c0_98 = arith.constant 0 : index
    %129 = vector.load %arg9[%c0_97, %c0_98] : memref<1x128xf32, #tpu.memory_space<vmem>>, vector<1x128xf32>
    %130 = arith.addf %128, %129 : vector<1x128xf32>
    %c0_99 = arith.constant 0 : index
    %c0_100 = arith.constant 0 : index
    %c0_101 = arith.constant 0 : index
    %131 = vector.load %arg17[%c0_99, %c0_100, %c0_101] : memref<1x1x128xf32, #tpu.memory_space<vmem>>, vector<1x1x128xf32>
    %132 = vector.shape_cast %131 : vector<1x1x128xf32> to vector<1x128xf32>
    %133 = vector.shape_cast %130 : vector<1x128xf32> to vector<1x1x128xf32>
    tpu.vector_store %arg17[%c0_99, %c0_100, %c0_101], %133 {strides = array<i32>} : memref<1x1x128xf32, #tpu.memory_space<vmem>>, vector<1x1x128xf32>,
    return
  }
  func.func @transform_0(%arg0: i32) -> (i32, i32, i32, i32) {
    %c0_i32 = arith.constant 0 : i32
    %c0_i32_0 = arith.constant 0 : i32
    %c0_i32_1 = arith.constant 0 : i32
    %c0_i32_2 = arith.constant 0 : i32
    return %arg0, %c0_i32, %c0_i32_0, %c0_i32_1 : i32, i32, i32, i32
  }
  func.func @transform_1(%arg0: i32) -> (i32, i32) {
    %c0_i32 = arith.constant 0 : i32
    %c0_i32_0 = arith.constant 0 : i32
    %c0_i32_1 = arith.constant 0 : i32
    return %c0_i32, %c0_i32_0 : i32, i32
  }
  func.func @transform_2(%arg0: i32) -> (i32, i32) {
    %c0_i32 = arith.constant 0 : i32
    %c0_i32_0 = arith.constant 0 : i32
    %c0_i32_1 = arith.constant 0 : i32
    return %c0_i32, %c0_i32_0 : i32, i32
  }
  func.func @transform_3(%arg0: i32) -> (i32, i32) {
    %c0_i32 = arith.constant 0 : i32
    %c0_i32_0 = arith.constant 0 : i32
    %c0_i32_1 = arith.constant 0 : i32
    return %c0_i32, %c0_i32_0 : i32, i32
  }
  func.func @transform_4(%arg0: i32) -> (i32, i32) {
    %c0_i32 = arith.constant 0 : i32
    %c0_i32_0 = arith.constant 0 : i32
    %c0_i32_1 = arith.constant 0 : i32
    return %c0_i32, %c0_i32_0 : i32, i32
  }
  func.func @transform_5(%arg0: i32) -> (i32, i32) {
    %c0_i32 = arith.constant 0 : i32
    %c0_i32_0 = arith.constant 0 : i32
    %c0_i32_1 = arith.constant 0 : i32
    return %c0_i32, %c0_i32_0 : i32, i32
  }
  func.func @transform_6(%arg0: i32) -> (i32, i32) {
    %c0_i32 = arith.constant 0 : i32
    %c0_i32_0 = arith.constant 0 : i32
    %c0_i32_1 = arith.constant 0 : i32
    return %c0_i32, %c0_i32_0 : i32, i32
  }
  func.func @transform_7(%arg0: i32) -> (i32, i32) {
    %c0_i32 = arith.constant 0 : i32
    %c0_i32_0 = arith.constant 0 : i32
    %c0_i32_1 = arith.constant 0 : i32
    return %c0_i32, %c0_i32_0 : i32, i32
  }
  func.func @transform_8(%arg0: i32) -> (i32, i32) {
    %c0_i32 = arith.constant 0 : i32
    %c0_i32_0 = arith.constant 0 : i32
    %c0_i32_1 = arith.constant 0 : i32
    return %c0_i32, %c0_i32_0 : i32, i32
  }
  func.func @transform_9(%arg0: i32) -> (i32, i32) {
    %c0_i32 = arith.constant 0 : i32
    %c0_i32_0 = arith.constant 0 : i32
    %c0_i32_1 = arith.constant 0 : i32
    return %c0_i32, %c0_i32_0 : i32, i32
  }
  func.func @transform_10(%arg0: i32) -> (i32, i32) {
    %c0_i32 = arith.constant 0 : i32
    %c0_i32_0 = arith.constant 0 : i32
    %c0_i32_1 = arith.constant 0 : i32
    return %c0_i32, %c0_i32_0 : i32, i32
  }
  func.func @transform_11(%arg0: i32) -> (i32, i32) {
    %c0_i32 = arith.constant 0 : i32
    %c0_i32_0 = arith.constant 0 : i32
    %c0_i32_1 = arith.constant 0 : i32
    return %c0_i32, %c0_i32_0 : i32, i32
  }
  func.func @transform_12(%arg0: i32) -> (i32, i32) {
    %c0_i32 = arith.constant 0 : i32
    %c0_i32_0 = arith.constant 0 : i32
    %c0_i32_1 = arith.constant 0 : i32
    return %c0_i32, %c0_i32_0 : i32, i32
  }
  func.func @transform_13(%arg0: i32) -> (i32, i32) {
    %c0_i32 = arith.constant 0 : i32
    %c0_i32_0 = arith.constant 0 : i32
    %c0_i32_1 = arith.constant 0 : i32
    return %c0_i32, %c0_i32_0 : i32, i32
  }
  func.func @transform_14(%arg0: i32) -> (i32, i32) {
    %c0_i32 = arith.constant 0 : i32
    %c0_i32_0 = arith.constant 0 : i32
    %c0_i32_1 = arith.constant 0 : i32
    return %c0_i32, %c0_i32_0 : i32, i32
  }
  func.func @transform_15(%arg0: i32) -> (i32, i32) {
    %c0_i32 = arith.constant 0 : i32
    %c0_i32_0 = arith.constant 0 : i32
    %c0_i32_1 = arith.constant 0 : i32
    return %c0_i32, %c0_i32_0 : i32, i32
  }
  func.func @transform_16(%arg0: i32) -> (i32, i32, i32) {
    %c0_i32 = arith.constant 0 : i32
    %c0_i32_0 = arith.constant 0 : i32
    %c0_i32_1 = arith.constant 0 : i32
    return %arg0, %c0_i32, %c0_i32_0 : i32, i32, i32
  }
}

</mosaic_0001>

<bundles_post_ra>
// kernel: garbage_classifier_attention_forward.1
= control target key start
LH: loop header
LB: loop body
LE: loop exit
PB: predicated region body
PF: predicated region fallthrough
CT: control target
= control target key end

     0   :  { %s6277_s0 = inlined_call_operand.vmem [shape: f32[2,18,18,3], index: 0, kind: input, shape index: {}]   ;;  %s6278_s1 = inlined_call_operand.vmem [shape: f32[27,8], index: 1, kind: input, shape index: {}]   ;;  %s6279_s2 = inlined_call_operand.vmem [shape: f32[1,8], index: 2, kind: input, shape index: {}]   ;;  %s6280_s3 = inlined_call_operand.vmem [shape: f32[72,8], index: 3, kind: input, shape index: {}]   ;;  %s6281_s4 = inlined_call_operand.vmem [shape: f32[1,8], index: 4, kind: input, shape index: {}]   ;;  %s6282_s5 = inlined_call_operand.vmem [shape: f32[8,8], index: 5, kind: input, shape index: {}]   ;;  %s6283_s6 = inlined_call_operand.vmem [shape: f32[1,8], index: 6, kind: input, shape index: {}]   ;;  %s6284_s7 = inlined_call_operand.vmem [shape: f32[128,128], index: 7, kind: input, shape index: {}]   ;;  %s6285_s8 = inlined_call_operand.vmem [shape: f32[1,128], index: 8, kind: input, shape index: {}]   ;;  %s6286_s9 = inlined_call_operand.vmem [shape: f32[64,128], index: 9, kind: input, shape index: {}]   ;;  %s6287_s10 = inlined_call_operand.vmem [shape: f32[64,128], index: 10, kind: input, shape index: {}]   ;;  %s6288_s11 = inlined_call_operand.vmem [shape: f32[16,32], index: 11, kind: input, shape index: {}]   ;;  %s6289_s12 = inlined_call_operand.vmem [shape: f32[16,32], index: 12, kind: input, shape index: {}]   ;;  %s6290_s13 = inlined_call_operand.vmem [shape: f32[8,128], index: 13, kind: input, shape index: {}]   ;;  %s6291_s14 = inlined_call_operand.vmem [shape: f32[16,128], index: 14, kind: input, shape index: {}]   ;;  %s6292_s15 = inlined_call_operand.vmem [shape: f32[1,16], index: 15, kind: input, shape index: {}]   ;;  %s6293_s16 = inlined_call_operand.hbm [shape: f32[2,1,128], index: 16, kind: output, shape index: {}]  }
   0x1   :  { %6323 = sst [smem:[#allocation11_spill]] %s6277_s0 }
   0x2   :  { %6324 = sst [smem:[#allocation12_spill]] %s6278_s1 }
   0x3   :  { %6325 = sst [smem:[#allocation13_spill]] %s6279_s2 }
   0x4   :  { %21 = vsyncpa [#allocation6], 0 }
   0x5   :  { %23 = vsyncpa [#allocation6 + $0x1], 0  ;;  %s4375_s21 = smov 0   ;;  %s4377_s22 = smov 0  }
   0x6   :  { %s4379_s23 = smov 0   ;;  %s4381_s24 = smov 0  }
   0x7 LB: > { %6326 = sst [smem:[#allocation8_spill]] %s4266_s23  ;;  %s4396_s25 = sadd.s32 4294967295, %s4270_s24   ;;  %s4270_s24 = sphi %s4381_s24, %s6347_s24   ;;  %s4266_s23 = sphi %s4379_s23, %s6349_s23   ;;  %s4262_s22 = sphi %s4377_s22, %s6351_s22   ;;  %s4258_s21 = sphi %s4375_s21, %s6350_s21  }
   0x8   : > { %s3689_s26 = sadd.s32 4294967294, %s4270_s24   ;;  %s4400_s27 = sadd.s32 1, %s4270_s24  }
   0x9   : > { %6327 = sst [smem:[#allocation9_spill]] %s4400_s27  ;;  %s377_s28 = sadd.s32 1, %s4266_s23 }
   0xa   : > { %s374_s29 = ssub.s32 %s4270_s24, %s4400_s27  ;;  %p387_p0 = scmp.ne.s32.totalorder %s4266_s23, %s4262_s22 }
   0xb   : > { %p375_p1 = scmp.eq.s32.totalorder %s374_s29, 0  ;;  %p388_p2 = scmp.eq.s32.totalorder %s4396_s25, 1 }
   0xc   : > { %p393_p3 = scmp.ne.s32.totalorder %s4262_s22, %s4258_s21  ;;  %p394_p4 = scmp.eq.s32.totalorder %s3689_s26, 1 }
   0xd   : > { %s4411_s30 = scalar_select %p375_p1, %s4266_s23, %s377_s28  }
   0xe   : > { %p4413_p5 = por %p388_p2, %p387_p0  ;;  %p4417_p6 = por %p394_p4, %p393_p3 }
   0xf   : > { %6328 = sst [smem:[#allocation10_spill]] %s4411_s30  ;;  %p3692_p7 = scmp.ge.s32.totalorder %s4270_s24, 1 }
  0x10   : > { %p465_p8 = scmp.lt.s32.totalorder %s4270_s24, 3 }
  0x12   : > { %p466_p9 = pnand %p3692_p7, %p465_p8 }
  0x13   : > { %p514_p10 = scmp.lt.s32.totalorder (!%p466_p9), %s4396_s25, 1  ;;  %s6331_s28 = sld [smem:[#allocation11_spill]] (!%p466_p9) }
  0x14   : > { %469 = sbr.rel (%p466_p9) target bundleno = 2572 (0xa0c), region = 84  ;;  %s6302_s20 = smov (!%p466_p9), 3  }
  0x15   : > { %s6294_s26 = smov (!%p466_p9), 12   ;;  %s6332_s1 = sld [smem:[#allocation12_spill]] (!%p466_p9) }
  0x16   : > { %s6311_s30 = smov (!%p466_p9), 24   ;;  %s6336_s23 = smov (!%p466_p9), 9  }
  0x17   : > { %s6337_s27 = smov (!%p466_p9), 21   ;;  %s6340_s2 = sld [smem:[#allocation13_spill]] (!%p466_p9) }
  0x19   : > { %s515_s18 = scalar_select %p514_p10, %s4396_s25, 1  ;;  %vm573_vm0 = vcmask 23552   ;;  %vm916_vm1 = vcmask 1046528   ;;  %vm1396_vm2 = vcmask 1045504   ;;  %vm2014_vm3 = vcmask 1042432  }
  0x1a   : > { %vm734_vm4 = vcmask 97352   ;;  %vm865_vm5 = vcmask 171152   ;;  %vm1093_vm6 = vcmask 48152   ;;  %vm1228_vm7 = vcmask 121952  }
  0x1b   : > { %s4145_s19 = smul.u32 432, %s515_s18  ;;  %s6298_s18 = smov 18   ;;  %v1909_v55 = vld [vmem:[%s6332_s1 + $0x18] sm:$0x7]  ;;  %v1908_v56 = vld [vmem:[%s6332_s1 + $0x10] sm:$0xff]  ;;  %v1907_v59 = vld [vmem:[%s6332_s1 + $0x8] sm:$0xff] }
  0x1c   : > { %4137 = vmatprep.subr.msk.mxu1 %vm2014_vm3, %v1909_v55  ;;  %3889 = vmatprep.subr.msk.mxu0 %vm2014_vm3, %v1909_v55  ;;  %v1906_v60 = vld [vmem:[%s6332_s1] sm:$0xff]  ;;  %vm1363_vm8 = vcmask 195752   ;;  %vm1573_vm9 = vcmask 72752   ;;  %vm1707_vm10 = vcmask 146552   ;;  %vm1841_vm11 = vcmask 220352   ;;  %s6343_s1 = smov 32  }
  0x1d   : > { %s4428_s29 = scalar_lea.vmem %s6331_s28, %s4145_s19  ;;  %s6296_s19 = smov 9   ;;  %4141 = vmatpush3.msk.msra.mxu1 %vm2014_vm3, %v1909_v55  ;;  %3890 = vmatpush3.msk.msra.mxu0 %vm2014_vm3, %v1909_v55  ;;  %vm1917_vm12 = vcmask 220160   ;;  %vm2525_vm13 = vcmask 64512   ;;  %vm2527_vm14 = vcmask 58368   ;;  %vm2532_vm15 = vcmask 57344  }
  0x1e   : > { %v4431_v0 = vld [vmem:[%s4428_s29 + $0xf0] sm:$0xff]  ;;  %v4434_v1 = vld [vmem:[%s4428_s29 + $0xd8] sm:$0xff]  ;;  %v4444_v3 = vld [vmem:[%s4428_s29 + $0xe0] sm:$0xff]  ;;  %s6300_s28 = smov 21   ;;  %4138 = vmatprep.subr.mxu1 %v1908_v56  ;;  %3891 = vmatprep.subr.mxu0 %v1908_v56  ;;  %vm2722_vm3 = vcmask 130112  }
  0x1f   : > { %v4437_v2 = vld [vmem:[%s4428_s29 + $0xf8] sm:$0xff]  ;;  %801 = vrot.lane.b32.xlu1 %v4431_v0, %s6298_s18  ;;  %670 = vrot.lane.b32.xlu0 %v4434_v1, %s6296_s19  ;;  %v4447_v4 = vld [vmem:[%s4428_s29 + $0xc8] sm:$0xff]  ;;  %592 = vst.msk [vmem:[#allocation2 + $0x90] sm:$0xff] %vm573_vm0, %v4434_v1  ;;  %594 = vst.msk [vmem:[#allocation2 + $0xa0] sm:$0xff] %vm573_vm0, %v4431_v0  ;;  %v962_v16 = vrot.slane %v4434_v1, 1  ;;  %v963_v17 = vrot.slane %v4444_v3, 1 }
  0x20   : > { %595 = vst.msk [vmem:[#allocation2 + $0xa8] sm:$0xff] %vm573_vm0, %v4437_v2  ;;  %v4456_v5 = vld [vmem:[%s4428_s29 + $0xd0] sm:$0x3]  ;;  %v958_v6 = vrot.slane %v4447_v4, 1  ;;  %v4460_v7 = vld [vmem:[%s4428_s29 + $0xc0] sm:$0xff]  ;;  %v4463_v8 = vld [vmem:[%s4428_s29 + $0x108] sm:$0xff]  ;;  %4142 = vmatpush3.msra.mxu1 %v1908_v56  ;;  %3892 = vmatpush3.msra.mxu0 %v1908_v56 }
  0x21   : > { %591 = vst.msk [vmem:[#allocation2 + $0x88] sm:$0xff] %vm573_vm0, %v4447_v4  ;;  %593 = vst.msk [vmem:[#allocation2 + $0x98] sm:$0xff] %vm573_vm0, %v4444_v3  ;;  %v960_v9 = vrot.slane %v4456_v5, 1  ;;  %v957_v10 = vrot.slane %v4460_v7, 1  ;;  %v4472_v11 = vld [vmem:[%s4428_s29 + $0x110] sm:$0xff]  ;;  %v4479_v12 = vld [vmem:[%s4428_s29 + $0x120] sm:$0xff]  ;;  %v4543_v28 = vsel %vm916_vm1, %v962_v16, %v963_v17  ;;  %4139 = vmatprep.subr.mxu1 %v1907_v59  ;;  %3893 = vmatprep.subr.mxu0 %v1907_v59 }
  0x22   : > { %590 = vst.msk [vmem:[#allocation2 + $0x80] sm:$0xff] %vm573_vm0, %v4460_v7  ;;  %596 = vst.msk [vmem:[#allocation2 + $0xb0] sm:$0xff] %vm573_vm0, %v4463_v8  ;;  %v4488_v13 = vld [vmem:[%s4428_s29 + $0x128] sm:$0xff]  ;;  %v4504_v19 = vld [vmem:[%s4428_s29 + $0x138] sm:$0xff]  ;;  %v1452_v24 = vrot.slane %v4463_v8, 2  ;;  %v1453_v25 = vrot.slane %v4472_v11, 2  ;;  %4143 = vmatpush3.msra.mxu1 %v1907_v59  ;;  %3894 = vmatpush3.msra.mxu0 %v1907_v59 }
  0x23   : > { %597 = vst.msk [vmem:[#allocation2 + $0xb8] sm:$0xff] %vm573_vm0, %v4472_v11  ;;  %803 = vrot.lane.b32.xlu1 %v4437_v2, %s6298_s18  ;;  %672 = vrot.lane.b32.xlu0 %v4444_v3, %s6296_s19  ;;  %598 = vst.msk [vmem:[#allocation2 + $0xc0] sm:$0xff] %vm573_vm0, %v4479_v12  ;;  %v4493_v14 = vsel %vm916_vm1, %v958_v6, %v960_v9  ;;  %v4496_v15 = vsel %vm916_vm1, %v957_v10, %v958_v6  ;;  %v4501_v18 = vld [vmem:[%s4428_s29 + $0xe8] sm:$0x3]  ;;  %v4507_v20 = vld [vmem:[%s4428_s29 + $0x140] sm:$0xff]  ;;  %v967_v29 = vrot.slane %v4431_v0, 1 }
  0x24   : > { %599 = vst.msk [vmem:[#allocation2 + $0xc8] sm:$0xff] %vm573_vm0, %v4488_v13  ;;  %v4512_v21 = vld [vmem:[%s4428_s29 + $0x18] sm:$0xff]  ;;  %600 = vst.msk [vmem:[#allocation2 + $0xd0] sm:$0xff] %vm573_vm0, %v4504_v19  ;;  %v4519_v22 = vld [vmem:[%s4428_s29 + $0x20] sm:$0xff]  ;;  %v968_v30 = vrot.slane %v4437_v2, 1  ;;  %v965_v31 = vrot.slane %v4501_v18, 1  ;;  %v4564_v35 = vsel %vm1396_vm2, %v1452_v24, %v1453_v25  ;;  %4140 = vmatprep.subr.mxu1 %v1906_v60  ;;  %3895 = vmatprep.subr.mxu0 %v1906_v60 }
  0x25   : > { %601 = vst.msk [vmem:[#allocation2 + $0xd8] sm:$0xff] %vm573_vm0, %v4507_v20  ;;  %v4522_v23 = vld [vmem:[%s4428_s29 + $0x30] sm:$0xff]  ;;  %576 = vst.msk [vmem:[#allocation2 + $0x10] sm:$0xff] %vm573_vm0, %v4512_v21  ;;  %v4540_v27 = vld [vmem:[%s4428_s29 + $0x38] sm:$0xff]  ;;  %v1437_v42 = vrot.slane %v4460_v7, 2  ;;  %v1438_v43 = vrot.slane %v4447_v4, 2  ;;  %4144 = vmatpush3.msra.mxu1 %v1906_v60  ;;  %3896 = vmatpush3.msra.mxu0 %v1906_v60 }
  0x26   : > { %577 = vst.msk [vmem:[#allocation2 + $0x18] sm:$0xff] %vm573_vm0, %v4519_v22  ;;  %578 = vst.msk [vmem:[#allocation2 + $0x20] sm:$0xff] %vm573_vm0, %v4522_v23  ;;  %v4537_v26 = vld [vmem:[%s4428_s29 + $0x150] sm:$0xff]  ;;  %v4553_v32 = vld [vmem:[%s4428_s29 + $0x158] sm:$0xff]  ;;  %v4577_v36 = vsel %vm916_vm1, %v967_v29, %v968_v30  ;;  %v4580_v37 = vsel %vm916_vm1, %v963_v17, %v965_v31  ;;  %v1442_v47 = vrot.slane %v4434_v1, 2  ;;  %v1443_v48 = vrot.slane %v4444_v3, 2 }
  0x27   : > { %1031 = vrot.lane.b32.xlu1 %v4493_v14, %s6302_s20  ;;  %1029 = vrot.lane.b32.xlu0 %v4496_v15, %s6302_s20  ;;  %602 = vst.msk [vmem:[#allocation2 + $0xe0] sm:$0xff] %vm573_vm0, %v4537_v26  ;;  %579 = vst.msk [vmem:[#allocation2 + $0x28] sm:$0xff] %vm573_vm0, %v4540_v27  ;;  %v4556_v33 = vld [vmem:[%s4428_s29] sm:$0xff]  ;;  %v4559_v34 = vld [vmem:[%s4428_s29 + $0x8] sm:$0xff]  ;;  %v4604_v45 = vsel %vm1396_vm2, %v1437_v42, %v1438_v43  ;;  %v1440_v49 = vrot.slane %v4456_v5, 2  ;;  %v1447_v52 = vrot.slane %v4431_v0, 2 }
  0x28   : > { %603 = vst.msk [vmem:[#allocation2 + $0xe8] sm:$0xff] %vm573_vm0, %v4553_v32  ;;  %574 = vst.msk [vmem:[#allocation2] sm:$0xff] %vm573_vm0, %v4556_v33  ;;  %v4583_v38 = vld [vmem:[%s4428_s29 + $0x100] sm:$0x3]  ;;  %v917_v39 = vrot.slane %v4556_v33, 1  ;;  %v918_v40 = vrot.slane %v4559_v34, 1  ;;  %v4621_v50 = vsel %vm1396_vm2, %v1442_v47, %v1443_v48 }
  0x29   : > { %575 = vst.msk [vmem:[#allocation2 + $0x8] sm:$0xff] %vm573_vm0, %v4559_v34  ;;  %v970_v44 = vrot.slane %v4583_v38, 1  ;;  %v4624_v51 = vsel %vm1396_vm2, %v1438_v43, %v1440_v49  ;;  %v1448_v53 = vrot.slane %v4437_v2, 2  ;;  %v1445_v54 = vrot.slane %v4501_v18, 2  ;;  %v554_v9 = vld [vmem:[%s4428_s29 + $0x118] sm:$0x3] }
  0x2a   : > { %v4594_v41 = vsel %vm916_vm1, %v917_v39, %v918_v40  ;;  %v1450_v61 = vrot.slane %v4583_v38, 2  ;;  %v972_v62 = vrot.slane %v4463_v8, 1  ;;  %v973_v63 = vrot.slane %v4472_v11, 1  ;;  %v4694_v24 = vld [vmem:[%s4428_s29 + $0x50] sm:$0xff]  ;;  %v4800_v59 = vld [vmem:[%s4428_s29 + $0x68] sm:$0xff] }
  0x2b   : > { %674 = vrot.lane.b32.xlu1 %v4431_v0, %s6296_s19  ;;  %1164 = vrot.lane.b32.xlu0 %v4543_v28, %s6294_s26  ;;  %v4607_v46 = vsel %vm916_vm1, %v968_v30, %v970_v44  ;;  %v4644_v57 = vsel %vm1396_vm2, %v1447_v52, %v1448_v53  ;;  %v4647_v58 = vsel %vm1396_vm2, %v1443_v48, %v1445_v54  ;;  %v4663_v0 = vld [vmem:[%s4428_s29 + $0x48] sm:$0xff]  ;;  %v1397_v10 = vrot.slane %v4556_v33, 2  ;;  %v4697_v29 = vld [vmem:[%s4428_s29 + $0x170] sm:$0xff] }
  0x2c   : > { %580 = vst.msk [vmem:[#allocation2 + $0x30] sm:$0xff] %vm573_vm0, %v4663_v0  ;;  %v1451_v5 = vsel %vm1396_vm2, %v1448_v53, %v1450_v61  ;;  %v974_v6 = vsel %vm916_vm1, %v972_v62, %v973_v63  ;;  %v1398_v16 = vrot.slane %v4559_v34, 2  ;;  %581 = vst.msk [vmem:[#allocation2 + $0x38] sm:$0xff] %vm573_vm0, %v4694_v24  ;;  %v1455_v30 = vrot.slane %v554_v9, 2  ;;  %v557_v39 = vld [vmem:[%s4428_s29 + $0x130] sm:$0x3] }
  0x2d   : > { %605 = vst.msk [vmem:[#allocation2 + $0xf8] sm:$0xff] %vm573_vm0, %v4697_v29  ;;  %v977_v31 = vrot.slane %v4479_v12, 1  ;;  %v978_v33 = vrot.slane %v4488_v13, 1  ;;  %v980_v42 = vrot.slane %v557_v39, 1  ;;  %v1458_v43 = vrot.slane %v4488_v13, 2  ;;  %583 = vst.msk [vmem:[#allocation2 + $0x48] sm:$0xff] %vm573_vm0, %v4800_v59 }
  0x2e   : > { %v4686_v17 = vsel %vm1396_vm2, %v1397_v10, %v1398_v16  ;;  %v1460_v48 = vrot.slane %v557_v39, 2  ;;  %v4789_v54 = vld [vmem:[%s4428_s29 + $0x148] sm:$0x3] }
  0x2f   : > { %1299 = vrot.lane.b32.xlu1 %v4577_v36, %s6300_s28  ;;  %1166 = vrot.lane.b32.xlu0 %v4580_v37, %s6294_s26  ;;  %s6306_s26 = smov 6   ;;  %v4731_v38 = vsel %vm916_vm1, %v977_v31, %v978_v33  ;;  %v985_v55 = vrot.slane %v4789_v54, 1  ;;  %v923_v31 = vrot.slane %v4519_v22, 1 }
  0x30   : > { %v4786_v49 = vsel %vm1396_vm2, %v1458_v43, %v1460_v48 }
  0x33   : > { %805 = vrot.lane.b32.xlu1 %v4463_v8, %s6298_s18  ;;  %676 = vrot.lane.b32.xlu0 %v4437_v2, %s6296_s19  ;;  %s6304_s19 = smov 15   ;;  %v4666_v2 = vld [vmem:[%s4428_s29 + $0x168] sm:$0xff] }
  0x34   : > { %604 = vst.msk [vmem:[#allocation2 + $0xf0] sm:$0xff] %vm573_vm0, %v4666_v2 }
  0x37   : > { %1509 = vrot.lane.b32.xlu1 %v4604_v45, %s6306_s26  ;;  %1301 = vrot.lane.b32.xlu0 %v4607_v46, %s6300_s28  ;;  %s6339_s28 = smov 6  }
  0x3b   : > { %1033 = vrot.lane.b32.xlu1 %v4543_v28, %s6302_s20  ;;  %807 = vrot.lane.b32.xlu0 %v4472_v11, %s6298_s18  ;;  %s6333_s20 = smov 12   ;;  %s6338_s18 = smov 18  }
  0x3f   : > { %1643 = vrot.lane.b32.xlu1 %v4621_v50, %s6304_s19  ;;  %1511 = vrot.lane.b32.xlu0 %v4624_v51, %s6306_s26  ;;  %s6334_s19 = smov 3   ;;  %s6335_s26 = smov 15  }
  0x43   : > { %1168 = vrot.lane.b32.xlu1 %v4577_v36, %s6333_s20  ;;  %1035 = vrot.lane.b32.xlu0 %v4580_v37, %s6334_s19 }
  0x47   : > { %1777 = vrot.lane.b32.xlu1 %v4644_v57, %s6311_s30  ;;  %1645 = vrot.lane.b32.xlu0 %v4647_v58, %s6335_s26 }
  0x4b   : > { %1170 = vrot.lane.b32.xlu1 %v4607_v46, %s6333_s20  ;;  %678 = vrot.lane.b32.xlu0 %v4463_v8, %s6336_s23  ;;  %v975_v8 = vrot.slane %v554_v9, 1 }
  0x4d   : > { %v976_v18 = vsel %vm916_vm1, %v973_v63, %v975_v8  ;;  %v4825_v8 = vld [vmem:[%s4428_s29 + $0x10] sm:$0x3] }
  0x4e   : > { %v920_v10 = vrot.slane %v4825_v8, 1 }
  0x4f   : > { %1779 = vrot.lane.b32.xlu1 %v1451_v5, %s6311_s30  ;;  %1303 = vrot.lane.b32.xlu0 %v974_v6, %s6337_s27 }
  0x53   : > { %809 = vrot.lane.b32.xlu1 %v4479_v12, %s6338_s18  ;;  %680 = vrot.lane.b32.xlu0 %v4472_v11, %s6336_s23  ;;  %v4743_v11 = vsel %vm916_vm1, %v978_v33, %v980_v42  ;;  %v1462_v42 = vrot.slane %v4504_v19, 2 }
  0x57   : > { %1513 = vrot.lane.b32.xlu1 %v4621_v50, %s6339_s28  ;;  %1305 = vrot.lane.b32.xlu0 %v976_v18, %s6337_s27 }
  0x5b   : > { %1037 = vrot.lane.b32.xlu1 %v4577_v36, %s6334_s19  ;;  %811 = vrot.lane.b32.xlu0 %v4488_v13, %s6338_s18  ;;  %v4728_v36 = vsel %vm1396_vm2, %v1453_v25, %v1455_v30  ;;  %v1457_v25 = vrot.slane %v4479_v12, 2 }
  0x5d   : > { %v4761_v44 = vsel %vm1396_vm2, %v1457_v25, %v1458_v43  ;;  %v1463_v25 = vrot.slane %v4507_v20, 2 }
  0x5f   : > { %1647 = vrot.lane.b32.xlu1 %v4644_v57, %s6335_s26  ;;  %1515 = vrot.lane.b32.xlu0 %v4647_v58, %s6339_s28 }
  0x63   : > { %1172 = vrot.lane.b32.xlu1 %v974_v6, %s6333_s20  ;;  %1039 = vrot.lane.b32.xlu0 %v4607_v46, %s6334_s19  ;;  %v982_v46 = vrot.slane %v4504_v19, 1 }
  0x67   : > { %1781 = vrot.lane.b32.xlu1 %v4564_v35, %s6311_s30  ;;  %1649 = vrot.lane.b32.xlu0 %v1451_v5, %s6335_s26 }
  0x6b   : > { %1174 = vrot.lane.b32.xlu1 %v976_v18, %s6333_s20  ;;  %682 = vrot.lane.b32.xlu0 %v4479_v12, %s6336_s23  ;;  %v983_v12 = vrot.slane %v4507_v20, 1 }
  0x6d   : > { %v4779_v47 = vsel %vm916_vm1, %v982_v46, %v983_v12  ;;  %v4810_v60 = vsel %vm916_vm1, %v983_v12, %v985_v55  ;;  %v4862_v12 = vld [vmem:[%s4428_s29 + $0x28] sm:$0x3]  ;;  %v928_v55 = vrot.slane %v4540_v27, 1 }
  0x6f   : > { %1783 = vrot.lane.b32.xlu1 %v4728_v36, %s6311_s30  ;;  %1307 = vrot.lane.b32.xlu0 %v4731_v38, %s6337_s27 }
  0x73   : > { %813 = vrot.lane.b32.xlu1 %v4504_v19, %s6338_s18  ;;  %684 = vrot.lane.b32.xlu0 %v4488_v13, %s6336_s23  ;;  %v4770_v13 = vld [vmem:[%s4428_s29 + $0x60] sm:$0xff] }
  0x74   : > { %582 = vst.msk [vmem:[#allocation2 + $0x40] sm:$0xff] %vm573_vm0, %v4770_v13 }
  0x77   : > { %1517 = vrot.lane.b32.xlu1 %v4644_v57, %s6339_s28  ;;  %1309 = vrot.lane.b32.xlu0 %v4743_v11, %s6337_s27 }
  0x7b   : > { %1041 = vrot.lane.b32.xlu1 %v974_v6, %s6334_s19  ;;  %815 = vrot.lane.b32.xlu0 %v4507_v20, %s6338_s18 }
  0x7f   : > { %1651 = vrot.lane.b32.xlu1 %v4564_v35, %s6335_s26  ;;  %1519 = vrot.lane.b32.xlu0 %v1451_v5, %s6339_s28 }
  0x83   : > { %1176 = vrot.lane.b32.xlu1 %v4731_v38, %s6333_s20  ;;  %1043 = vrot.lane.b32.xlu0 %v976_v18, %s6334_s19 }
  0x87   : > { %1785 = vrot.lane.b32.xlu1 %v4761_v44, %s6311_s30  ;;  %1653 = vrot.lane.b32.xlu0 %v4728_v36, %s6335_s26 }
  0x8b   : > { %686 = vrot.lane.b32.xlu1 %v4504_v19, %s6336_s23  ;;  %638 = vrot.lane.b32.xlu0 %v4512_v21, %s6336_s23  ;;  %v925_v19 = vrot.slane %v4862_v12, 1 }
  0x8f   : > { %1311 = vrot.lane.b32.xlu1 %v4779_v47, %s6337_s27  ;;  %1178 = vrot.lane.b32.xlu0 %v4743_v11, %s6333_s20 }
  0x91   : > { %v802_v52 = vpop.permute.xlu1 %801  ;;  %v671_v53 = vpop.permute.xlu0 %670 }
  0x92   : > { %751 = vst.msk [vmem:[#allocation2 + $0x80] sm:$0xff] %vm734_vm4, %v671_v53  ;;  %v927_v53 = vrot.slane %v4522_v23, 1 }
  0x93   : > { %640 = vrot.lane.b32.xlu1 %v4519_v22, %s6336_s23  ;;  %1787 = vrot.lane.b32.xlu0 %v4786_v49, %s6311_s30  ;;  %882 = vst.msk [vmem:[#allocation2 + $0x80] sm:$0xff] %vm865_vm5, %v802_v52  ;;  %v4881_v52 = vsel %vm916_vm1, %v923_v31, %v925_v19 }
  0x95   : > { %v804_v56 = vpop.permute.xlu1 %803  ;;  %v673_v57 = vpop.permute.xlu0 %672 }
  0x96   : > { %752 = vst.msk [vmem:[#allocation2 + $0x88] sm:$0xff] %vm734_vm4, %v673_v57 }
  0x97   : > { %769 = vrot.lane.b32.xlu1 %v4522_v23, %s6338_s18  ;;  %688 = vrot.lane.b32.xlu0 %v4507_v20, %s6336_s23  ;;  %883 = vst.msk [vmem:[#allocation2 + $0x88] sm:$0xff] %vm865_vm5, %v804_v56 }
  0x99   : > { %v1032_v61 = vpop.permute.xlu1 %1031  ;;  %v1030_v62 = vpop.permute.xlu0 %1029 }
  0x9a   : > { %1111 = vst.msk [vmem:[#allocation2 + $0x88] sm:$0xff] %vm1093_vm6, %v1032_v61  ;;  %1110 = vst.msk [vmem:[#allocation2 + $0x80] sm:$0xff] %vm1093_vm6, %v1030_v62  ;;  %v4892_v61 = vsel %vm916_vm1, %v927_v53, %v928_v55  ;;  %v987_v62 = vrot.slane %v4537_v26, 1 }
  0x9b   : > { %1313 = vrot.lane.b32.xlu1 %v4810_v60, %s6337_s27  ;;  %817 = vrot.lane.b32.xlu0 %v4537_v26, %s6338_s18 }
  0x9d   : > { %v675_v63 = vpop.permute.xlu1 %674  ;;  %v1165_v5 = vpop.permute.xlu0 %1164 }
  0x9e   : > { %753 = vst.msk [vmem:[#allocation2 + $0x90] sm:$0xff] %vm734_vm4, %v675_v63  ;;  %v988_v63 = vrot.slane %v4553_v32, 1 }
  0x9f   : > { %1245 = vst.msk [vmem:[#allocation2 + $0x80] sm:$0xff] %vm1228_vm7, %v1165_v5  ;;  %771 = vrot.lane.b32.xlu1 %v4540_v27, %s6338_s18  ;;  %1521 = vrot.lane.b32.xlu0 %v4564_v35, %s6339_s28  ;;  %v921_v35 = vsel %vm916_vm1, %v918_v40, %v920_v10  ;;  %v1465_v5 = vrot.slane %v4789_v54, 2 }
  0xa0   : > { %v4904_v10 = vsel %vm916_vm1, %v987_v62, %v988_v63 }
  0xa1   : > { %v1300_v6 = vpop.permute.xlu1 %1299  ;;  %v1167_v9 = vpop.permute.xlu0 %1166  ;;  %v4907_v54 = vsel %vm1396_vm2, %v1463_v25, %v1465_v5 }
  0xa2   : > { %1380 = vst.msk [vmem:[#allocation2 + $0x80] sm:$0xff] %vm1363_vm8, %v1300_v6 }
  0xa3   : > { %1246 = vst.msk [vmem:[#allocation2 + $0x88] sm:$0xff] %vm1228_vm7, %v1167_v9  ;;  %819 = vrot.lane.b32.xlu0 %v4553_v32, %s6338_s18  ;;  %997 = vrot.lane.b32.xlu1 %v4594_v41, %s6334_s19  ;;  %v922_v41 = vrot.slane %v4512_v21, 1 }
  0xa5   : > { %v806_v18 = vpop.permute.xlu1 %805  ;;  %v677_v30 = vpop.permute.xlu0 %676 }
  0xa6   : > { %884 = vst.msk [vmem:[#allocation2 + $0x90] sm:$0xff] %vm865_vm5, %v806_v18 }
  0xa7   : > { %754 = vst.msk [vmem:[#allocation2 + $0x98] sm:$0xff] %vm734_vm4, %v677_v30  ;;  %1045 = vrot.lane.b32.xlu0 %v4731_v38, %s6334_s19  ;;  %1523 = vrot.lane.b32.xlu1 %v4728_v36, %s6339_s28  ;;  %v4851_v36 = vsel %vm916_vm1, %v922_v41, %v923_v31 }
  0xa9   : > { %v1510_v33 = vpop.permute.xlu1 %1509  ;;  %v1302_v39 = vpop.permute.xlu0 %1301 }
  0xaa   : > { %1590 = vst.msk [vmem:[#allocation2 + $0x80] sm:$0xff] %vm1573_vm9, %v1510_v33  ;;  %v4917_v33 = vld [vmem:[%s4428_s29 + $0x40] sm:$0x3] }
  0xab   : > { %1381 = vst.msk [vmem:[#allocation2 + $0x88] sm:$0xff] %vm1363_vm8, %v1302_v39  ;;  %1655 = vrot.lane.b32.xlu0 %v4761_v44, %s6335_s26  ;;  %999 = vrot.lane.b32.xlu1 %v921_v35, %s6334_s19  ;;  %v4920_v39 = vld [vmem:[%s4428_s29 + $0x160] sm:$0x3] }
  0xad   : > { %v1034_v40 = vpop.permute.xlu1 %1033  ;;  %v808_v38 = vpop.permute.xlu0 %807 }
  0xae   : > { %1112 = vst.msk [vmem:[#allocation2 + $0x90] sm:$0xff] %vm1093_vm6, %v1034_v40  ;;  %v930_v40 = vrot.slane %v4917_v33, 1 }
  0xaf   : > { %885 = vst.msk [vmem:[#allocation2 + $0x98] sm:$0xff] %vm865_vm5, %v808_v38  ;;  %1047 = vrot.lane.b32.xlu0 %v4743_v11, %s6334_s19  ;;  %1132 = vrot.lane.b32.xlu1 %v4851_v36, %s6333_s20  ;;  %v4871_v11 = vsel %vm1396_vm2, %v1462_v42, %v1463_v25  ;;  %v990_v38 = vrot.slane %v4920_v39, 1 }
  0xb0   : > { %v4943_v19 = vsel %vm916_vm1, %v928_v55, %v930_v40  ;;  %v1467_v40 = vrot.slane %v4537_v26, 2 }
  0xb1   : > { %v1644_v43 = vpop.permute.xlu1 %1643  ;;  %v1512_v46 = vpop.permute.xlu0 %1511 }
  0xb2   : > { %1724 = vst.msk [vmem:[#allocation2 + $0x80] sm:$0xff] %vm1707_vm10, %v1644_v43 }
  0xb3   : > { %1591 = vst.msk [vmem:[#allocation2 + $0x88] sm:$0xff] %vm1573_vm9, %v1512_v46  ;;  %1180 = vrot.lane.b32.xlu0 %v4779_v47, %s6333_s20  ;;  %1657 = vrot.lane.b32.xlu1 %v4786_v49, %s6335_s26  ;;  %v4934_v46 = vld [vmem:[%s4428_s29 + $0x78] sm:$0xff] }
  0xb4   : > { %584 = vst.msk [vmem:[#allocation2 + $0x50] sm:$0xff] %vm573_vm0, %v4934_v46 }
  0xb5   : > { %v1169_v20 = vpop.permute.xlu1 %1168  ;;  %v1036_v48 = vpop.permute.xlu0 %1035 }
  0xb6   : > { %1247 = vst.msk [vmem:[#allocation2 + $0x90] sm:$0xff] %vm1228_vm7, %v1169_v20  ;;  %v4946_v20 = vsel %vm916_vm1, %v988_v63, %v990_v38  ;;  %v4963_v63 = vld [vmem:[%s4428_s29 + $0x80] sm:$0xff]  ;;  %v1468_v38 = vrot.slane %v4553_v32, 2 }
  0xb7   : > { %1113 = vst.msk [vmem:[#allocation2 + $0x98] sm:$0xff] %vm1093_vm6, %v1036_v48  ;;  %1789 = vrot.lane.b32.xlu0 %v4871_v11, %s6311_s30  ;;  %642 = vrot.lane.b32.xlu1 %v4522_v23, %s6336_s23 }
  0xb8   : > { %585 = vst.msk [vmem:[#allocation2 + $0x58] sm:$0xff] %vm573_vm0, %v4963_v63 }
  0xb9   : > { %v1778_v56 = vpop.permute.xlu1 %1777  ;;  %v1646_v57 = vpop.permute.xlu0 %1645 }
  0xba   : > { %1858 = vst.msk [vmem:[#allocation2 + $0x80] sm:$0xff] %vm1841_vm11, %v1778_v56 }
  0xbb   : > { %1725 = vst.msk [vmem:[#allocation2 + $0x88] sm:$0xff] %vm1707_vm10, %v1646_v57  ;;  %690 = vrot.lane.b32.xlu0 %v4537_v26, %s6336_s23  ;;  %1134 = vrot.lane.b32.xlu1 %v4881_v52, %s6333_s20 }
  0xbd   : > { %v1171_v6 = vpop.permute.xlu1 %1170  ;;  %v679_v9 = vpop.permute.xlu0 %678 }
  0xbe   : > { %1248 = vst.msk [vmem:[#allocation2 + $0x98] sm:$0xff] %vm1228_vm7, %v1171_v6  ;;  %v1402_v6 = vrot.slane %v4512_v21, 2 }
  0xbf   : > { %755 = vst.msk [vmem:[#allocation2 + $0xa0] sm:$0xff] %vm734_vm4, %v679_v9  ;;  %1182 = vrot.lane.b32.xlu0 %v4810_v60, %s6333_s20  ;;  %1267 = vrot.lane.b32.xlu1 %v4892_v61, %s6337_s27  ;;  %v1403_v9 = vrot.slane %v4519_v22, 2 }
  0xc1   : > { %v1780_v18 = vpop.permute.xlu1 %1779  ;;  %v1304_v30 = vpop.permute.xlu0 %1303  ;;  %v1890_v35 = vld [vmem:[#allocation2 + $0x80] sm:$0xff] }
  0xc2   : > { %1859 = vst.msk [vmem:[#allocation2 + $0x88] sm:$0xff] %vm1841_vm11, %v1780_v18  ;;  %3921 = vmatprep.mubr.msk.f32.mxu1 %vm1917_vm12, %v1890_v35 }
  0xc3   : > { %1382 = vst.msk [vmem:[#allocation2 + $0x90] sm:$0xff] %vm1363_vm8, %v1304_v30  ;;  %1315 = vrot.lane.b32.xlu0 %v4904_v10, %s6337_s27  ;;  %1791 = vrot.lane.b32.xlu1 %v4907_v54, %s6311_s30 }
  0xc5   : > { %v810_v41 = vpop.permute.xlu1 %809  ;;  %v681_v31 = vpop.permute.xlu0 %680 }
  0xc6   : > { %886 = vst.msk [vmem:[#allocation2 + $0xa0] sm:$0xff] %vm865_vm5, %v810_v41 }
  0xc7   : > { %756 = vst.msk [vmem:[#allocation2 + $0xa8] sm:$0xff] %vm734_vm4, %v681_v31  ;;  %644 = vrot.lane.b32.xlu0 %v4540_v27, %s6336_s23  ;;  %692 = vrot.lane.b32.xlu1 %v4553_v32, %s6336_s23 }
  0xc9   : > { %v1514_v42 = vpop.permute.xlu1 %1513  ;;  %v1306_v25 = vpop.permute.xlu0 %1305  ;;  %v1891_v43 = vld [vmem:[#allocation2 + $0x88] sm:$0xff] }
  0xca   : > { %1592 = vst.msk [vmem:[#allocation2 + $0x90] sm:$0xff] %vm1573_vm9, %v1514_v42  ;;  %3922 = vmatmul.mubr.msk.f32.vlgmr.msra.gmra.mxu1 %vm1917_vm12, %v1891_v43 }
  0xcb   : > { %1383 = vst.msk [vmem:[#allocation2 + $0x98] sm:$0xff] %vm1363_vm8, %v1306_v25  ;;  %773 = vrot.lane.b32.xlu0 %v4663_v0, %s6338_s18  ;;  %821 = vrot.lane.b32.xlu1 %v4666_v2, %s6338_s18 }
  0xcd   : > { %v1038_v48 = vpop.permute.xlu1 %1037  ;;  %v812_v53 = vpop.permute.xlu0 %811 }
  0xce   : > { %1114 = vst.msk [vmem:[#allocation2 + $0xa0] sm:$0xff] %vm1093_vm6, %v1038_v48 }
  0xcf   : > { %887 = vst.msk [vmem:[#allocation2 + $0xa8] sm:$0xff] %vm865_vm5, %v812_v53  ;;  %1269 = vrot.lane.b32.xlu0 %v4943_v19, %s6337_s27  ;;  %1317 = vrot.lane.b32.xlu1 %v4946_v20, %s6337_s27  ;;  %v932_v53 = vrot.slane %v4663_v0, 1 }
  0xd1   : > { %v1648_v56 = vpop.permute.xlu1 %1647  ;;  %v1516_v57 = vpop.permute.xlu0 %1515 }
  0xd2   : > { %1726 = vst.msk [vmem:[#allocation2 + $0x90] sm:$0xff] %vm1707_vm10, %v1648_v56  ;;  %v933_v56 = vrot.slane %v4694_v24, 1 }
  0xd3   : > { %1593 = vst.msk [vmem:[#allocation2 + $0x98] sm:$0xff] %vm1573_vm9, %v1516_v57  ;;  %1477 = vrot.lane.b32.xlu0 %v4686_v17, %s6339_s28  ;;  %1525 = vrot.lane.b32.xlu1 %v4761_v44, %s6339_s28  ;;  %v1400_v17 = vrot.slane %v4825_v8, 2  ;;  %v992_v57 = vrot.slane %v4666_v2, 1 }
  0xd5   : > { %v1173_v55 = vpop.permute.xlu1 %1172  ;;  %v1040_v62 = vpop.permute.xlu0 %1039  ;;  %v1401_v8 = vsel %vm1396_vm2, %v1398_v16, %v1400_v17 }
  0xd6   : > { %1249 = vst.msk [vmem:[#allocation2 + $0xa0] sm:$0xff] %vm1228_vm7, %v1173_v55  ;;  %v993_v55 = vrot.slane %v4697_v29, 1 }
  0xd7   : > { %1115 = vst.msk [vmem:[#allocation2 + $0xa8] sm:$0xff] %vm1093_vm6, %v1040_v62  ;;  %775 = vrot.lane.b32.xlu0 %v4694_v24, %s6338_s18  ;;  %823 = vrot.lane.b32.xlu1 %v4697_v29, %s6338_s18 }
  0xd9   : > { %v1782_v44 = vpop.permute.xlu1 %1781  ;;  %v1650_v5 = vpop.permute.xlu0 %1649 }
  0xda   : > { %1860 = vst.msk [vmem:[#allocation2 + $0x90] sm:$0xff] %vm1841_vm11, %v1782_v44  ;;  %v5054_v44 = vsel %vm916_vm1, %v932_v53, %v933_v56 }
  0xdb   : > { %1727 = vst.msk [vmem:[#allocation2 + $0x98] sm:$0xff] %vm1707_vm10, %v1650_v5  ;;  %1001 = vrot.lane.b32.xlu0 %v4851_v36, %s6334_s19  ;;  %1049 = vrot.lane.b32.xlu1 %v4779_v47, %s6334_s19  ;;  %v4989_v47 = vsel %vm1396_vm2, %v1402_v6, %v1403_v9  ;;  %v5057_v5 = vsel %vm916_vm1, %v992_v57, %v993_v55  ;;  %v1410_v6 = vrot.slane %v4917_v33, 2 }
  0xdd   : > { %v1175_v18 = vpop.permute.xlu1 %1174  ;;  %v683_v30 = vpop.permute.xlu0 %682 }
  0xde   : > { %1250 = vst.msk [vmem:[#allocation2 + $0xa8] sm:$0xff] %vm1228_vm7, %v1175_v18 }
  0xdf   : > { %757 = vst.msk [vmem:[#allocation2 + $0xb0] sm:$0xff] %vm734_vm4, %v683_v30  ;;  %1479 = vrot.lane.b32.xlu0 %v1401_v8, %s6339_s28  ;;  %1527 = vrot.lane.b32.xlu1 %v4786_v49, %s6339_s28  ;;  %v1405_v49 = vrot.slane %v4862_v12, 2  ;;  %v1408_v12 = vrot.slane %v4540_v27, 2  ;;  %v5029_v27 = vsel %vm1396_vm2, %v1467_v40, %v1468_v38 }
  0xe1   : > { %v1784_v21 = vpop.permute.xlu1 %1783  ;;  %v1308_v22 = vpop.permute.xlu0 %1307  ;;  %v1892_v36 = vld [vmem:[#allocation2 + $0x90] sm:$0xff]  ;;  %v5068_v30 = vsel %vm1396_vm2, %v1408_v12, %v1410_v6 }
  0xe2   : > { %1861 = vst.msk [vmem:[#allocation2 + $0x98] sm:$0xff] %vm1841_vm11, %v1784_v21  ;;  %3924 = vmatprep.mubr.msk.f32.mxu1 %vm1917_vm12, %v1892_v36 }
  0xe3   : > { %1384 = vst.msk [vmem:[#allocation2 + $0xa0] sm:$0xff] %vm1363_vm8, %v1308_v22  ;;  %1611 = vrot.lane.b32.xlu0 %v4989_v47, %s6335_s26  ;;  %1659 = vrot.lane.b32.xlu1 %v4871_v11, %s6335_s26 }
  0xe5   : > { %v814_v34 = vpop.permute.xlu1 %813  ;;  %v685_v16 = vpop.permute.xlu0 %684 }
  0xe6   : > { %888 = vst.msk [vmem:[#allocation2 + $0xb0] sm:$0xff] %vm865_vm5, %v814_v34 }
  0xe7   : > { %758 = vst.msk [vmem:[#allocation2 + $0xb8] sm:$0xff] %vm734_vm4, %v685_v16  ;;  %1003 = vrot.lane.b32.xlu0 %v4881_v52, %s6334_s19  ;;  %1051 = vrot.lane.b32.xlu1 %v4810_v60, %s6334_s19  ;;  %v5013_v52 = vsel %vm1396_vm2, %v1403_v9, %v1405_v49  ;;  %v1407_v60 = vrot.slane %v4522_v23, 2  ;;  %v1470_v9 = vrot.slane %v4920_v39, 2  ;;  %v5081_v16 = vld [vmem:[%s4428_s29 + $0x58] sm:$0x3] }
  0xe8   : > { %v5084_v49 = vld [vmem:[%s4428_s29 + $0x178] sm:$0x3] }
  0xe9   : > { %v1518_v35 = vpop.permute.xlu1 %1517  ;;  %v1310_v41 = vpop.permute.xlu0 %1309  ;;  %v1893_v31 = vld [vmem:[#allocation2 + $0x98] sm:$0xff]  ;;  %v5026_v23 = vsel %vm1396_vm2, %v1407_v60, %v1408_v12  ;;  %v5071_v33 = vsel %vm1396_vm2, %v1468_v38, %v1470_v9  ;;  %v995_v60 = vrot.slane %v5084_v49, 1 }
  0xea   : > { %1594 = vst.msk [vmem:[#allocation2 + $0xa0] sm:$0xff] %vm1573_vm9, %v1518_v35  ;;  %3925 = vmatmul.mubr.msk.f32.gmra.mxu1 %vm1917_vm12, %v1893_v31  ;;  %v5089_v35 = vld [vmem:[%s4428_s29 + $0x90] sm:$0xff]  ;;  %v935_v31 = vrot.slane %v5081_v16, 1 }
  0xeb   : > { %1385 = vst.msk [vmem:[#allocation2 + $0xa8] sm:$0xff] %vm1363_vm8, %v1310_v41  ;;  %1136 = vrot.lane.b32.xlu0 %v4892_v61, %s6333_s20  ;;  %1184 = vrot.lane.b32.xlu1 %v4904_v10, %s6333_s20  ;;  %v5098_v41 = vld [vmem:[%s4428_s29 + $0x180] sm:$0xff] }
  0xec   : > { %586 = vst.msk [vmem:[#allocation2 + $0x60] sm:$0xff] %vm573_vm0, %v5089_v35  ;;  %v5109_v38 = vsel %vm916_vm1, %v933_v56, %v935_v31  ;;  %v5133_v56 = vld [vmem:[%s4428_s29 + $0x188] sm:$0xff] }
  0xed   : > { %v1042_v42 = vpop.permute.xlu1 %1041  ;;  %v816_v25 = vpop.permute.xlu0 %815 }
  0xee   : > { %1116 = vst.msk [vmem:[#allocation2 + $0xb0] sm:$0xff] %vm1093_vm6, %v1042_v42  ;;  %v5112_v42 = vsel %vm916_vm1, %v993_v55, %v995_v60  ;;  %v1127_v60 = vrot.slane %v5098_v41, 1 }
  0xef   : > { %889 = vst.msk [vmem:[#allocation2 + $0xb8] sm:$0xff] %vm865_vm5, %v816_v25  ;;  %1613 = vrot.lane.b32.xlu0 %v5013_v52, %s6335_s26  ;;  %1661 = vrot.lane.b32.xlu1 %v4907_v54, %s6335_s26 }
  0xf1   : > { %v1652_v26 = vpop.permute.xlu1 %1651  ;;  %v1520_v32 = vpop.permute.xlu0 %1519 }
  0xf2   : > { %1728 = vst.msk [vmem:[#allocation2 + $0xa0] sm:$0xff] %vm1707_vm10, %v1652_v26 }
  0xf3   : > { %1595 = vst.msk [vmem:[#allocation2 + $0xa8] sm:$0xff] %vm1573_vm9, %v1520_v32  ;;  %1745 = vrot.lane.b32.xlu0 %v5026_v23, %s6311_s30  ;;  %1793 = vrot.lane.b32.xlu1 %v5029_v27, %s6311_s30 }
  0xf5   : > { %v1177_v43 = vpop.permute.xlu1 %1176  ;;  %v1044_v48 = vpop.permute.xlu0 %1043 }
  0xf6   : > { %1251 = vst.msk [vmem:[#allocation2 + $0xb0] sm:$0xff] %vm1228_vm7, %v1177_v43  ;;  %v5118_v43 = vld [vmem:[%s4428_s29 + $0x98] sm:$0xff] }
  0xf7   : > { %1117 = vst.msk [vmem:[#allocation2 + $0xb8] sm:$0xff] %vm1093_vm6, %v1044_v48  ;;  %646 = vrot.lane.b32.xlu0 %v4663_v0, %s6336_s23  ;;  %694 = vrot.lane.b32.xlu1 %v4666_v2, %s6336_s23 }
  0xf8   : > { %587 = vst.msk [vmem:[#allocation2 + $0x68] sm:$0xff] %vm573_vm0, %v5118_v43 }
  0xf9   : > { %v1786_v62 = vpop.permute.xlu1 %1785  ;;  %v1654_v17 = vpop.permute.xlu0 %1653 }
  0xfa   : > { %1862 = vst.msk [vmem:[#allocation2 + $0xa0] sm:$0xff] %vm1841_vm11, %v1786_v62 }
  0xfb   : > { %1729 = vst.msk [vmem:[#allocation2 + $0xa8] sm:$0xff] %vm1707_vm10, %v1654_v17  ;;  %1138 = vrot.lane.b32.xlu0 %v4943_v19, %s6333_s20  ;;  %1186 = vrot.lane.b32.xlu1 %v4946_v20, %s6333_s20 }
  0xfd   : > { %v687_v8 = vpop.permute.xlu1 %686  ;;  %v639_v18 = vpop.permute.xlu0 %638 }
  0xfe   : > { %759 = vst.msk [vmem:[#allocation2 + $0xc0] sm:$0xff] %vm734_vm4, %v687_v8  ;;  %735 = vst.msk [vmem:[#allocation2] sm:$0xff] %vm734_vm4, %v639_v18  ;;  %v1412_v8 = vrot.slane %v4663_v0, 2  ;;  %v1413_v18 = vrot.slane %v4694_v24, 2 }
  0xff   : > { %1271 = vrot.lane.b32.xlu0 %v5054_v44, %s6337_s27  ;;  %1319 = vrot.lane.b32.xlu1 %v5057_v5, %s6337_s27 }
 0x100   : > { %v5182_v0 = vsel %vm1396_vm2, %v1412_v8, %v1413_v18  ;;  %v5260_v8 = vld [vmem:[%s4428_s29 + $0x198] sm:$0xff] }
 0x101   : > { %v1312_v39 = vpop.permute.xlu1 %1311  ;;  %v1179_v21 = vpop.permute.xlu0 %1178  ;;  %v1894_v22 = vld [vmem:[#allocation2 + $0xa0] sm:$0xff] }
 0x102   : > { %1386 = vst.msk [vmem:[#allocation2 + $0xb0] sm:$0xff] %vm1363_vm8, %v1312_v39  ;;  %3927 = vmatprep.mubr.msk.f32.mxu1 %vm1917_vm12, %v1894_v22 }
 0x103   : > { %1252 = vst.msk [vmem:[#allocation2 + $0xb8] sm:$0xff] %vm1228_vm7, %v1179_v21  ;;  %1747 = vrot.lane.b32.xlu0 %v5068_v30, %s6311_s30  ;;  %1795 = vrot.lane.b32.xlu1 %v5071_v33, %s6311_s30 }
 0x105   : > { %v641_v36 = vpop.permute.xlu1 %640  ;;  %v1788_v34 = vpop.permute.xlu0 %1787 }
 0x106   : > { %736 = vst.msk [vmem:[#allocation2 + $0x8] sm:$0xff] %vm734_vm4, %v641_v36  ;;  %v5191_v36 = vld [vmem:[%s4428_s29 + $0xa8] sm:$0xff] }
 0x107   : > { %1863 = vst.msk [vmem:[#allocation2 + $0xa8] sm:$0xff] %vm1841_vm11, %v1788_v34  ;;  %648 = vrot.lane.b32.xlu0 %v4694_v24, %s6336_s23  ;;  %696 = vrot.lane.b32.xlu1 %v4697_v29, %s6336_s23 }
 0x108   : > { %588 = vst.msk [vmem:[#allocation2 + $0x70] sm:$0xff] %vm573_vm0, %v5191_v36 }
 0x109   : > { %v770_v12 = vpop.permute.xlu1 %769  ;;  %v689_v40 = vpop.permute.xlu0 %688 }
 0x10a   : > { %866 = vst.msk [vmem:[#allocation2] sm:$0xff] %vm865_vm5, %v770_v12  ;;  %v1128_v12 = vrot.slane %v5133_v56, 1 }
 0x10b   : > { %760 = vst.msk [vmem:[#allocation2 + $0xc8] sm:$0xff] %vm734_vm4, %v689_v40  ;;  %777 = vrot.lane.b32.xlu0 %v4770_v13, %s6338_s18  ;;  %825 = vrot.lane.b32.xlu1 %v5098_v41, %s6338_s18  ;;  %v937_v40 = vrot.slane %v4770_v13, 1 }
 0x10d   : > { %v1314_v25 = vpop.permute.xlu1 %1313  ;;  %v818_v26 = vpop.permute.xlu0 %817 }
 0x10e   : > { %v1895_v32 = vld [vmem:[#allocation2 + $0xa8] sm:$0xff]  ;;  %1387 = vst.msk [vmem:[#allocation2 + $0xb8] sm:$0xff] %vm1363_vm8, %v1314_v25  ;;  %v938_v25 = vrot.slane %v4800_v59, 1 }
 0x10f   : > { %890 = vst.msk [vmem:[#allocation2 + $0xc0] sm:$0xff] %vm865_vm5, %v818_v26  ;;  %3928 = vmatmul.mubr.msk.f32.gmra.mxu1 %vm1917_vm12, %v1895_v32  ;;  %1273 = vrot.lane.b32.xlu0 %v5109_v38, %s6337_s27 }
 0x110   : > { %1321 = vrot.lane.b32.xlu1 %v5112_v42, %s6337_s27 }
 0x111   : > { %v772_v48 = vpop.permute.xlu1 %771  ;;  %v1522_v53 = vpop.permute.xlu0 %1521 }
 0x112   : > { %867 = vst.msk [vmem:[#allocation2 + $0x8] sm:$0xff] %vm865_vm5, %v772_v48  ;;  %v5212_v48 = vld [vmem:[%s4428_s29 + $0xb0] sm:$0xff] }
 0x113   : > { %1596 = vst.msk [vmem:[#allocation2 + $0xb0] sm:$0xff] %vm1573_vm9, %v1522_v53  ;;  %1481 = vrot.lane.b32.xlu0 %v4989_v47, %s6339_s28  ;;  %v5221_v53 = vsel %vm916_vm1, %v937_v40, %v938_v25 }
 0x114   : > { %1529 = vrot.lane.b32.xlu1 %v4871_v11, %s6339_s28  ;;  %589 = vst.msk [vmem:[#allocation2 + $0x78] sm:$0xff] %vm573_vm0, %v5212_v48  ;;  %vm2622_vm0 = vcmask 261312  }
 0x115   : > { %v820_v57 = vpop.permute.xlu0 %819  ;;  %v998_v55 = vpop.permute.xlu1 %997 }
 0x116   : > { %891 = vst.msk [vmem:[#allocation2 + $0xc8] sm:$0xff] %vm865_vm5, %v820_v57  ;;  %v5224_v57 = vsel %vm916_vm1, %v1127_v60, %v1128_v12  ;;  %v5289_v60 = vld [vmem:[%s4428_s29 + $0x1a0] sm:$0xff] }
 0x117   : > { %1094 = vst.msk [vmem:[#allocation2] sm:$0xff] %vm1093_vm6, %v998_v55  ;;  %779 = vrot.lane.b32.xlu0 %v4800_v59, %s6338_s18  ;;  %v1415_v55 = vrot.slane %v5081_v16, 2 }
 0x118   : > { %827 = vrot.lane.b32.xlu1 %v5133_v56, %s6338_s18 }
 0x119   : > { %v1046_v62 = vpop.permute.xlu0 %1045  ;;  %v1524_v17 = vpop.permute.xlu1 %1523  ;;  %v5236_v16 = vsel %vm1396_vm2, %v1413_v18, %v1415_v55 }
 0x11a   : > { %1118 = vst.msk [vmem:[#allocation2 + $0xc0] sm:$0xff] %vm1093_vm6, %v1046_v62  ;;  %v1475_v62 = vrot.slane %v5084_v49, 2 }
 0x11b   : > { %1597 = vst.msk [vmem:[#allocation2 + $0xb8] sm:$0xff] %vm1573_vm9, %v1524_v17  ;;  %1005 = vrot.lane.b32.xlu0 %v4892_v61, %s6334_s19 }
 0x11c   : > { %1053 = vrot.lane.b32.xlu1 %v4904_v10, %s6334_s19 }
 0x11d   : > { %v1656_v11 = vpop.permute.xlu0 %1655  ;;  %v1000_v47 = vpop.permute.xlu1 %999 }
 0x11e   : > { %1730 = vst.msk [vmem:[#allocation2 + $0xb0] sm:$0xff] %vm1707_vm10, %v1656_v11 }
 0x11f   : > { %1095 = vst.msk [vmem:[#allocation2 + $0x8] sm:$0xff] %vm1093_vm6, %v1000_v47  ;;  %1483 = vrot.lane.b32.xlu0 %v5013_v52, %s6339_s28 }
 0x120   : > { %1531 = vrot.lane.b32.xlu1 %v4907_v54, %s6339_s28 }
 0x121   : > { %v1048_v6 = vpop.permute.xlu0 %1047  ;;  %v1133_v9 = vpop.permute.xlu1 %1132 }
 0x122   : > { %1119 = vst.msk [vmem:[#allocation2 + $0xc8] sm:$0xff] %vm1093_vm6, %v1048_v6 }
 0x123   : > { %1229 = vst.msk [vmem:[#allocation2] sm:$0xff] %vm1228_vm7, %v1133_v9  ;;  %1615 = vrot.lane.b32.xlu0 %v5026_v23, %s6335_s26 }
 0x124   : > { %1663 = vrot.lane.b32.xlu1 %v5029_v27, %s6335_s26 }
 0x125   : > { %v1181_v61 = vpop.permute.xlu0 %1180  ;;  %v1658_v10 = vpop.permute.xlu1 %1657 }
 0x126   : > { %1253 = vst.msk [vmem:[#allocation2 + $0xc0] sm:$0xff] %vm1228_vm7, %v1181_v61 }
 0x127   : > { %1731 = vst.msk [vmem:[#allocation2 + $0xb8] sm:$0xff] %vm1707_vm10, %v1658_v10  ;;  %1007 = vrot.lane.b32.xlu0 %v4943_v19, %s6334_s19  ;;  %v1472_v19 = vrot.slane %v4666_v2, 2 }
 0x128   : > { %1055 = vrot.lane.b32.xlu1 %v4946_v20, %s6334_s19  ;;  %v1473_v20 = vrot.slane %v4697_v29, 2 }
 0x129   : > { %v1790_v54 = vpop.permute.xlu0 %1789  ;;  %v643_v52 = vpop.permute.xlu1 %642 }
 0x12a   : > { %1864 = vst.msk [vmem:[#allocation2 + $0xb0] sm:$0xff] %vm1841_vm11, %v1790_v54  ;;  %v5185_v2 = vsel %vm1396_vm2, %v1472_v19, %v1473_v20  ;;  %v5239_v49 = vsel %vm1396_vm2, %v1473_v20, %v1475_v62  ;;  %v5248_v54 = vld [vmem:[%s4428_s29 + $0x70] sm:$0x3]  ;;  %v1606_v62 = vrot.slane %v5098_v41, 2 }
 0x12b   : > { %737 = vst.msk [vmem:[#allocation2 + $0x10] sm:$0xff] %vm734_vm4, %v643_v52  ;;  %1140 = vrot.lane.b32.xlu0 %v5054_v44, %s6333_s20  ;;  %v5251_v52 = vld [vmem:[%s4428_s29 + $0x190] sm:$0x3]  ;;  %v940_v18 = vrot.slane %v5248_v54, 1 }
 0x12c   : > { %1188 = vrot.lane.b32.xlu1 %v5057_v5, %s6333_s20  ;;  %v1130_v19 = vrot.slane %v5251_v52, 1 }
 0x12d   : > { %v691_v39 = vpop.permute.xlu0 %690  ;;  %v1135_v21 = vpop.permute.xlu1 %1134 }
 0x12e   : > { %761 = vst.msk [vmem:[#allocation2 + $0xd0] sm:$0xff] %vm734_vm4, %v691_v39 }
 0x12f   : > { %1230 = vst.msk [vmem:[#allocation2 + $0x8] sm:$0xff] %vm1228_vm7, %v1135_v21  ;;  %1617 = vrot.lane.b32.xlu0 %v5068_v30, %s6335_s26  ;;  %v5271_v21 = vsel %vm916_vm1, %v938_v25, %v940_v18 }
 0x130   : > { %1665 = vrot.lane.b32.xlu1 %v5071_v33, %s6335_s26 }
 0x131   : > { %v1183_v24 = vpop.permute.xlu0 %1182  ;;  %v1268_v29 = vpop.permute.xlu1 %1267  ;;  %v1896_v22 = vld [vmem:[#allocation2 + $0xb0] sm:$0xff] }
 0x132   : > { %1254 = vst.msk [vmem:[#allocation2 + $0xc8] sm:$0xff] %vm1228_vm7, %v1183_v24  ;;  %3930 = vmatprep.mubr.msk.f32.mxu1 %vm1917_vm12, %v1896_v22  ;;  %v5274_v24 = vsel %vm916_vm1, %v1128_v12, %v1130_v19  ;;  %v1262_v19 = vrot.slane %v5260_v8, 1 }
 0x133   : > { %1364 = vst.msk [vmem:[#allocation2] sm:$0xff] %vm1363_vm8, %v1268_v29  ;;  %1749 = vrot.lane.b32.xlu0 %v5182_v0, %s6311_s30 }
 0x134   : > { %1797 = vrot.lane.b32.xlu1 %v5185_v2, %s6311_s30 }
 0x135   : > { %v1316_v34 = vpop.permute.xlu0 %1315  ;;  %v1792_v31 = vpop.permute.xlu1 %1791 }
 0x136   : > { %1388 = vst.msk [vmem:[#allocation2 + $0xc0] sm:$0xff] %vm1363_vm8, %v1316_v34 }
 0x137   : > { %1865 = vst.msk [vmem:[#allocation2 + $0xb8] sm:$0xff] %vm1841_vm11, %v1792_v31  ;;  %650 = vrot.lane.b32.xlu0 %v4770_v13, %s6336_s23 }
 0x138   : > { %698 = vrot.lane.b32.xlu1 %v5098_v41, %s6336_s23 }
 0x139   : > { %v645_v26 = vpop.permute.xlu0 %644  ;;  %v693_v32 = vpop.permute.xlu1 %692 }
 0x13a   : > { %738 = vst.msk [vmem:[#allocation2 + $0x18] sm:$0xff] %vm734_vm4, %v645_v26  ;;  %762 = vst.msk [vmem:[#allocation2 + $0xd8] sm:$0xff] %vm734_vm4, %v693_v32 }
 0x13b   : > { %1142 = vrot.lane.b32.xlu0 %v5109_v38, %s6333_s20 }
 0x13c   : > { %1190 = vrot.lane.b32.xlu1 %v5112_v42, %s6333_s20 }
 0x13d   : > { %v774_v17 = vpop.permute.xlu0 %773  ;;  %v822_v11 = vpop.permute.xlu1 %821 }
 0x13e   : > { %v1897_v47 = vld [vmem:[#allocation2 + $0xb8] sm:$0xff]  ;;  %868 = vst.msk [vmem:[#allocation2 + $0x10] sm:$0xff] %vm865_vm5, %v774_v17  ;;  %892 = vst.msk [vmem:[#allocation2 + $0xd0] sm:$0xff] %vm865_vm5, %v822_v11  ;;  %v1607_v17 = vrot.slane %v5133_v56, 2 }
 0x13f   : > { %3931 = vmatmul.mubr.msk.f32.gmra.mxu1 %vm1917_vm12, %v1897_v47  ;;  %1275 = vrot.lane.b32.xlu0 %v5221_v53, %s6337_s27 }
 0x140   : > { %1323 = vrot.lane.b32.xlu1 %v5224_v57, %s6337_s27 }
 0x141   : > { %v1270_v6 = vpop.permute.xlu0 %1269  ;;  %v1318_v9 = vpop.permute.xlu1 %1317 }
 0x142   : > { %1365 = vst.msk [vmem:[#allocation2 + $0x8] sm:$0xff] %vm1363_vm8, %v1270_v6  ;;  %1389 = vst.msk [vmem:[#allocation2 + $0xc8] sm:$0xff] %vm1363_vm8, %v1318_v9 }
 0x143   : > { %1751 = vrot.lane.b32.xlu0 %v5236_v16, %s6311_s30 }
 0x144   : > { %1799 = vrot.lane.b32.xlu1 %v5239_v49, %s6311_s30 }
 0x145   : > { %v1478_v61 = vpop.permute.xlu0 %1477  ;;  %v1526_v10 = vpop.permute.xlu1 %1525 }
 0x146   : > { %1574 = vst.msk [vmem:[#allocation2] sm:$0xff] %vm1573_vm9, %v1478_v61  ;;  %1598 = vst.msk [vmem:[#allocation2 + $0xc0] sm:$0xff] %vm1573_vm9, %v1526_v10  ;;  %v943_v61 = vrot.slane %v4963_v63, 1 }
 0x147   : > { %652 = vrot.lane.b32.xlu0 %v4800_v59, %s6336_s23 }
 0x148   : > { %700 = vrot.lane.b32.xlu1 %v5133_v56, %s6336_s23 }
 0x149   : > { %v776_v20 = vpop.permute.xlu0 %775  ;;  %v824_v39 = vpop.permute.xlu1 %823 }
 0x14a   : > { %869 = vst.msk [vmem:[#allocation2 + $0x18] sm:$0xff] %vm865_vm5, %v776_v20  ;;  %893 = vst.msk [vmem:[#allocation2 + $0xd8] sm:$0xff] %vm865_vm5, %v824_v39  ;;  %v1263_v20 = vrot.slane %v5289_v60, 1 }
 0x14b   : > { %781 = vrot.lane.b32.xlu0 %v4934_v46, %s6338_s18 }
 0x14c   : > { %829 = vrot.lane.b32.xlu1 %v5260_v8, %s6338_s18 }
 0x14d   : > { %v1002_v29 = vpop.permute.xlu0 %1001  ;;  %v1050_v22 = vpop.permute.xlu1 %1049 }
 0x14e   : > { %1096 = vst.msk [vmem:[#allocation2 + $0x10] sm:$0xff] %vm1093_vm6, %v1002_v29  ;;  %1120 = vst.msk [vmem:[#allocation2 + $0xd0] sm:$0xff] %vm1093_vm6, %v1050_v22  ;;  %v1420_v29 = vrot.slane %v5248_v54, 2 }
 0x14f   : > { %1277 = vrot.lane.b32.xlu0 %v5271_v21, %s6337_s27 }
 0x150   : > { %1325 = vrot.lane.b32.xlu1 %v5274_v24, %s6337_s27 }
 0x151   : > { %v1480_v34 = vpop.permute.xlu0 %1479  ;;  %v1528_v31 = vpop.permute.xlu1 %1527 }
 0x152   : > { %1575 = vst.msk [vmem:[#allocation2 + $0x8] sm:$0xff] %vm1573_vm9, %v1480_v34  ;;  %1599 = vst.msk [vmem:[#allocation2 + $0xc8] sm:$0xff] %vm1573_vm9, %v1528_v31  ;;  %v1264_v31 = vsel %vm916_vm1, %v1262_v19, %v1263_v20 }
 0x153   : > { %1485 = vrot.lane.b32.xlu0 %v5026_v23, %s6339_s28 }
 0x154   : > { %1533 = vrot.lane.b32.xlu1 %v5029_v27, %s6339_s28 }
 0x155   : > { %v1612_v12 = vpop.permute.xlu0 %1611  ;;  %v1660_v40 = vpop.permute.xlu1 %1659 }
 0x156   : > { %1708 = vst.msk [vmem:[#allocation2] sm:$0xff] %vm1707_vm10, %v1612_v12  ;;  %1732 = vst.msk [vmem:[#allocation2 + $0xc0] sm:$0xff] %vm1707_vm10, %v1660_v40  ;;  %v1609_v40 = vrot.slane %v5251_v52, 2 }
 0x157   : > { %783 = vrot.lane.b32.xlu0 %v4963_v63, %s6338_s18 }
 0x158   : > { %831 = vrot.lane.b32.xlu1 %v5289_v60, %s6338_s18  ;;  %v5387_v52 = vsel %vm1396_vm2, %v1607_v17, %v1609_v40 }
 0x159   : > { %v1004_v25 = vpop.permute.xlu0 %1003  ;;  %v1052_v26 = vpop.permute.xlu1 %1051 }
 0x15a   : > { %1097 = vst.msk [vmem:[#allocation2 + $0x18] sm:$0xff] %vm1093_vm6, %v1004_v25  ;;  %1121 = vst.msk [vmem:[#allocation2 + $0xd8] sm:$0xff] %vm1093_vm6, %v1052_v26 }
 0x15b   : > { %1009 = vrot.lane.b32.xlu0 %v5054_v44, %s6334_s19 }
 0x15c   : > { %1057 = vrot.lane.b32.xlu1 %v5057_v5, %s6334_s19 }
 0x15d   : > { %v1137_v23 = vpop.permute.xlu0 %1136  ;;  %v1185_v27 = vpop.permute.xlu1 %1184 }
 0x15e   : > { %1231 = vst.msk [vmem:[#allocation2 + $0x10] sm:$0xff] %vm1228_vm7, %v1137_v23  ;;  %1255 = vst.msk [vmem:[#allocation2 + $0xd0] sm:$0xff] %vm1228_vm7, %v1185_v27  ;;  %v5377_v27 = vld [vmem:[%s4428_s29 + $0x88] sm:$0x3] }
 0x15f   : > { %1487 = vrot.lane.b32.xlu0 %v5068_v30, %s6339_s28 }
 0x160   : > { %1535 = vrot.lane.b32.xlu1 %v5071_v33, %s6339_s28 }
 0x161   : > { %v1614_v32 = vpop.permute.xlu0 %1613  ;;  %v1662_v55 = vpop.permute.xlu1 %1661 }
 0x162   : > { %1709 = vst.msk [vmem:[#allocation2 + $0x8] sm:$0xff] %vm1707_vm10, %v1614_v32  ;;  %1733 = vst.msk [vmem:[#allocation2 + $0xc8] sm:$0xff] %vm1707_vm10, %v1662_v55 }
 0x163   : > { %1619 = vrot.lane.b32.xlu0 %v5182_v0, %s6335_s26 }
 0x164   : > { %1667 = vrot.lane.b32.xlu1 %v5185_v2, %s6335_s26 }
 0x165   : > { %v1746_v44 = vpop.permute.xlu0 %1745  ;;  %v1794_v5 = vpop.permute.xlu1 %1793 }
 0x166   : > { %1842 = vst.msk [vmem:[#allocation2] sm:$0xff] %vm1841_vm11, %v1746_v44  ;;  %1866 = vst.msk [vmem:[#allocation2 + $0xc0] sm:$0xff] %vm1841_vm11, %v1794_v5  ;;  %v5391_v44 = vld [vmem:[%s4428_s29 + $0x1a8] sm:$0x3] }
 0x167   : > { %1011 = vrot.lane.b32.xlu0 %v5109_v38, %s6334_s19  ;;  %v1417_v38 = vrot.slane %v4770_v13, 2 }
 0x168   : > { %1059 = vrot.lane.b32.xlu1 %v5112_v42, %s6334_s19  ;;  %v1418_v42 = vrot.slane %v4800_v59, 2  ;;  %v5343_v59 = vsel %vm1396_vm2, %v1606_v62, %v1607_v17 }
 0x169   : > { %v647_v30 = vpop.permute.xlu0 %646  ;;  %v695_v33 = vpop.permute.xlu1 %694 }
 0x16a   : > { %739 = vst.msk [vmem:[#allocation2 + $0x20] sm:$0xff] %vm734_vm4, %v647_v30  ;;  %763 = vst.msk [vmem:[#allocation2 + $0xe0] sm:$0xff] %vm734_vm4, %v695_v33  ;;  %v5340_v13 = vsel %vm1396_vm2, %v1417_v38, %v1418_v42  ;;  %v5373_v12 = vsel %vm1396_vm2, %v1418_v42, %v1420_v29  ;;  %v1265_v30 = vrot.slane %v5391_v44, 1  ;;  %v1425_v29 = vrot.slane %v5377_v27, 2 }
 0x16b   : > { %1144 = vrot.lane.b32.xlu0 %v5221_v53, %s6333_s20 }
 0x16c   : > { %1192 = vrot.lane.b32.xlu1 %v5224_v57, %s6333_s20  ;;  %v942_v57 = vrot.slane %v4934_v46, 1  ;;  %v1266_v17 = vsel %vm916_vm1, %v1263_v20, %v1265_v30 }
 0x16d   : > { %v1139_v11 = vpop.permute.xlu0 %1138  ;;  %v1187_v47 = vpop.permute.xlu1 %1186  ;;  %v1874_v6 = vld [vmem:[#allocation2] sm:$0xff] }
 0x16e   : > { %v1898_v9 = vld [vmem:[#allocation2 + $0xc0] sm:$0xff]  ;;  %1232 = vst.msk [vmem:[#allocation2 + $0x18] sm:$0xff] %vm1228_vm7, %v1139_v11  ;;  %1256 = vst.msk [vmem:[#allocation2 + $0xd8] sm:$0xff] %vm1228_vm7, %v1187_v47  ;;  %3897 = vmatprep.mubr.msk.f32.mxu0 %vm1917_vm12, %v1874_v6  ;;  %v5362_v39 = vsel %vm916_vm1, %v942_v57, %v943_v61 }
 0x16f   : > { %3933 = vmatprep.mubr.msk.f32.mxu1 %vm1917_vm12, %v1898_v9  ;;  %1621 = vrot.lane.b32.xlu0 %v5236_v16, %s6335_s26 }
 0x170   : > { %1669 = vrot.lane.b32.xlu1 %v5239_v49, %s6335_s26 }
 0x171   : > { %v1272_v41 = vpop.permute.xlu0 %1271  ;;  %v1320_v56 = vpop.permute.xlu1 %1319 }
 0x172   : > { %1366 = vst.msk [vmem:[#allocation2 + $0x10] sm:$0xff] %vm1363_vm8, %v1272_v41  ;;  %1390 = vst.msk [vmem:[#allocation2 + $0xd0] sm:$0xff] %vm1363_vm8, %v1320_v56 }
 0x173   : > { %1753 = vrot.lane.b32.xlu0 %v5340_v13, %s6311_s30 }
 0x174   : > { %1801 = vrot.lane.b32.xlu1 %v5343_v59, %s6311_s30 }
 0x175   : > { %v1748_v10 = vpop.permute.xlu0 %1747  ;;  %v1796_v18 = vpop.permute.xlu1 %1795 }
 0x176   : > { %1843 = vst.msk [vmem:[#allocation2 + $0x8] sm:$0xff] %vm1841_vm11, %v1748_v10  ;;  %1867 = vst.msk [vmem:[#allocation2 + $0xc8] sm:$0xff] %vm1841_vm11, %v1796_v18 }
 0x177   : > { %654 = vrot.lane.b32.xlu0 %v4934_v46, %s6336_s23 }
 0x178   : > { %1146 = vrot.lane.b32.xlu1 %v5271_v21, %s6333_s20 }
 0x179   : > { %v649_v22 = vpop.permute.xlu0 %648  ;;  %v697_v34 = vpop.permute.xlu1 %696 }
 0x17a   : > { %740 = vst.msk [vmem:[#allocation2 + $0x28] sm:$0xff] %vm734_vm4, %v649_v22  ;;  %764 = vst.msk [vmem:[#allocation2 + $0xe8] sm:$0xff] %vm734_vm4, %v697_v34  ;;  %v1743_v22 = vrot.slane %v5391_v44, 2 }
 0x17b   : > { %1194 = vrot.lane.b32.xlu0 %v5274_v24, %s6333_s20  ;;  %v945_v24 = vrot.slane %v5377_v27, 1 }
 0x17c   : > { %1279 = vrot.lane.b32.xlu1 %v5362_v39, %s6337_s27 }
 0x17d   : > { %v778_v54 = vpop.permute.xlu0 %777  ;;  %v826_v25 = vpop.permute.xlu1 %825  ;;  %v1875_v26 = vld [vmem:[#allocation2 + $0x8] sm:$0xff]  ;;  %v5400_v5 = vsel %vm916_vm1, %v943_v61, %v945_v24 }
 0x17e   : > { %v1899_v23 = vld [vmem:[#allocation2 + $0xc8] sm:$0xff]  ;;  %870 = vst.msk [vmem:[#allocation2 + $0x20] sm:$0xff] %vm865_vm5, %v778_v54  ;;  %894 = vst.msk [vmem:[#allocation2 + $0xe0] sm:$0xff] %vm865_vm5, %v826_v25  ;;  %3898 = vmatmul.mubr.msk.f32.vlgmr.msra.gmra.mxu0 %vm1917_vm12, %v1875_v26 }
 0x17f   : > { %3934 = vmatmul.mubr.msk.f32.gmra.mxu1 %vm1917_vm12, %v1899_v23  ;;  %1327 = vrot.lane.b32.xlu0 %v1264_v31, %s6337_s27 }
 0x180   : > { %1755 = vrot.lane.b32.xlu1 %v5373_v12, %s6311_s30 }
 0x181   : > { %v1274_v32 = vpop.permute.xlu0 %1273 }
 0x182   : > { %v1322_v55 = vpop.permute.xlu1 %1321  ;;  %1367 = vst.msk [vmem:[#allocation2 + $0x18] sm:$0xff] %vm1363_vm8, %v1274_v32 }
 0x183   : > { %1391 = vst.msk [vmem:[#allocation2 + $0xd8] sm:$0xff] %vm1363_vm8, %v1322_v55  ;;  %1803 = vrot.lane.b32.xlu0 %v5387_v52, %s6311_s30 }
 0x184   : > { %656 = vrot.lane.b32.xlu1 %v4963_v63, %s6336_s23 }
 0x185   : > { %v1482_v33 = vpop.permute.xlu0 %1481 }
 0x186   : > { %v1530_v62 = vpop.permute.xlu1 %1529  ;;  %1576 = vst.msk [vmem:[#allocation2 + $0x10] sm:$0xff] %vm1573_vm9, %v1482_v33 }
 0x187   : > { %1600 = vst.msk [vmem:[#allocation2 + $0xd0] sm:$0xff] %vm1573_vm9, %v1530_v62  ;;  %785 = vrot.lane.b32.xlu0 %v5089_v35, %s6338_s18 }
 0x188   : > { %1281 = vrot.lane.b32.xlu1 %v5400_v5, %s6337_s27 }
 0x189   : > { %v780_v38 = vpop.permute.xlu0 %779 }
 0x18a   : > { %v828_v42 = vpop.permute.xlu1 %827  ;;  %871 = vst.msk [vmem:[#allocation2 + $0x28] sm:$0xff] %vm865_vm5, %v780_v38 }
 0x18b   : > { %895 = vst.msk [vmem:[#allocation2 + $0xe8] sm:$0xff] %vm865_vm5, %v828_v42  ;;  %1329 = vrot.lane.b32.xlu0 %v1266_v17, %s6337_s27 }
 0x18c   : > { %1489 = vrot.lane.b32.xlu1 %v5182_v0, %s6339_s28 }
 0x18d   : > { %v1006_v11 = vpop.permute.xlu0 %1005 }
 0x18e   : > { %v1054_v47 = vpop.permute.xlu1 %1053  ;;  %1098 = vst.msk [vmem:[#allocation2 + $0x20] sm:$0xff] %vm1093_vm6, %v1006_v11 }
 0x18f   : > { %1122 = vst.msk [vmem:[#allocation2 + $0xe0] sm:$0xff] %vm1093_vm6, %v1054_v47  ;;  %1537 = vrot.lane.b32.xlu0 %v5185_v2, %s6339_s28 }
 0x190   : > { %787 = vrot.lane.b32.xlu1 %v5118_v43, %s6338_s18 }
 0x191   : > { %v1484_v6 = vpop.permute.xlu0 %1483 }
 0x192   : > { %v1532_v9 = vpop.permute.xlu1 %1531  ;;  %1577 = vst.msk [vmem:[#allocation2 + $0x18] sm:$0xff] %vm1573_vm9, %v1484_v6 }
 0x193   : > { %1601 = vst.msk [vmem:[#allocation2 + $0xd8] sm:$0xff] %vm1573_vm9, %v1532_v9  ;;  %1013 = vrot.lane.b32.xlu0 %v5221_v53, %s6334_s19  ;;  %v1422_v53 = vrot.slane %v4934_v46, 2 }
 0x194   : > { %1491 = vrot.lane.b32.xlu1 %v5236_v16, %s6339_s28  ;;  %v1423_v16 = vrot.slane %v4963_v63, 2 }
 0x195   : > { %v1616_v0 = vpop.permute.xlu0 %1615 }
 0x196   : > { %v1664_v41 = vpop.permute.xlu1 %1663  ;;  %1710 = vst.msk [vmem:[#allocation2 + $0x10] sm:$0xff] %vm1707_vm10, %v1616_v0  ;;  %v5450_v46 = vsel %vm1396_vm2, %v1422_v53, %v1423_v16  ;;  %v5478_v40 = vsel %vm1396_vm2, %v1423_v16, %v1425_v29 }
 0x197   : > { %1734 = vst.msk [vmem:[#allocation2 + $0xd0] sm:$0xff] %vm1707_vm10, %v1664_v41  ;;  %1539 = vrot.lane.b32.xlu0 %v5239_v49, %s6339_s28 }
 0x198   : > { %1623 = vrot.lane.b32.xlu1 %v5340_v13, %s6335_s26 }
 0x199   : > { %v1008_v2 = vpop.permute.xlu0 %1007 }
 0x19a   : > { %v1056_v56 = vpop.permute.xlu1 %1055  ;;  %1099 = vst.msk [vmem:[#allocation2 + $0x28] sm:$0xff] %vm1093_vm6, %v1008_v2 }
 0x19b   : > { %1123 = vst.msk [vmem:[#allocation2 + $0xe8] sm:$0xff] %vm1093_vm6, %v1056_v56  ;;  %1671 = vrot.lane.b32.xlu0 %v5343_v59, %s6335_s26  ;;  %v1740_v59 = vrot.slane %v5260_v8, 2  ;;  %v947_v8 = vrot.slane %v5089_v35, 1 }
 0x19c   : > { %1015 = vrot.lane.b32.xlu1 %v5271_v21, %s6334_s19  ;;  %v1741_v21 = vrot.slane %v5289_v60, 2  ;;  %v948_v60 = vrot.slane %v5118_v43, 1 }
 0x19d   : > { %v1141_v49 = vpop.permute.xlu0 %1140 }
 0x19e   : > { %v1189_v57 = vpop.permute.xlu1 %1188  ;;  %1233 = vst.msk [vmem:[#allocation2 + $0x20] sm:$0xff] %vm1228_vm7, %v1141_v49  ;;  %v1742_v10 = vsel %vm1396_vm2, %v1740_v59, %v1741_v21  ;;  %v5467_v20 = vsel %vm916_vm1, %v947_v8, %v948_v60  ;;  %v1744_v54 = vsel %vm1396_vm2, %v1741_v21, %v1743_v22  ;;  %v542_v59 = vld [vmem:[%s4428_s29 + $0xb8] sm:$0x3] }
 0x19f   : > { %1257 = vst.msk [vmem:[#allocation2 + $0xe0] sm:$0xff] %vm1228_vm7, %v1189_v57  ;;  %1148 = vrot.lane.b32.xlu0 %v5362_v39, %s6333_s20  ;;  %v955_v21 = vrot.slane %v542_v59, 1 }
 0x1a0   : > { %1625 = vrot.lane.b32.xlu1 %v5373_v12, %s6335_s26 }
 0x1a1   : > { %v1618_v63 = vpop.permute.xlu0 %1617 }
 0x1a2   : > { %v1666_v61 = vpop.permute.xlu1 %1665  ;;  %1711 = vst.msk [vmem:[#allocation2 + $0x18] sm:$0xff] %vm1707_vm10, %v1618_v63 }
 0x1a3   : > { %1735 = vst.msk [vmem:[#allocation2 + $0xd8] sm:$0xff] %vm1707_vm10, %v1666_v61  ;;  %1673 = vrot.lane.b32.xlu0 %v5387_v52, %s6335_s26  ;;  %v5482_v52 = vld [vmem:[%s4428_s29 + $0xa0] sm:$0x3]  ;;  %s6321_s29 = smov 16  }
 0x1a4   : > { %1757 = vrot.lane.b32.xlu1 %v5450_v46, %s6311_s30  ;;  %v950_v24 = vrot.slane %v5482_v52, 1 }
 0x1a5   : > { %v1750_v18 = vpop.permute.xlu0 %1749 }
 0x1a6   : > { %v1798_v19 = vpop.permute.xlu1 %1797  ;;  %1844 = vst.msk [vmem:[#allocation2 + $0x10] sm:$0xff] %vm1841_vm11, %v1750_v18  ;;  %v5499_v44 = vsel %vm916_vm1, %v948_v60, %v950_v24 }
 0x1a7   : > { %1868 = vst.msk [vmem:[#allocation2 + $0xd0] sm:$0xff] %vm1841_vm11, %v1798_v19  ;;  %1805 = vrot.lane.b32.xlu0 %v1742_v10, %s6311_s30 }
 0x1a8   : > { %658 = vrot.lane.b32.xlu1 %v5089_v35, %s6336_s23 }
 0x1a9   : > { %v651_v34 = vpop.permute.xlu0 %650 }
 0x1aa   : > { %v699_v31 = vpop.permute.xlu1 %698  ;;  %741 = vst.msk [vmem:[#allocation2 + $0x30] sm:$0xff] %vm734_vm4, %v651_v34  ;;  %v1433_v34 = vrot.slane %v5212_v48, 2 }
 0x1ab   : > { %765 = vst.msk [vmem:[#allocation2 + $0xf0] sm:$0xff] %vm734_vm4, %v699_v31  ;;  %1150 = vrot.lane.b32.xlu0 %v5400_v5, %s6333_s20 }
 0x1ac   : > { %1283 = vrot.lane.b32.xlu1 %v5467_v20, %s6337_s27 }
 0x1ad   : > { %v1143_v25 = vpop.permute.xlu0 %1142  ;;  %v1876_v23 = vld [vmem:[#allocation2 + $0x10] sm:$0xff] }
 0x1ae   : > { %v1191_v26 = vpop.permute.xlu1 %1190  ;;  %v1900_v27 = vld [vmem:[#allocation2 + $0xd0] sm:$0xff]  ;;  %1234 = vst.msk [vmem:[#allocation2 + $0x28] sm:$0xff] %vm1228_vm7, %v1143_v25  ;;  %3900 = vmatprep.mubr.msk.f32.mxu0 %vm1917_vm12, %v1876_v23 }
 0x1af   : > { %1258 = vst.msk [vmem:[#allocation2 + $0xe8] sm:$0xff] %vm1228_vm7, %v1191_v26  ;;  %3936 = vmatprep.mubr.msk.f32.mxu1 %vm1917_vm12, %v1900_v27  ;;  %1759 = vrot.lane.b32.xlu0 %v5478_v40, %s6311_s30 }
 0x1b0   : > { %1807 = vrot.lane.b32.xlu1 %v1744_v54, %s6311_s30 }
 0x1b1   : > { %v1276_v32 = vpop.permute.xlu0 %1275 }
 0x1b2   : > { %v1324_v55 = vpop.permute.xlu1 %1323  ;;  %1368 = vst.msk [vmem:[#allocation2 + $0x20] sm:$0xff] %vm1363_vm8, %v1276_v32 }
 0x1b3   : > { %1392 = vst.msk [vmem:[#allocation2 + $0xe0] sm:$0xff] %vm1363_vm8, %v1324_v55  ;;  %660 = vrot.lane.b32.xlu0 %v5118_v43, %s6336_s23 }
 0x1b4   : > { %789 = vrot.lane.b32.xlu1 %v5191_v36, %s6338_s18 }
 0x1b5   : > { %v1752_v30 = vpop.permute.xlu0 %1751 }
 0x1b6   : > { %v1800_v33 = vpop.permute.xlu1 %1799  ;;  %1845 = vst.msk [vmem:[#allocation2 + $0x18] sm:$0xff] %vm1841_vm11, %v1752_v30 }
 0x1b7   : > { %1869 = vst.msk [vmem:[#allocation2 + $0xd8] sm:$0xff] %vm1841_vm11, %v1800_v33  ;;  %1285 = vrot.lane.b32.xlu0 %v5499_v44, %s6337_s27 }
 0x1b8   : > { %1493 = vrot.lane.b32.xlu1 %v5340_v13, %s6339_s28  ;;  %v1427_v13 = vrot.slane %v5089_v35, 2  ;;  %v952_v35 = vrot.slane %v5191_v36, 1 }
 0x1b9   : > { %v653_v62 = vpop.permute.xlu0 %652 }
 0x1ba   : > { %v701_v17 = vpop.permute.xlu1 %700  ;;  %742 = vst.msk [vmem:[#allocation2 + $0x38] sm:$0xff] %vm734_vm4, %v653_v62 }
 0x1bb   : > { %766 = vst.msk [vmem:[#allocation2 + $0xf8] sm:$0xff] %vm734_vm4, %v701_v17  ;;  %791 = vrot.lane.b32.xlu0 %v5212_v48, %s6338_s18 }
 0x1bc   : > { %1017 = vrot.lane.b32.xlu1 %v5362_v39, %s6334_s19  ;;  %v1428_v39 = vrot.slane %v5118_v43, 2  ;;  %v953_v43 = vrot.slane %v5212_v48, 1 }
 0x1bd   : > { %v782_v38 = vpop.permute.xlu0 %781  ;;  %v1877_v11 = vld [vmem:[#allocation2 + $0x18] sm:$0xff] }
 0x1be   : > { %v830_v42 = vpop.permute.xlu1 %829  ;;  %v1901_v47 = vld [vmem:[#allocation2 + $0xd8] sm:$0xff]  ;;  %872 = vst.msk [vmem:[#allocation2 + $0x30] sm:$0xff] %vm865_vm5, %v782_v38  ;;  %3901 = vmatmul.mubr.msk.f32.gmra.mxu0 %vm1917_vm12, %v1877_v11  ;;  %v5548_v53 = vsel %vm916_vm1, %v952_v35, %v953_v43  ;;  %v5567_v10 = vsel %vm916_vm1, %v953_v43, %v955_v21 }
 0x1bf   : > { %896 = vst.msk [vmem:[#allocation2 + $0xf0] sm:$0xff] %vm865_vm5, %v830_v42  ;;  %3937 = vmatmul.mubr.msk.f32.gmra.mxu1 %vm1917_vm12, %v1901_v47  ;;  %1495 = vrot.lane.b32.xlu0 %v5373_v12, %s6339_s28  ;;  %v5530_v12 = vsel %vm1396_vm2, %v1427_v13, %v1428_v39 }
 0x1c0   : > { %1627 = vrot.lane.b32.xlu1 %v5450_v46, %s6335_s26 }
 0x1c1   : > { %v1278_v6 = vpop.permute.xlu0 %1277 }
 0x1c2   : > { %v1326_v9 = vpop.permute.xlu1 %1325  ;;  %1369 = vst.msk [vmem:[#allocation2 + $0x28] sm:$0xff] %vm1363_vm8, %v1278_v6 }
 0x1c3   : > { %1393 = vst.msk [vmem:[#allocation2 + $0xe8] sm:$0xff] %vm1363_vm8, %v1326_v9  ;;  %1019 = vrot.lane.b32.xlu0 %v5400_v5, %s6334_s19  ;;  %v1430_v5 = vrot.slane %v5482_v52, 2 }
 0x1c4   : > { %1152 = vrot.lane.b32.xlu1 %v5467_v20, %s6333_s20 }
 0x1c5   : > { %v1486_v0 = vpop.permute.xlu0 %1485  ;;  %v5551_v16 = vsel %vm1396_vm2, %v1428_v39, %v1430_v5 }
 0x1c6   : > { %v1534_v41 = vpop.permute.xlu1 %1533  ;;  %1578 = vst.msk [vmem:[#allocation2 + $0x20] sm:$0xff] %vm1573_vm9, %v1486_v0 }
 0x1c7   : > { %1602 = vst.msk [vmem:[#allocation2 + $0xe0] sm:$0xff] %vm1573_vm9, %v1534_v41  ;;  %1629 = vrot.lane.b32.xlu0 %v5478_v40, %s6335_s26 }
 0x1c8   : > { %1761 = vrot.lane.b32.xlu1 %v5530_v12, %s6311_s30 }
 0x1c9   : > { %v784_v2 = vpop.permute.xlu0 %783 }
 0x1ca   : > { %v832_v56 = vpop.permute.xlu1 %831  ;;  %873 = vst.msk [vmem:[#allocation2 + $0x38] sm:$0xff] %vm865_vm5, %v784_v2 }
 0x1cb   : > { %897 = vst.msk [vmem:[#allocation2 + $0xf8] sm:$0xff] %vm865_vm5, %v832_v56  ;;  %662 = vrot.lane.b32.xlu0 %v5191_v36, %s6336_s23 }
 0x1cc   : > { %1154 = vrot.lane.b32.xlu1 %v5499_v44, %s6333_s20 }
 0x1cd   : > { %v1010_v49 = vpop.permute.xlu0 %1009 }
 0x1ce   : > { %v1058_v57 = vpop.permute.xlu1 %1057  ;;  %1100 = vst.msk [vmem:[#allocation2 + $0x30] sm:$0xff] %vm1093_vm6, %v1010_v49 }
 0x1cf   : > { %1124 = vst.msk [vmem:[#allocation2 + $0xf0] sm:$0xff] %vm1093_vm6, %v1058_v57  ;;  %1287 = vrot.lane.b32.xlu0 %v5548_v53, %s6337_s27 }
 0x1d0   : > { %1763 = vrot.lane.b32.xlu1 %v5551_v16, %s6311_s30 }
 0x1d1   : > { %v1488_v63 = vpop.permute.xlu0 %1487 }
 0x1d2   : > { %v1536_v61 = vpop.permute.xlu1 %1535  ;;  %1579 = vst.msk [vmem:[#allocation2 + $0x28] sm:$0xff] %vm1573_vm9, %v1488_v63 }
 0x1d3   : > { %1603 = vst.msk [vmem:[#allocation2 + $0xe8] sm:$0xff] %vm1573_vm9, %v1536_v61  ;;  %664 = vrot.lane.b32.xlu0 %v5212_v48, %s6336_s23 }
 0x1d4   : > { %793 = vrot.lane.b32.xlu1 %v4460_v7, %s6338_s18 }
 0x1d5   : > { %v1620_v8 = vpop.permute.xlu0 %1619 }
 0x1d6   : > { %v1668_v60 = vpop.permute.xlu1 %1667  ;;  %1712 = vst.msk [vmem:[#allocation2 + $0x20] sm:$0xff] %vm1707_vm10, %v1620_v8 }
 0x1d7   : > { %1736 = vst.msk [vmem:[#allocation2 + $0xe0] sm:$0xff] %vm1707_vm10, %v1668_v60  ;;  %1289 = vrot.lane.b32.xlu0 %v5567_v10, %s6337_s27 }
 0x1d8   : > { %1497 = vrot.lane.b32.xlu1 %v5450_v46, %s6339_s28  ;;  %v1432_v46 = vrot.slane %v5191_v36, 2  ;;  %v1435_v36 = vrot.slane %v542_v59, 2 }
 0x1d9   : > { %v1012_v18 = vpop.permute.xlu0 %1011 }
 0x1da   : > { %v1060_v19 = vpop.permute.xlu1 %1059  ;;  %1101 = vst.msk [vmem:[#allocation2 + $0x38] sm:$0xff] %vm1093_vm6, %v1012_v18  ;;  %v5611_v23 = vsel %vm1396_vm2, %v1433_v34, %v1435_v36 }
 0x1db   : > { %1125 = vst.msk [vmem:[#allocation2 + $0xf8] sm:$0xff] %vm1093_vm6, %v1060_v19  ;;  %795 = vrot.lane.b32.xlu0 %v4447_v4, %s6338_s18 }
 0x1dc   : > { %1021 = vrot.lane.b32.xlu1 %v5467_v20, %s6334_s19  ;;  %v5596_v20 = vsel %vm1396_vm2, %v1432_v46, %v1433_v34 }
 0x1dd   : > { %v1145_v29 = vpop.permute.xlu0 %1144 }
 0x1de   : > { %v1193_v22 = vpop.permute.xlu1 %1192  ;;  %1235 = vst.msk [vmem:[#allocation2 + $0x30] sm:$0xff] %vm1228_vm7, %v1145_v29 }
 0x1df   : > { %1259 = vst.msk [vmem:[#allocation2 + $0xf0] sm:$0xff] %vm1228_vm7, %v1193_v22  ;;  %1499 = vrot.lane.b32.xlu0 %v5478_v40, %s6339_s28 }
 0x1e0   : > { %1631 = vrot.lane.b32.xlu1 %v5530_v12, %s6335_s26 }
 0x1e1   : > { %v1622_v31 = vpop.permute.xlu0 %1621 }
 0x1e2   : > { %v1670_v54 = vpop.permute.xlu1 %1669  ;;  %1713 = vst.msk [vmem:[#allocation2 + $0x28] sm:$0xff] %vm1707_vm10, %v1622_v31 }
 0x1e3   : > { %1737 = vst.msk [vmem:[#allocation2 + $0xe8] sm:$0xff] %vm1707_vm10, %v1670_v54  ;;  %1023 = vrot.lane.b32.xlu0 %v5499_v44, %s6334_s19 }
 0x1e4   : > { %1156 = vrot.lane.b32.xlu1 %v5548_v53, %s6333_s20 }
 0x1e5   : > { %v1754_v40 = vpop.permute.xlu0 %1753 }
 0x1e6   : > { %v1802_v25 = vpop.permute.xlu1 %1801  ;;  %1846 = vst.msk [vmem:[#allocation2 + $0x20] sm:$0xff] %vm1841_vm11, %v1754_v40 }
 0x1e7   : > { %1870 = vst.msk [vmem:[#allocation2 + $0xe0] sm:$0xff] %vm1841_vm11, %v1802_v25  ;;  %1633 = vrot.lane.b32.xlu0 %v5551_v16, %s6335_s26 }
 0x1e8   : > { %1765 = vrot.lane.b32.xlu1 %v5596_v20, %s6311_s30 }
 0x1e9   : > { %v655_v48 = vpop.permute.xlu0 %654 }
 0x1ea   : > { %v1147_v26 = vpop.permute.xlu1 %1146  ;;  %743 = vst.msk [vmem:[#allocation2 + $0x40] sm:$0xff] %vm734_vm4, %v655_v48 }
 0x1eb   : > { %1236 = vst.msk [vmem:[#allocation2 + $0x38] sm:$0xff] %vm1228_vm7, %v1147_v26  ;;  %666 = vrot.lane.b32.xlu0 %v4460_v7, %s6336_s23 }
 0x1ec   : > { %1158 = vrot.lane.b32.xlu1 %v5567_v10, %s6333_s20 }
 0x1ed   : > { %v1195_v27 = vpop.permute.xlu0 %1194  ;;  %v1878_v24 = vld [vmem:[#allocation2 + $0x20] sm:$0xff] }
 0x1ee   : > { %v1280_v52 = vpop.permute.xlu1 %1279  ;;  %v1902_v32 = vld [vmem:[#allocation2 + $0xe0] sm:$0xff]  ;;  %1260 = vst.msk [vmem:[#allocation2 + $0xf8] sm:$0xff] %vm1228_vm7, %v1195_v27  ;;  %3903 = vmatprep.mubr.msk.f32.mxu0 %vm1917_vm12, %v1878_v24 }
 0x1ef   : > { %1370 = vst.msk [vmem:[#allocation2 + $0x30] sm:$0xff] %vm1363_vm8, %v1280_v52  ;;  %3939 = vmatprep.mubr.msk.f32.mxu1 %vm1917_vm12, %v1902_v32  ;;  %1291 = vrot.lane.b32.xlu0 %v4496_v15, %s6337_s27 }
 0x1f0   : > { %1767 = vrot.lane.b32.xlu1 %v5611_v23, %s6311_s30 }
 0x1f1   : > { %v1328_v7 = vpop.permute.xlu0 %1327 }
 0x1f2   : > { %v1756_v55 = vpop.permute.xlu1 %1755  ;;  %1394 = vst.msk [vmem:[#allocation2 + $0xf0] sm:$0xff] %vm1363_vm8, %v1328_v7 }
 0x1f3   : > { %1847 = vst.msk [vmem:[#allocation2 + $0x28] sm:$0xff] %vm1841_vm11, %v1756_v55  ;;  %668 = vrot.lane.b32.xlu0 %v4447_v4, %s6336_s23  ;;  %s4286_s23 = smov 64  }
 0x1f4   : > { %797 = vrot.lane.b32.xlu1 %v4434_v1, %s6338_s18 }
 0x1f5   : > { %v1804_v44 = vpop.permute.xlu0 %1803 }
 0x1f6   : > { %v657_v30 = vpop.permute.xlu1 %656  ;;  %1871 = vst.msk [vmem:[#allocation2 + $0xe8] sm:$0xff] %vm1841_vm11, %v1804_v44 }
 0x1f7   : > { %744 = vst.msk [vmem:[#allocation2 + $0x48] sm:$0xff] %vm734_vm4, %v657_v30  ;;  %1293 = vrot.lane.b32.xlu0 %v4493_v14, %s6337_s27 }
 0x1f8   : > { %1501 = vrot.lane.b32.xlu1 %v5530_v12, %s6339_s28 }
 0x1f9   : > { %v786_v33 = vpop.permute.xlu0 %785 }
 0x1fa   : > { %v1282_v62 = vpop.permute.xlu1 %1281  ;;  %v1879_v17 = vld [vmem:[#allocation2 + $0x28] sm:$0xff]  ;;  %874 = vst.msk [vmem:[#allocation2 + $0x40] sm:$0xff] %vm865_vm5, %v786_v33 }
 0x1fb   : > { %1371 = vst.msk [vmem:[#allocation2 + $0x38] sm:$0xff] %vm1363_vm8, %v1282_v62  ;;  %3904 = vmatmul.mubr.msk.f32.gmra.mxu0 %vm1917_vm12, %v1879_v17  ;;  %799 = vrot.lane.b32.xlu0 %v4444_v3, %s6338_s18  ;;  %s4281_s18 = smov 8  }
 0x1fc   : > { %1025 = vrot.lane.b32.xlu1 %v5548_v53, %s6334_s19 }
 0x1fd   : > { %v1330_v1 = vpop.permute.xlu0 %1329  ;;  %v1903_v38 = vld [vmem:[#allocation2 + $0xe8] sm:$0xff] }
 0x1fe   : > { %v1490_v4 = vpop.permute.xlu1 %1489  ;;  %1395 = vst.msk [vmem:[#allocation2 + $0xf8] sm:$0xff] %vm1363_vm8, %v1330_v1  ;;  %3940 = vmatmul.mubr.msk.f32.gmra.mxu1 %vm1917_vm12, %v1903_v38 }
 0x1ff   : > { %1580 = vst.msk [vmem:[#allocation2 + $0x30] sm:$0xff] %vm1573_vm9, %v1490_v4  ;;  %1503 = vrot.lane.b32.xlu0 %v5551_v16, %s6339_s28 }
 0x200   : > { %1635 = vrot.lane.b32.xlu1 %v5596_v20, %s6335_s26 }
 0x201   : > { %v1538_v42 = vpop.permute.xlu0 %1537 }
 0x202   : > { %v788_v3 = vpop.permute.xlu1 %787  ;;  %1604 = vst.msk [vmem:[#allocation2 + $0xf0] sm:$0xff] %vm1573_vm9, %v1538_v42 }
 0x203   : > { %875 = vst.msk [vmem:[#allocation2 + $0x48] sm:$0xff] %vm865_vm5, %v788_v3  ;;  %1027 = vrot.lane.b32.xlu0 %v5567_v10, %s6334_s19  ;;  %s6341_s19 = smov 24  }
 0x204   : > { %1160 = vrot.lane.b32.xlu1 %v4496_v15, %s6333_s20 }
 0x205   : > { %v1014_v11 = vpop.permute.xlu0 %1013 }
 0x206   : > { %v1492_v47 = vpop.permute.xlu1 %1491  ;;  %1102 = vst.msk [vmem:[#allocation2 + $0x40] sm:$0xff] %vm1093_vm6, %v1014_v11 }
 0x207   : > { %1581 = vst.msk [vmem:[#allocation2 + $0x38] sm:$0xff] %vm1573_vm9, %v1492_v47  ;;  %1637 = vrot.lane.b32.xlu0 %v5611_v23, %s6335_s26 }
 0x208   : > { %1769 = vrot.lane.b32.xlu1 %v4604_v45, %s6311_s30 }
 0x209   : > { %v1540_v13 = vpop.permute.xlu0 %1539 }
 0x20a   : > { %v1624_v39 = vpop.permute.xlu1 %1623  ;;  %1605 = vst.msk [vmem:[#allocation2 + $0xf8] sm:$0xff] %vm1573_vm9, %v1540_v13 }
 0x20b   : > { %1714 = vst.msk [vmem:[#allocation2 + $0x30] sm:$0xff] %vm1707_vm10, %v1624_v39  ;;  %1162 = vrot.lane.b32.xlu0 %v4493_v14, %s6333_s20  ;;  %s6319_s20 = smov 56  }
 0x20c   : > { %1295 = vrot.lane.b32.xlu1 %v4543_v28, %s6337_s27 }
 0x20d   : > { %v1672_v15 = vpop.permute.xlu0 %1671 }
 0x20e   : > { %v1016_v6 = vpop.permute.xlu1 %1015  ;;  %1738 = vst.msk [vmem:[#allocation2 + $0xf0] sm:$0xff] %vm1707_vm10, %v1672_v15 }
 0x20f   : > { %1103 = vst.msk [vmem:[#allocation2 + $0x48] sm:$0xff] %vm1093_vm6, %v1016_v6  ;;  %1771 = vrot.lane.b32.xlu0 %v4624_v51, %s6311_s30 }
 0x210   : > { %1297 = vrot.lane.b32.xlu1 %v4580_v37, %s6337_s27  ;;  %s6313_s27 = smov 40  }
 0x211   : > { %v1149_v9 = vpop.permute.xlu0 %1148 }
 0x212   : > { %v1626_v12 = vpop.permute.xlu1 %1625  ;;  %1237 = vst.msk [vmem:[#allocation2 + $0x40] sm:$0xff] %vm1228_vm7, %v1149_v9 }
 0x213   : > { %1715 = vst.msk [vmem:[#allocation2 + $0x38] sm:$0xff] %vm1707_vm10, %v1626_v12  ;;  %1505 = vrot.lane.b32.xlu0 %v5596_v20, %s6339_s28 }
 0x214   : > { %1507 = vrot.lane.b32.xlu1 %v5611_v23, %s6339_s28  ;;  %s6315_s28 = smov 48  }
 0x215   : > { %v1674_v14 = vpop.permute.xlu0 %1673 }
 0x216   : > { %v1758_v28 = vpop.permute.xlu1 %1757  ;;  %1739 = vst.msk [vmem:[#allocation2 + $0xf8] sm:$0xff] %vm1707_vm10, %v1674_v14 }
 0x217   : > { %1848 = vst.msk [vmem:[#allocation2 + $0x30] sm:$0xff] %vm1841_vm11, %v1758_v28  ;;  %1639 = vrot.lane.b32.xlu0 %v4604_v45, %s6335_s26 }
 0x218   : > { %1641 = vrot.lane.b32.xlu1 %v4624_v51, %s6335_s26  ;;  %s6317_s26 = smov 32  }
 0x219   : > { %v1806_v37 = vpop.permute.xlu0 %1805 }
 0x21a   : > { %v659_v0 = vpop.permute.xlu1 %658  ;;  %1872 = vst.msk [vmem:[#allocation2 + $0xf0] sm:$0xff] %vm1841_vm11, %v1806_v37 }
 0x21b   : > { %745 = vst.msk [vmem:[#allocation2 + $0x50] sm:$0xff] %vm734_vm4, %v659_v0  ;;  %1773 = vrot.lane.b32.xlu0 %v4621_v50, %s6311_s30 }
 0x21c   : > { %1775 = vrot.lane.b32.xlu1 %v4647_v58, %s6311_s30  ;;  %s6344_s30 = smov 56  }
 0x21d   : > { %v1151_v41 = vpop.permute.xlu0 %1150 }
 0x21e   : > { %v1284_v35 = vpop.permute.xlu1 %1283  ;;  %v1880_v43 = vld [vmem:[#allocation2 + $0x30] sm:$0xff]  ;;  %1238 = vst.msk [vmem:[#allocation2 + $0x48] sm:$0xff] %vm1228_vm7, %v1151_v41 }
 0x21f   : > { %1372 = vst.msk [vmem:[#allocation2 + $0x40] sm:$0xff] %vm1363_vm8, %v1284_v35  ;;  %3906 = vmatprep.mubr.msk.f32.mxu0 %vm1917_vm12, %v1880_v43 }
 0x221   : > { %v1760_v45 = vpop.permute.xlu0 %1759  ;;  %v1904_v5 = vld [vmem:[#allocation2 + $0xf0] sm:$0xff] }
 0x222   : > { %v1808_v51 = vpop.permute.xlu1 %1807  ;;  %1849 = vst.msk [vmem:[#allocation2 + $0x38] sm:$0xff] %vm1841_vm11, %v1760_v45  ;;  %3942 = vmatprep.mubr.msk.f32.mxu1 %vm1917_vm12, %v1904_v5 }
 0x223   : > { %1873 = vst.msk [vmem:[#allocation2 + $0xf8] sm:$0xff] %vm1841_vm11, %v1808_v51 }
 0x225   : > { %v661_v50 = vpop.permute.xlu0 %660 }
 0x226   : > { %v790_v58 = vpop.permute.xlu1 %789  ;;  %746 = vst.msk [vmem:[#allocation2 + $0x58] sm:$0xff] %vm734_vm4, %v661_v50  ;;  %v3923_v50 = vpop.f32.mrf.mxu1 }
 0x227   : > { %876 = vst.msk [vmem:[#allocation2 + $0x50] sm:$0xff] %vm865_vm5, %v790_v58 }
 0x228   : > { %v2164_v58 = vpop.f32.mrf.mxu1 }
 0x229   : > { %v1286_v2 = vpop.permute.xlu0 %1285  ;;  %v1881_v53 = vld [vmem:[#allocation2 + $0x38] sm:$0xff] }
 0x22a   : > { %v1494_v56 = vpop.permute.xlu1 %1493  ;;  %v1905_v16 = vld [vmem:[#allocation2 + $0xf8] sm:$0xff]  ;;  %1373 = vst.msk [vmem:[#allocation2 + $0x48] sm:$0xff] %vm1363_vm8, %v1286_v2  ;;  %3907 = vmatmul.mubr.msk.f32.gmra.mxu0 %vm1917_vm12, %v1881_v53  ;;  %v3926_v2 = vpop.f32.mrf.mxu1 }
 0x22b   : > { %1582 = vst.msk [vmem:[#allocation2 + $0x40] sm:$0xff] %vm1573_vm9, %v1494_v56  ;;  %3943 = vmatmul.mubr.msk.f32.gmra.mxu1 %vm1917_vm12, %v1905_v16 }
 0x22c   : > { %v2174_v56 = vpop.f32.mrf.mxu1 }
 0x22d   : > { %v792_v49 = vpop.permute.xlu0 %791 }
 0x22e   : > { %v1018_v57 = vpop.permute.xlu1 %1017  ;;  %877 = vst.msk [vmem:[#allocation2 + $0x58] sm:$0xff] %vm865_vm5, %v792_v49  ;;  %v3929_v53 = vpop.f32.mrf.mxu1 }
 0x22f   : > { %1104 = vst.msk [vmem:[#allocation2 + $0x50] sm:$0xff] %vm1093_vm6, %v1018_v57 }
 0x230   : > { %v2184_v16 = vpop.f32.mrf.mxu1 }
 0x231   : > { %v1496_v59 = vpop.permute.xlu0 %1495 }
 0x232   : > { %v1628_v21 = vpop.permute.xlu1 %1627  ;;  %1583 = vst.msk [vmem:[#allocation2 + $0x48] sm:$0xff] %vm1573_vm9, %v1496_v59  ;;  %v3932_v49 = vpop.f32.mrf.mxu1 }
 0x233   : > { %1716 = vst.msk [vmem:[#allocation2 + $0x40] sm:$0xff] %vm1707_vm10, %v1628_v21 }
 0x234   : > { %v2194_v57 = vpop.f32.mrf.mxu1 }
 0x235   : > { %v1020_v63 = vpop.permute.xlu0 %1019 }
 0x236   : > { %v1153_v61 = vpop.permute.xlu1 %1152  ;;  %1105 = vst.msk [vmem:[#allocation2 + $0x58] sm:$0xff] %vm1093_vm6, %v1020_v63 }
 0x237   : > { %1239 = vst.msk [vmem:[#allocation2 + $0x50] sm:$0xff] %vm1228_vm7, %v1153_v61 }
 0x239   : > { %v1630_v10 = vpop.permute.xlu0 %1629 }
 0x23a   : > { %v1762_v8 = vpop.permute.xlu1 %1761  ;;  %1717 = vst.msk [vmem:[#allocation2 + $0x48] sm:$0xff] %vm1707_vm10, %v1630_v10 }
 0x23b   : > { %1850 = vst.msk [vmem:[#allocation2 + $0x40] sm:$0xff] %vm1841_vm11, %v1762_v8  ;;  %v5762_v8 = vld [vmem:[%s6340_s2] ss:$0 sm:$0xff] }
 0x23d   : > { %v663_v60 = vpop.permute.xlu0 %662 }
 0x23e   : > { %v1155_v18 = vpop.permute.xlu1 %1154  ;;  %747 = vst.msk [vmem:[#allocation2 + $0x60] sm:$0xff] %vm734_vm4, %v663_v60 }
 0x23f   : > { %1240 = vst.msk [vmem:[#allocation2 + $0x58] sm:$0xff] %vm1228_vm7, %v1155_v18  ;;  %v3935_v59 = vpop.f32.mrf.mxu1 }
 0x241   : > { %v1288_v19 = vpop.permute.xlu0 %1287  ;;  %v2204_v21 = vpop.f32.mrf.mxu1 }
 0x242   : > { %v1764_v29 = vpop.permute.xlu1 %1763  ;;  %v1882_v22 = vld [vmem:[#allocation2 + $0x40] sm:$0xff]  ;;  %1374 = vst.msk [vmem:[#allocation2 + $0x50] sm:$0xff] %vm1363_vm8, %v1288_v19 }
 0x243   : > { %1851 = vst.msk [vmem:[#allocation2 + $0x48] sm:$0xff] %vm1841_vm11, %v1764_v29  ;;  %3909 = vmatprep.mubr.msk.f32.mxu0 %vm1917_vm12, %v1882_v22 }
 0x245   : > { %v665_v46 = vpop.permute.xlu0 %664 }
 0x246   : > { %v794_v34 = vpop.permute.xlu1 %793  ;;  %748 = vst.msk [vmem:[#allocation2 + $0x68] sm:$0xff] %vm734_vm4, %v665_v46 }
 0x247   : > { %878 = vst.msk [vmem:[#allocation2 + $0x60] sm:$0xff] %vm865_vm5, %v794_v34  ;;  %v2210_v34 = vadd.f32 %v3935_v59, %v5762_v8 }
 0x249   : > { %v1290_v31 = vpop.permute.xlu0 %1289 }
 0x24a   : > { %v1498_v54 = vpop.permute.xlu1 %1497  ;;  %v1883_v20 = vld [vmem:[#allocation2 + $0x48] sm:$0xff]  ;;  %1375 = vst.msk [vmem:[#allocation2 + $0x58] sm:$0xff] %vm1363_vm8, %v1290_v31 }
 0x24b   : > { %1584 = vst.msk [vmem:[#allocation2 + $0x50] sm:$0xff] %vm1573_vm9, %v1498_v54  ;;  %3910 = vmatmul.mubr.msk.f32.gmra.mxu0 %vm1917_vm12, %v1883_v20  ;;  %v2291_v54 = vld [vmem:[%s6286_s9] sm:$0xff] }
 0x24c   : > { %v2404_v20 = vld [vmem:[%s6287_s10] sm:$0xff] }
 0x24d   : > { %v796_v40 = vpop.permute.xlu0 %795  ;;  %4021 = vmatprep.mubr.f32.mxu1 %v2404_v20 }
 0x24e   : > { %v1022_v25 = vpop.permute.xlu1 %1021  ;;  %879 = vst.msk [vmem:[#allocation2 + $0x68] sm:$0xff] %vm865_vm5, %v796_v40 }
 0x24f   : > { %1106 = vst.msk [vmem:[#allocation2 + $0x60] sm:$0xff] %vm1093_vm6, %v1022_v25 }
 0x251   : > { %v1500_v36 = vpop.permute.xlu0 %1499 }
 0x252   : > { %v1632_v48 = vpop.permute.xlu1 %1631  ;;  %1585 = vst.msk [vmem:[#allocation2 + $0x58] sm:$0xff] %vm1573_vm9, %v1500_v36 }
 0x253   : > { %1718 = vst.msk [vmem:[#allocation2 + $0x50] sm:$0xff] %vm1707_vm10, %v1632_v48 }
 0x255   : > { %v1024_v26 = vpop.permute.xlu0 %1023 }
 0x256   : > { %v1157_v23 = vpop.permute.xlu1 %1156  ;;  %1107 = vst.msk [vmem:[#allocation2 + $0x68] sm:$0xff] %vm1093_vm6, %v1024_v26  ;;  %v2200_v26 = vadd.f32 %v3932_v49, %v5762_v8 }
 0x257   : > { %1241 = vst.msk [vmem:[#allocation2 + $0x60] sm:$0xff] %vm1228_vm7, %v1157_v23  ;;  %v2205_v23 = vadd.f32 %v5762_v8, %v2204_v21 }
 0x259   : > { %v1634_v27 = vpop.permute.xlu0 %1633 }
 0x25a   : > { %v1766_v52 = vpop.permute.xlu1 %1765  ;;  %1719 = vst.msk [vmem:[#allocation2 + $0x58] sm:$0xff] %vm1707_vm10, %v1634_v27 }
 0x25b   : > { %1852 = vst.msk [vmem:[#allocation2 + $0x50] sm:$0xff] %vm1841_vm11, %v1766_v52 }
 0x25d   : > { %v667_v24 = vpop.permute.xlu0 %666 }
 0x25e   : > { %v1159_v32 = vpop.permute.xlu1 %1158  ;;  %749 = vst.msk [vmem:[#allocation2 + $0x70] sm:$0xff] %vm734_vm4, %v667_v24 }
 0x25f   : > { %1242 = vst.msk [vmem:[#allocation2 + $0x68] sm:$0xff] %vm1228_vm7, %v1159_v32 }
 0x261   : > { %v1292_v7 = vpop.permute.xlu0 %1291 }
 0x262   : > { %v1768_v55 = vpop.permute.xlu1 %1767  ;;  %v1884_v44 = vld [vmem:[#allocation2 + $0x50] sm:$0xff]  ;;  %1376 = vst.msk [vmem:[#allocation2 + $0x60] sm:$0xff] %vm1363_vm8, %v1292_v7  ;;  %v2190_v7 = vadd.f32 %v3929_v53, %v5762_v8 }
 0x263   : > { %1853 = vst.msk [vmem:[#allocation2 + $0x58] sm:$0xff] %vm1841_vm11, %v1768_v55  ;;  %3912 = vmatprep.mubr.msk.f32.mxu0 %vm1917_vm12, %v1884_v44  ;;  %v2195_v55 = vadd.f32 %v5762_v8, %v2194_v57  ;;  %v2268_v44 = vmax.f32 %v2210_v34, 0.0 }
 0x265   : > { %v669_v30 = vpop.permute.xlu0 %668 }
 0x266   : > { %v798_v33 = vpop.permute.xlu1 %797  ;;  %750 = vst.msk [vmem:[#allocation2 + $0x78] sm:$0xff] %vm734_vm4, %v669_v30  ;;  %vm2796_vm4 = vcmask 523712  }
 0x267   : > { %880 = vst.msk [vmem:[#allocation2 + $0x70] sm:$0xff] %vm865_vm5, %v798_v33 }
 0x269   : > { %v1294_v62 = vpop.permute.xlu0 %1293 }
 0x26a   : > { %v1502_v17 = vpop.permute.xlu1 %1501  ;;  %v1885_v1 = vld [vmem:[#allocation2 + $0x58] sm:$0xff]  ;;  %1377 = vst.msk [vmem:[#allocation2 + $0x68] sm:$0xff] %vm1363_vm8, %v1294_v62  ;;  %v2180_v62 = vadd.f32 %v3926_v2, %v5762_v8 }
 0x26b   : > { %1586 = vst.msk [vmem:[#allocation2 + $0x60] sm:$0xff] %vm1573_vm9, %v1502_v17  ;;  %3913 = vmatmul.mubr.msk.f32.gmra.mxu0 %vm1917_vm12, %v1885_v1  ;;  %v2185_v17 = vadd.f32 %v5762_v8, %v2184_v16  ;;  %v2266_v1 = vmax.f32 %v2200_v26, 0.0 }
 0x26d   : > { %v800_v4 = vpop.permute.xlu0 %799 }
 0x26e   : > { %v1026_v38 = vpop.permute.xlu1 %1025  ;;  %881 = vst.msk [vmem:[#allocation2 + $0x78] sm:$0xff] %vm865_vm5, %v800_v4  ;;  %v2267_v4 = vmax.f32 %v2205_v23, 0.0  ;;  %vm2853_vm5 = vcmask 195712  }
 0x26f   : > { %1108 = vst.msk [vmem:[#allocation2 + $0x70] sm:$0xff] %vm1093_vm6, %v1026_v38 }
 0x271   : > { %v1504_v42 = vpop.permute.xlu0 %1503 }
 0x272   : > { %v1636_v3 = vpop.permute.xlu1 %1635  ;;  %1587 = vst.msk [vmem:[#allocation2 + $0x68] sm:$0xff] %vm1573_vm9, %v1504_v42  ;;  %v2170_v42 = vadd.f32 %v3923_v50, %v5762_v8 }
 0x273   : > { %1720 = vst.msk [vmem:[#allocation2 + $0x60] sm:$0xff] %vm1707_vm10, %v1636_v3  ;;  %v2175_v3 = vadd.f32 %v5762_v8, %v2174_v56 }
 0x275   : > { %v1028_v11 = vpop.permute.xlu0 %1027 }
 0x276   : > { %v1161_v47 = vpop.permute.xlu1 %1160  ;;  %1109 = vst.msk [vmem:[#allocation2 + $0x78] sm:$0xff] %vm1093_vm6, %v1028_v11  ;;  %v2264_v11 = vmax.f32 %v2190_v7, 0.0  ;;  %vm2889_vm6 = vcmask 392512  }
 0x277   : > { %1243 = vst.msk [vmem:[#allocation2 + $0x70] sm:$0xff] %vm1228_vm7, %v1161_v47  ;;  %v2265_v47 = vmax.f32 %v2195_v55, 0.0 }
 0x279   : > { %v1638_v13 = vpop.permute.xlu0 %1637 }
 0x27a   : > { %v1770_v39 = vpop.permute.xlu1 %1769  ;;  %1721 = vst.msk [vmem:[#allocation2 + $0x68] sm:$0xff] %vm1707_vm10, %v1638_v13 }
 0x27b   : > { %1854 = vst.msk [vmem:[#allocation2 + $0x60] sm:$0xff] %vm1841_vm11, %v1770_v39  ;;  %v2165_v39 = vadd.f32 %v5762_v8, %v2164_v58 }
 0x27d   : > { %v1163_v15 = vpop.permute.xlu0 %1162 }
 0x27e   : > { %v1296_v6 = vpop.permute.xlu1 %1295  ;;  %1244 = vst.msk [vmem:[#allocation2 + $0x78] sm:$0xff] %vm1228_vm7, %v1163_v15  ;;  %v2262_v15 = vmax.f32 %v2180_v62, 0.0  ;;  %vm2925_vm7 = vcmask 589312  }
 0x27f   : > { %1378 = vst.msk [vmem:[#allocation2 + $0x70] sm:$0xff] %vm1363_vm8, %v1296_v6  ;;  %v3938_v63 = vpop.f32.mrf.mxu1  ;;  %v2263_v6 = vmax.f32 %v2185_v17, 0.0 }
 0x280   : > { %v2220_v29 = vadd.f32 %v3938_v63, %v5762_v8 }
 0x281   : > { %v1772_v9 = vpop.permute.xlu0 %1771  ;;  %v2214_v61 = vpop.f32.mrf.mxu1 }
 0x282   : > { %v1298_v12 = vpop.permute.xlu1 %1297  ;;  %v1886_v14 = vld [vmem:[#allocation2 + $0x60] sm:$0xff]  ;;  %1855 = vst.msk [vmem:[#allocation2 + $0x68] sm:$0xff] %vm1841_vm11, %v1772_v9  ;;  %v2215_v40 = vadd.f32 %v5762_v8, %v2214_v61  ;;  %v2270_v27 = vmax.f32 %v2220_v29, 0.0  ;;  %v2286_v9 = vmax.f32 %v2264_v11, %v2266_v1 }
 0x283   : > { %1379 = vst.msk [vmem:[#allocation2 + $0x78] sm:$0xff] %vm1363_vm8, %v1298_v12  ;;  %3915 = vmatprep.mubr.msk.f32.mxu0 %vm1917_vm12, %v1886_v14  ;;  %v2260_v12 = vmax.f32 %v2170_v42, 0.0  ;;  %v2261_v14 = vmax.f32 %v2175_v3, 0.0  ;;  %vm2958_vm8 = vcmask 588800  }
 0x284   : > { %v2269_v30 = vmax.f32 %v2215_v40, 0.0  ;;  %v2288_v38 = vmax.f32 %v2268_v44, %v2270_v27 }
 0x285   : > { %v1506_v28 = vpop.permute.xlu0 %1505 }
 0x286   : > { %v1508_v37 = vpop.permute.xlu1 %1507  ;;  %1588 = vst.msk [vmem:[#allocation2 + $0x70] sm:$0xff] %vm1573_vm9, %v1506_v28  ;;  %v2287_v13 = vmax.f32 %v2267_v4, %v2269_v30  ;;  %v2285_v28 = vmax.f32 %v2263_v6, %v2265_v47  ;;  %v2292_v6 = vld [vmem:[%s6286_s9 + $0x8] sm:$0xff] }
 0x287   : > { %1589 = vst.msk [vmem:[#allocation2 + $0x78] sm:$0xff] %vm1573_vm9, %v1508_v37  ;;  %v2259_v37 = vmax.f32 %v2165_v39, 0.0  ;;  %vm3102_vm9 = vcmask 261120  }
 0x289   : > { %v1640_v0 = vpop.permute.xlu0 %1639  ;;  %v1887_v35 = vld [vmem:[#allocation2 + $0x68] sm:$0xff] }
 0x28a   : > { %v1642_v41 = vpop.permute.xlu1 %1641  ;;  %1722 = vst.msk [vmem:[#allocation2 + $0x70] sm:$0xff] %vm1707_vm10, %v1640_v0  ;;  %3916 = vmatmul.mubr.msk.f32.gmra.mxu0 %vm1917_vm12, %v1887_v35  ;;  %v2284_v0 = vmax.f32 %v2260_v12, %v2262_v15  ;;  %v3899_v35 = vpop.f32.mrf.mxu0  ;;  %v2293_v12 = vld [vmem:[%s6286_s9 + $0x10] sm:$0xff] }
 0x28b   : > { %1723 = vst.msk [vmem:[#allocation2 + $0x78] sm:$0xff] %vm1707_vm10, %v1642_v41  ;;  %v2283_v41 = vmax.f32 %v2259_v37, %v2261_v14  ;;  %v2090_v30 = vadd.f32 %v3899_v35, %v5762_v8  ;;  %v2406_v14 = vld [vmem:[%s6287_s10 + $0x10] sm:$0xff]  ;;  %v2407_v37 = vld [vmem:[%s6287_s10 + $0x18] sm:$0xff]  ;;  %v2296_v35 = vld [vmem:[%s6286_s9 + $0x28] sm:$0xff]  ;;  %vm4288_vm10 = vmmov 0  }
 0x28d   : > { %v1774_v43 = vpop.permute.xlu0 %1773  ;;  %v2244_v11 = vmax.f32 %v2090_v30, 0.0 }
 0x28e   : > { %v1776_v45 = vpop.permute.xlu1 %1775  ;;  %1856 = vst.msk [vmem:[#allocation2 + $0x70] sm:$0xff] %vm1841_vm11, %v1774_v43  ;;  %v2084_v43 = vpop.f32.mrf.mxu0 }
 0x28f   : > { %1857 = vst.msk [vmem:[#allocation2 + $0x78] sm:$0xff] %vm1841_vm11, %v1776_v45  ;;  %v2085_v4 = vadd.f32 %v5762_v8, %v2084_v43  ;;  %v2409_v43 = vld [vmem:[%s6287_s10 + $0x28] sm:$0xff]  ;;  %vm3459_vm11 = vcmask 130048  }
 0x290   : > { %v3902_v45 = vpop.f32.mrf.mxu0 }
 0x291   : > { %v2243_v39 = vmax.f32 %v2085_v4, 0.0 }
 0x295   : > { %v1888_v51 = vld [vmem:[#allocation2 + $0x70] sm:$0xff] }
 0x296   : > { %v1889_v5 = vld [vmem:[#allocation2 + $0x78] sm:$0xff]  ;;  %3918 = vmatprep.mubr.msk.f32.mxu0 %vm1917_vm12, %v1888_v51  ;;  %v2094_v51 = vpop.f32.mrf.mxu0 }
 0x297   : > { %3919 = vmatmul.mubr.msk.f32.gmra.mxu0 %vm1917_vm12, %v1889_v5 }
 0x298   : > { %3977 = vmatprep.mubr.f32.mxu0 %v2291_v54 }
 0x2bb   : > { %v3905_v5 = vpop.f32.mrf.mxu0 }
 0x2bd   : > { %v2104_v50 = vpop.f32.mrf.mxu0 }
 0x2be   : > { %v3941_v10 = vpop.f32.mrf.mxu1 }
 0x2bf   : > { %v2230_v18 = vadd.f32 %v3941_v10, %v5762_v8 }
 0x2c0   : > { %v2224_v60 = vpop.f32.mrf.mxu1 }
 0x2c1   : > { %v2225_v22 = vadd.f32 %v5762_v8, %v2224_v60  ;;  %v2272_v25 = vmax.f32 %v2230_v18, 0.0 }
 0x2c3   : > { %v2271_v52 = vmax.f32 %v2225_v22, 0.0 }
 0x2ea   : > { %v3908_v58 = vpop.f32.mrf.mxu0 }
 0x2eb   : > { %v3944_v19 = vpop.f32.mrf.mxu1 }
 0x2ec   : > { %v2240_v46 = vadd.f32 %v3944_v19, %v5762_v8  ;;  %v2114_v2 = vpop.f32.mrf.mxu0 }
 0x2ed   : > { %v2234_v31 = vpop.f32.mrf.mxu1  ;;  %v2115_v26 = vadd.f32 %v5762_v8, %v2114_v2 }
 0x2ee   : > { %v2274_v36 = vmax.f32 %v2240_v46, 0.0  ;;  %v2235_v48 = vadd.f32 %v5762_v8, %v2234_v31  ;;  %v2120_v31 = vadd.f32 %v3908_v58, %v5762_v8  ;;  %v4280_v58 = vmov 0.0  }
 0x2ef   : > { %v2249_v17 = vmax.f32 %v2115_v26, 0.0  ;;  %2526 = vst.msk [vmem:[#allocation4] sm:$0xff] %vm2525_vm13, %v4280_v58  ;;  %2530 = vst.msk [vmem:[#allocation4 + $0x90] sm:$0xff] %vm2525_vm13, %v4280_v58 }
 0x2f0   : > { %v2290_v24 = vmax.f32 %v2272_v25, %v2274_v36  ;;  %v2273_v32 = vmax.f32 %v2235_v48, 0.0  ;;  %v2110_v48 = vadd.f32 %v3905_v5, %v5762_v8  ;;  %v2250_v7 = vmax.f32 %v2120_v31, 0.0  ;;  %v2298_v5 = vld [vmem:[%s6286_s9 + $0x38] sm:$0xff]  ;;  %2528 = vst.msk [vmem:[#allocation4 + $0x8] sm:$0x3] %vm2527_vm14, %v4280_v58 }
 0x2f1   : > { %2531 = vst.msk [vmem:[#allocation4 + $0x98] sm:$0x3] %vm2527_vm14, %v4280_v58 }
 0x2f2   : > { %v2289_v33 = vmax.f32 %v2271_v52, %v2273_v32  ;;  %3945 = vmatprep.subr.mxu0 %v2290_v24  ;;  %3989 = vmatprep.subr.mxu1 %v2290_v24  ;;  %v2105_v32 = vadd.f32 %v5762_v8, %v2104_v50  ;;  %v2248_v62 = vmax.f32 %v2110_v48, 0.0  ;;  %v2411_v50 = vld [vmem:[%s6287_s10 + $0x38] sm:$0xff]  ;;  %2533 = vst.msk [vmem:[#allocation4] sm:$0x1] %vm2532_vm15, %v4280_v58  ;;  %2543 = vst.msk [vmem:[#allocation4 + $0x9] sm:$0x1] %vm2532_vm15, %v4280_v58 }
 0x2f3   : > { %3946 = vmatpush3.msra.mxu0 %v2290_v24  ;;  %3990 = vmatpush3.msra.mxu1 %v2290_v24  ;;  %v2100_v24 = vadd.f32 %v3902_v45, %v5762_v8  ;;  %v2297_v45 = vld [vmem:[%s6286_s9 + $0x30] sm:$0xff]  ;;  %2534 = vst.msk [vmem:[#allocation4 + $0x10] sm:$0x1] %vm2532_vm15, %v4280_v58  ;;  %2535 = vst.msk [vmem:[#allocation4 + $0x20] sm:$0x1] %vm2532_vm15, %v4280_v58 }
 0x2f4   : > { %3947 = vmatprep.subr.mxu0 %v2289_v33  ;;  %3991 = vmatprep.subr.mxu1 %v2289_v33  ;;  %v2247_v42 = vmax.f32 %v2105_v32, 0.0  ;;  %v2278_v3 = vmax.f32 %v2248_v62, %v2250_v7  ;;  %2536 = vst.msk [vmem:[#allocation4 + $0x30] sm:$0x1] %vm2532_vm15, %v4280_v58  ;;  %2537 = vst.msk [vmem:[#allocation4 + $0x40] sm:$0x1] %vm2532_vm15, %v4280_v58 }
 0x2f5   : > { %3948 = vmatpush3.msra.mxu0 %v2289_v33  ;;  %3992 = vmatpush3.msra.mxu1 %v2289_v33  ;;  %v2095_v33 = vadd.f32 %v5762_v8, %v2094_v51  ;;  %v2410_v51 = vld [vmem:[%s6287_s10 + $0x30] sm:$0xff]  ;;  %2538 = vst.msk [vmem:[#allocation4 + $0x50] sm:$0x1] %vm2532_vm15, %v4280_v58  ;;  %2539 = vst.msk [vmem:[#allocation4 + $0x60] sm:$0x1] %vm2532_vm15, %v4280_v58 }
 0x2f6   : > { %3949 = vmatprep.subr.mxu0 %v2288_v38  ;;  %3993 = vmatprep.subr.mxu1 %v2288_v38  ;;  %2540 = vst.msk [vmem:[#allocation4 + $0x70] sm:$0x1] %vm2532_vm15, %v4280_v58  ;;  %2541 = vst.msk [vmem:[#allocation4 + $0x80] sm:$0x1] %vm2532_vm15, %v4280_v58 }
 0x2f7   : > { %3950 = vmatpush3.msra.mxu0 %v2288_v38  ;;  %3994 = vmatpush3.msra.mxu1 %v2288_v38  ;;  %v2246_v38 = vmax.f32 %v2100_v24, 0.0  ;;  %v2245_v47 = vmax.f32 %v2095_v33, 0.0  ;;  %2544 = vst.msk [vmem:[#allocation4 + $0x19] sm:$0x1] %vm2532_vm15, %v4280_v58  ;;  %2545 = vst.msk [vmem:[#allocation4 + $0x29] sm:$0x1] %vm2532_vm15, %v4280_v58 }
 0x2f8   : > { %3951 = vmatprep.subr.mxu0 %v2287_v13  ;;  %3995 = vmatprep.subr.mxu1 %v2287_v13  ;;  %2546 = vst.msk [vmem:[#allocation4 + $0x39] sm:$0x1] %vm2532_vm15, %v4280_v58  ;;  %2547 = vst.msk [vmem:[#allocation4 + $0x49] sm:$0x1] %vm2532_vm15, %v4280_v58 }
 0x2f9   : > { %3952 = vmatpush3.msra.mxu0 %v2287_v13  ;;  %3996 = vmatpush3.msra.mxu1 %v2287_v13  ;;  %v2277_v13 = vmax.f32 %v2247_v42, %v2249_v17  ;;  %v2276_v15 = vmax.f32 %v2244_v11, %v2246_v38  ;;  %2548 = vst.msk [vmem:[#allocation4 + $0x59] sm:$0x1] %vm2532_vm15, %v4280_v58  ;;  %2549 = vst.msk [vmem:[#allocation4 + $0x69] sm:$0x1] %vm2532_vm15, %v4280_v58  ;;  %v2562_v2 = vld [vmem:[#allocation4] sm:$0xff] }
 0x2fa   : > { %3953 = vmatprep.subr.mxu0 %v2286_v9  ;;  %3997 = vmatprep.subr.mxu1 %v2286_v9  ;;  %2550 = vst.msk [vmem:[#allocation4 + $0x79] sm:$0x1] %vm2532_vm15, %v4280_v58  ;;  %2551 = vst.msk [vmem:[#allocation4 + $0x89] sm:$0x1] %vm2532_vm15, %v4280_v58 }
 0x2fb   : > { %3954 = vmatpush3.msra.mxu0 %v2286_v9  ;;  %3998 = vmatpush3.msra.mxu1 %v2286_v9  ;;  %v2405_v9 = vld [vmem:[%s6287_s10 + $0x8] sm:$0xff]  ;;  %2542 = vst.msk [vmem:[#allocation4 + $0x90] sm:$0x1] %vm2532_vm15, %v4280_v58  ;;  %2552 = vst.msk [vmem:[#allocation4 + $0x99] sm:$0x1] %vm2532_vm15, %v4280_v58 }
 0x2fc   : > { %3955 = vmatprep.subr.mxu0 %v2285_v28  ;;  %3999 = vmatprep.subr.mxu1 %v2285_v28  ;;  %2582 = vst.msk [vmem:[#allocation3] sm:$0xff] %vm2525_vm13, %v2562_v2 }
 0x2fd   : > { %3956 = vmatpush3.msra.mxu0 %v2285_v28  ;;  %4000 = vmatpush3.msra.mxu1 %v2285_v28  ;;  %v2294_v28 = vld [vmem:[%s6286_s9 + $0x18] sm:$0xff] }
 0x2fe   : > { %3957 = vmatprep.subr.mxu0 %v2284_v0  ;;  %4001 = vmatprep.subr.mxu1 %v2284_v0 }
 0x2ff   : > { %3958 = vmatpush3.msra.mxu0 %v2284_v0  ;;  %4002 = vmatpush3.msra.mxu1 %v2284_v0  ;;  %v2295_v0 = vld [vmem:[%s6286_s9 + $0x20] sm:$0xff] }
 0x300   : > { %3959 = vmatprep.subr.mxu0 %v2283_v41  ;;  %4003 = vmatprep.subr.mxu1 %v2283_v41 }
 0x301   : > { %3960 = vmatpush3.msra.mxu0 %v2283_v41  ;;  %4004 = vmatpush3.msra.mxu1 %v2283_v41  ;;  %v2408_v41 = vld [vmem:[%s6287_s10 + $0x20] sm:$0xff] }
 0x30b   : > { %v3911_v56 = vpop.f32.mrf.mxu0 }
 0x30c   : > { %v2130_v18 = vadd.f32 %v3911_v56, %v5762_v8  ;;  %v2563_v56 = vld [vmem:[#allocation4 + $0x8] sm:$0x3] }
 0x30d   : > { %v2124_v53 = vpop.f32.mrf.mxu0 }
 0x30e   : > { %v2125_v54 = vadd.f32 %v5762_v8, %v2124_v53  ;;  %v2252_v23 = vmax.f32 %v2130_v18, 0.0  ;;  %v2674_v53 = vrot.slane %v2562_v2, 1 }
 0x310   : > { %v2251_v55 = vmax.f32 %v2125_v54, 0.0 }
 0x32b   : > { %v3914_v16 = vpop.f32.mrf.mxu0 }
 0x32c   : > { %v2140_v61 = vadd.f32 %v3914_v16, %v5762_v8  ;;  %v2675_v16 = vrot.slane %v2563_v56, 1 }
 0x32d   : > { %v2134_v49 = vpop.f32.mrf.mxu0 }
 0x32e   : > { %v2135_v29 = vadd.f32 %v5762_v8, %v2134_v49  ;;  %v2254_v20 = vmax.f32 %v2140_v61, 0.0  ;;  %v2676_v49 = vsel %vm916_vm1, %v2674_v53, %v2675_v16  ;;  %v2950_v53 = vld [vmem:[%s6280_s3 + $0x40] sm:$0xff] }
 0x32f   : > { %2698 = vrot.lane.b32.xlu0 %v2676_v49, %s4281_s18 }
 0x330   : > { %v2253_v27 = vmax.f32 %v2135_v29, 0.0  ;;  %v2280_v44 = vmax.f32 %v2252_v23, %v2254_v20 }
 0x332   : > { %v2279_v1 = vmax.f32 %v2251_v55, %v2253_v27 }
 0x34a   : > { %v3917_v57 = vpop.f32.mrf.mxu0 }
 0x34b   : > { %v2150_v21 = vadd.f32 %v3917_v57, %v5762_v8  ;;  %v2805_v57 = vrot.slane %v2562_v2, 2 }
 0x34c   : > { %v2144_v59 = vpop.f32.mrf.mxu0 }
 0x34d   : > { %v2145_v10 = vadd.f32 %v5762_v8, %v2144_v59  ;;  %v2256_v22 = vmax.f32 %v2150_v21, 0.0  ;;  %v2806_v59 = vrot.slane %v2563_v56, 2  ;;  %v5893_v21 = vld [vmem:[#allocation4 + $0x90] sm:$0xff] }
 0x34e   : > { %2646 = vrot.lane.b32.xlu0 %v5893_v21, %s6315_s28 }
 0x34f   : > { %v2255_v40 = vmax.f32 %v2145_v10, 0.0 }
 0x357   : > { %v3920_v63 = vpop.f32.mrf.mxu0 }
 0x358   : > { %v2160_v60 = vadd.f32 %v3920_v63, %v5762_v8  ;;  %v2807_v63 = vsel %vm1396_vm2, %v2805_v57, %v2806_v59  ;;  %v2949_v57 = vld [vmem:[%s6280_s3 + $0x38] sm:$0xff]  ;;  %v2948_v59 = vld [vmem:[%s6280_s3 + $0x30] sm:$0xff] }
 0x359   : > { %v2154_v19 = vpop.f32.mrf.mxu0  ;;  %2829 = vrot.lane.b32.xlu1 %v2807_v63, %s6321_s29 }
 0x35a   : > { %v2258_v46 = vmax.f32 %v2160_v60, 0.0  ;;  %v2155_v34 = vadd.f32 %v5762_v8, %v2154_v19  ;;  %v2275_v8 = vmax.f32 %v2243_v39, %v2245_v47 }
 0x35c   : > { %v2282_v25 = vmax.f32 %v2256_v22, %v2258_v46  ;;  %v2257_v36 = vmax.f32 %v2155_v34, 0.0 }
 0x35e   : > { %v2281_v52 = vmax.f32 %v2255_v40, %v2257_v36  ;;  %3961 = vmatprep.subr.mxu0 %v2282_v25  ;;  %4005 = vmatprep.subr.mxu1 %v2282_v25 }
 0x35f   : > { %3962 = vmatpush3.msra.mxu0 %v2282_v25  ;;  %4006 = vmatpush3.msra.mxu1 %v2282_v25 }
 0x360   : > { %3963 = vmatprep.subr.mxu0 %v2281_v52  ;;  %4007 = vmatprep.subr.mxu1 %v2281_v52 }
 0x361   : > { %3964 = vmatpush3.msra.mxu0 %v2281_v52  ;;  %4008 = vmatpush3.msra.mxu1 %v2281_v52 }
 0x362   : > { %3965 = vmatprep.subr.mxu0 %v2280_v44  ;;  %4009 = vmatprep.subr.mxu1 %v2280_v44 }
 0x363   : > { %3966 = vmatpush3.msra.mxu0 %v2280_v44  ;;  %4010 = vmatpush3.msra.mxu1 %v2280_v44 }
 0x364   : > { %3967 = vmatprep.subr.mxu0 %v2279_v1  ;;  %4011 = vmatprep.subr.mxu1 %v2279_v1 }
 0x365   : > { %3968 = vmatpush3.msra.mxu0 %v2279_v1  ;;  %4012 = vmatpush3.msra.mxu1 %v2279_v1 }
 0x366   : > { %3969 = vmatprep.subr.mxu0 %v2278_v3  ;;  %4013 = vmatprep.subr.mxu1 %v2278_v3 }
 0x367   : > { %3970 = vmatpush3.msra.mxu0 %v2278_v3  ;;  %4014 = vmatpush3.msra.mxu1 %v2278_v3 }
 0x368   : > { %3971 = vmatprep.subr.mxu0 %v2277_v13  ;;  %4015 = vmatprep.subr.mxu1 %v2277_v13 }
 0x369   : > { %3972 = vmatpush3.msra.mxu0 %v2277_v13  ;;  %4016 = vmatpush3.msra.mxu1 %v2277_v13 }
 0x36a   : > { %3973 = vmatprep.subr.mxu0 %v2276_v15  ;;  %4017 = vmatprep.subr.mxu1 %v2276_v15 }
 0x36b   : > { %3974 = vmatpush3.msra.mxu0 %v2276_v15  ;;  %4018 = vmatpush3.msra.mxu1 %v2276_v15 }
 0x36c   : > { %3975 = vmatprep.subr.mxu0 %v2275_v8  ;;  %4019 = vmatprep.subr.mxu1 %v2275_v8 }
 0x36d   : > { %3976 = vmatpush3.msra.mxu0 %v2275_v8  ;;  %4020 = vmatpush3.msra.mxu1 %v2275_v8 }
 0x36e   : > { %3978 = vmatmul.mubr.f32.vlgmr.msra.gmra.mxu0 %v2292_v6  ;;  %4022 = vmatmul.mubr.f32.vlgmr.msra.gmra.mxu1 %v2405_v9 }
 0x36f   : > { %3980 = vmatprep.mubr.f32.mxu0 %v2293_v12  ;;  %4024 = vmatprep.mubr.f32.mxu1 %v2406_v14 }
 0x370   : > { %4033 = vmatprep.subr.mxu0 %v2950_v53 }
 0x371   : > { %4034 = vmatpush3.msra.mxu0 %v2950_v53 }
 0x372   : > { %3981 = vmatmul.mubr.f32.gmra.mxu0 %v2294_v28  ;;  %4025 = vmatmul.mubr.f32.gmra.mxu1 %v2407_v37 }
 0x373   : > { %3983 = vmatprep.mubr.f32.mxu0 %v2295_v0  ;;  %4027 = vmatprep.mubr.f32.mxu1 %v2408_v41 }
 0x374   : > { %4035 = vmatprep.subr.mxu0 %v2949_v57 }
 0x375   : > { %4036 = vmatpush3.msra.mxu0 %v2949_v57 }
 0x376   : > { %3984 = vmatmul.mubr.f32.gmra.mxu0 %v2296_v35  ;;  %4028 = vmatmul.mubr.f32.gmra.mxu1 %v2409_v43 }
 0x377   : > { %3986 = vmatprep.mubr.f32.mxu0 %v2297_v45  ;;  %4030 = vmatprep.mubr.f32.mxu1 %v2410_v51 }
 0x378   : > { %4037 = vmatprep.subr.mxu0 %v2948_v59 }
 0x379   : > { %4038 = vmatpush3.msra.mxu0 %v2948_v59 }
 0x37a   : > { %3987 = vmatmul.mubr.f32.gmra.mxu0 %v2298_v5  ;;  %4031 = vmatmul.mubr.f32.gmra.mxu1 %v2411_v50 }
 0x42e   : > { %v3979_v61 = vpop.f32.mrf.mxu0  ;;  %v4023_v10 = vpop.f32.mrf.mxu1 }
 0x42f   : > { %v2518_v60 = vmax.f32 %v3979_v61, %v4023_v10  ;;  %v2947_v61 = vld [vmem:[%s6280_s3 + $0x28] sm:$0xff]  ;;  %v2946_v10 = vld [vmem:[%s6280_s3 + $0x20] sm:$0xff] }
 0x430   : > { %v2365_v18 = vpop.f32.mrf.mxu0  ;;  %v2478_v19 = vpop.f32.mrf.mxu1  ;;  %4039 = vmatprep.subr.mxu0 %v2947_v61 }
 0x431   : > { %2555 = vst.msk [vmem:[#allocation4 + $0x21] sm:$0xff] %vm2525_vm13, %v2518_v60  ;;  %v2517_v29 = vmax.f32 %v2365_v18, %v2478_v19  ;;  %4040 = vmatpush3.msra.mxu0 %v2947_v61  ;;  %v2945_v18 = vld [vmem:[%s6280_s3 + $0x18] sm:$0xff] }
 0x432   : > { %v3982_v22 = vpop.f32.mrf.mxu0  ;;  %v4026_v46 = vpop.f32.mrf.mxu1  ;;  %4041 = vmatprep.subr.mxu0 %v2946_v10 }
 0x433   : > { %2554 = vst.msk [vmem:[#allocation4 + $0x11] sm:$0xff] %vm2525_vm13, %v2517_v29  ;;  %v2520_v34 = vmax.f32 %v3982_v22, %v4026_v46  ;;  %4042 = vmatpush3.msra.mxu0 %v2946_v10  ;;  %v2944_v22 = vld [vmem:[%s6280_s3 + $0x10] sm:$0xff]  ;;  %v2943_v46 = vld [vmem:[%s6280_s3 + $0x8] sm:$0xff] }
 0x434   : > { %v2488_v31 = vpop.f32.mrf.mxu1  ;;  %v2375_v54 = vpop.f32.mrf.mxu0  ;;  %4043 = vmatprep.subr.mxu0 %v2945_v18 }
 0x435   : > { %2557 = vst.msk [vmem:[#allocation4 + $0x41] sm:$0xff] %vm2525_vm13, %v2520_v34  ;;  %v2519_v20 = vmax.f32 %v2375_v54, %v2488_v31  ;;  %4044 = vmatpush3.msra.mxu0 %v2945_v18 }
 0x436   : > { %v3985_v40 = vpop.f32.mrf.mxu0  ;;  %v4029_v25 = vpop.f32.mrf.mxu1  ;;  %4045 = vmatprep.subr.mxu0 %v2944_v22 }
 0x437   : > { %2556 = vst.msk [vmem:[#allocation4 + $0x31] sm:$0xff] %vm2525_vm13, %v2519_v20  ;;  %v2522_v36 = vmax.f32 %v3985_v40, %v4029_v25  ;;  %4046 = vmatpush3.msra.mxu0 %v2944_v22  ;;  %v2942_v20 = vld [vmem:[%s6280_s3] sm:$0xff] }
 0x438   : > { %v2566_v48 = vld [vmem:[#allocation4 + $0x20] sm:$0xff]  ;;  %v2567_v26 = vld [vmem:[#allocation4 + $0x28] sm:$0x3]  ;;  %v2498_v23 = vpop.f32.mrf.mxu1  ;;  %v2385_v27 = vpop.f32.mrf.mxu0  ;;  %4047 = vmatprep.subr.mxu0 %v2943_v46 }
 0x439   : > { %2632 = vrot.lane.b32.xlu0 %v2566_v48, %s6315_s28  ;;  %2584 = vst.msk [vmem:[#allocation3 + $0x10] sm:$0xff] %vm2525_vm13, %v2566_v48  ;;  %2600 = vrot.lane.b32.xlu1 %v2566_v48, %s6341_s19  ;;  %v2680_v52 = vrot.slane %v2566_v48, 1  ;;  %v2681_v24 = vrot.slane %v2567_v26, 1  ;;  %2559 = vst.msk [vmem:[#allocation4 + $0x61] sm:$0xff] %vm2525_vm13, %v2522_v36  ;;  %v2521_v7 = vmax.f32 %v2385_v27, %v2498_v23  ;;  %v2811_v42 = vrot.slane %v2566_v48, 2 }
 0x43a   : > { %v2564_v32 = vld [vmem:[#allocation4 + $0x10] sm:$0xff]  ;;  %v3988_v55 = vpop.f32.mrf.mxu0  ;;  %v4032_v44 = vpop.f32.mrf.mxu1  ;;  %v2812_v3 = vrot.slane %v2567_v26, 2  ;;  %v2565_v39 = vld [vmem:[#allocation4 + $0x18] sm:$0x3]  ;;  %4048 = vmatpush3.msra.mxu0 %v2943_v46 }
 0x43b   : > { %v2682_v30 = vsel %vm916_vm1, %v2680_v52, %v2681_v24  ;;  %2583 = vst.msk [vmem:[#allocation3 + $0x8] sm:$0xff] %vm2525_vm13, %v2564_v32  ;;  %2558 = vst.msk [vmem:[#allocation4 + $0x51] sm:$0xff] %vm2525_vm13, %v2521_v7  ;;  %v2524_v62 = vmax.f32 %v3988_v55, %v4032_v44  ;;  %v2677_v8 = vrot.slane %v2564_v32, 1  ;;  %v2678_v6 = vrot.slane %v2565_v39, 1  ;;  %4049 = vmatprep.subr.mxu0 %v2942_v20 }
 0x43c   : > { %v2570_v33 = vld [vmem:[#allocation4 + $0x40] sm:$0xff]  ;;  %v2508_v17 = vpop.f32.mrf.mxu1  ;;  %v2395_v1 = vpop.f32.mrf.mxu0  ;;  %v2813_v13 = vsel %vm1396_vm2, %v2811_v42, %v2812_v3  ;;  %v2808_v9 = vrot.slane %v2564_v32, 2  ;;  %v2809_v14 = vrot.slane %v2565_v39, 2  ;;  %v2571_v28 = vld [vmem:[#allocation4 + $0x48] sm:$0x3]  ;;  %4050 = vmatpush3.msra.mxu0 %v2942_v20  ;;  %v2769_v42 = vrot.slane %v5893_v21, 1 }
 0x43d   : > { %2772 = vrot.lane.b32.xlu1 %v2682_v30, %s6319_s20  ;;  %2598 = vrot.lane.b32.xlu0 %v2564_v32, %s6341_s19  ;;  %2586 = vst.msk [vmem:[#allocation3 + $0x20] sm:$0xff] %vm2525_vm13, %v2570_v33  ;;  %2561 = vst.msk [vmem:[#allocation4 + $0x81] sm:$0xff] %vm2525_vm13, %v2524_v62  ;;  %v2523_v38 = vmax.f32 %v2395_v1, %v2508_v17  ;;  %v2679_v12 = vsel %vm916_vm1, %v2677_v8, %v2678_v6  ;;  %v2686_v0 = vrot.slane %v2570_v33, 1  ;;  %v2581_v17 = vld [vmem:[#allocation4 + $0x98] sm:$0x3] }
 0x43e   : > { %v5913_v4 = vld [vmem:[#allocation4 + $0x30] sm:$0xff]  ;;  %v2810_v37 = vsel %vm1396_vm2, %v2808_v9, %v2809_v14  ;;  %v2687_v41 = vrot.slane %v2571_v28, 1  ;;  %v2817_v43 = vrot.slane %v2570_v33, 2  ;;  %v2818_v45 = vrot.slane %v2571_v28, 2  ;;  %v2569_v5 = vld [vmem:[#allocation4 + $0x38] sm:$0x3] }
 0x43f   : > { %2585 = vst.msk [vmem:[#allocation3 + $0x18] sm:$0xff] %vm2525_vm13, %v5913_v4  ;;  %2560 = vst.msk [vmem:[#allocation4 + $0x71] sm:$0xff] %vm2525_vm13, %v2523_v38  ;;  %v2683_v50 = vrot.slane %v5913_v4, 1  ;;  %v2684_v2 = vrot.slane %v2569_v5, 1  ;;  %v2814_v16 = vrot.slane %v5913_v4, 2  ;;  %v2815_v49 = vrot.slane %v2569_v5, 2 }
 0x440   : > { %v5918_v11 = vld [vmem:[#allocation4 + $0x60] sm:$0xff]  ;;  %v2688_v35 = vsel %vm916_vm1, %v2686_v0, %v2687_v41  ;;  %v2819_v51 = vsel %vm1396_vm2, %v2817_v43, %v2818_v45  ;;  %v2575_v60 = vld [vmem:[#allocation4 + $0x68] sm:$0x3]  ;;  %v2770_v3 = vrot.slane %v2581_v17, 1  ;;  %v2898_v9 = vrot.slane %v5893_v21, 2 }
 0x441   : > { %2702 = vrot.lane.b32.xlu1 %v2682_v30, %s4281_s18  ;;  %2737 = vrot.lane.b32.xlu0 %v2682_v30, %s6317_s26  ;;  %2588 = vst.msk [vmem:[#allocation3 + $0x30] sm:$0xff] %vm2525_vm13, %v5918_v11  ;;  %v2685_v56 = vsel %vm916_vm1, %v2683_v50, %v2684_v2  ;;  %v2816_v63 = vsel %vm1396_vm2, %v2814_v16, %v2815_v49  ;;  %v2692_v19 = vrot.slane %v5918_v11, 1  ;;  %v2693_v29 = vrot.slane %v2575_v60, 1 }
 0x442   : > { %v5925_v47 = vld [vmem:[#allocation4 + $0x50] sm:$0xff]  ;;  %v2823_v31 = vrot.slane %v5918_v11, 2  ;;  %v2824_v54 = vrot.slane %v2575_v60, 2  ;;  %v2573_v25 = vld [vmem:[#allocation4 + $0x58] sm:$0x3] }
 0x443   : > { %2587 = vst.msk [vmem:[#allocation3 + $0x28] sm:$0xff] %vm2525_vm13, %v5925_v47  ;;  %v2694_v34 = vsel %vm916_vm1, %v2692_v19, %v2693_v29  ;;  %v2689_v48 = vrot.slane %v5925_v47, 1  ;;  %v2690_v26 = vrot.slane %v2573_v25, 1  ;;  %v2820_v27 = vrot.slane %v5925_v47, 2 }
 0x444   : > { %v2825_v40 = vsel %vm1396_vm2, %v2823_v31, %v2824_v54  ;;  %v2578_v36 = vld [vmem:[#allocation4 + $0x80] sm:$0xff]  ;;  %v2821_v52 = vrot.slane %v2573_v25, 2  ;;  %v2579_v30 = vld [vmem:[#allocation4 + $0x88] sm:$0x3] }
 0x445   : > { %2901 = vrot.lane.b32.xlu1 %v2813_v13, %s4286_s23  ;;  %2867 = vrot.lane.b32.xlu0 %v2813_v13, %s6313_s27  ;;  %v2691_v23 = vsel %vm916_vm1, %v2689_v48, %v2690_v26  ;;  %v2733_v62 = vrot.slane %v2579_v30, 1  ;;  %v2862_v8 = vrot.slane %v2578_v36, 2  ;;  %v2863_v6 = vrot.slane %v2579_v30, 2 }
 0x446   : > { %v5932_v15 = vld [vmem:[#allocation4 + $0x70] sm:$0xff]  ;;  %v2822_v24 = vsel %vm1396_vm2, %v2820_v27, %v2821_v52  ;;  %v2577_v32 = vld [vmem:[#allocation4 + $0x78] sm:$0x3] }
 0x447   : > { %2589 = vst.msk [vmem:[#allocation3 + $0x38] sm:$0xff] %vm2525_vm13, %v5932_v15  ;;  %v2695_v7 = vrot.slane %v5932_v15, 1  ;;  %v2696_v55 = vrot.slane %v2577_v32, 1  ;;  %v2827_v38 = vrot.slane %v2577_v32, 2 }
 0x449   : > { %2833 = vrot.lane.b32.xlu1 %v2813_v13, %s6321_s29  ;;  %2604 = vrot.lane.b32.xlu0 %v2570_v33, %s6341_s19  ;;  %v2697_v44 = vsel %vm916_vm1, %v2695_v7, %v2696_v55  ;;  %v2771_v13 = vsel %vm916_vm1, %v2769_v42, %v2770_v3 }
 0x44d   : > { %2636 = vrot.lane.b32.xlu1 %v2570_v33, %s6315_s28  ;;  %2735 = vrot.lane.b32.xlu0 %v2679_v12, %s6317_s26  ;;  %v2732_v33 = vrot.slane %v2578_v36, 1 }
 0x44f   : > { %v2734_v1 = vsel %vm916_vm1, %v2732_v33, %v2733_v62  ;;  %vm2656_vm1 = vcmask 458112  }
 0x451   : > { %2700 = vrot.lane.b32.xlu1 %v2679_v12, %s4281_s18  ;;  %2831 = vrot.lane.b32.xlu0 %v2810_v37, %s6321_s29  ;;  %v2899_v12 = vrot.slane %v2581_v17, 2 }
 0x453   : > { %v2900_v0 = vsel %vm1396_vm2, %v2898_v9, %v2899_v12 }
 0x455   : > { %2865 = vrot.lane.b32.xlu1 %v2810_v37, %s6313_s27  ;;  %2776 = vrot.lane.b32.xlu0 %v2688_v35, %s6319_s20  ;;  %v2864_v37 = vsel %vm1396_vm2, %v2862_v8, %v2863_v6 }
 0x459   : > { %2871 = vrot.lane.b32.xlu0 %v2819_v51, %s6313_s27  ;;  %2634 = vrot.lane.b32.xlu1 %v5913_v4, %s6315_s28  ;;  %s6345_s27 = smov 40   ;;  %s3747_s28 = sshll.u32 %s4396_s25, 4 }
 0x45d   : > { %2602 = vrot.lane.b32.xlu1 %v5913_v4, %s6341_s19  ;;  %2608 = vrot.lane.b32.xlu0 %v5918_v11, %s6341_s19  ;;  %v2826_v4 = vrot.slane %v5932_v15, 2 }
 0x461   : > { %2741 = vrot.lane.b32.xlu1 %v2688_v35, %s6317_s26  ;;  %2774 = vrot.lane.b32.xlu0 %v2685_v56, %s6319_s20  ;;  %s6342_s20 = smov 48   ;;  %s512_s26 = sand.u32 1, %s4262_s22  }
 0x465   : > { %2706 = vrot.lane.b32.xlu1 %v2688_v35, %s4281_s18  ;;  %2704 = vrot.lane.b32.xlu0 %v2685_v56, %s4281_s18 }
 0x469   : > { %2905 = vrot.lane.b32.xlu1 %v2819_v51, %s4286_s23  ;;  %2835 = vrot.lane.b32.xlu0 %v2816_v63, %s6321_s29 }
 0x46d   : > { %2837 = vrot.lane.b32.xlu1 %v2819_v51, %s6321_s29  ;;  %2638 = vrot.lane.b32.xlu0 %v5925_v47, %s6342_s20  ;;  %s6346_s29 = smov 16  }
 0x471   : > { %2640 = vrot.lane.b32.xlu1 %v5918_v11, %s6342_s20  ;;  %2606 = vrot.lane.b32.xlu0 %v5925_v47, %s6341_s19  ;;  %v2699_v11 = vpop.permute.xlu0 %2698  ;;  %v2828_v47 = vsel %vm1396_vm2, %v2826_v4, %v2827_v38  ;;  %vm2759_vm2 = vcmask 326912  }
 0x475   : > { %2739 = vrot.lane.b32.xlu1 %v2685_v56, %s6343_s1  ;;  %2780 = vrot.lane.b32.xlu0 %v2694_v34, %s6344_s30  ;;  %v6042_v39 = vpop.permute.xlu0 %2646 }
 0x479   : > { %2903 = vrot.lane.b32.xlu1 %v2816_v63, %s4286_s23  ;;  %2875 = vrot.lane.b32.xlu0 %v2825_v40, %s6345_s27 }
 0x47d   : > { %2869 = vrot.lane.b32.xlu1 %v2816_v63, %s6345_s27  ;;  %2612 = vrot.lane.b32.xlu0 %v2578_v36, %s6341_s19 }
 0x481   : > { %2745 = vrot.lane.b32.xlu1 %v2694_v34, %s6343_s1  ;;  %2778 = vrot.lane.b32.xlu0 %v2691_v23, %s6344_s30 }
 0x485   : > { %2710 = vrot.lane.b32.xlu1 %v2694_v34, %s4281_s18  ;;  %2708 = vrot.lane.b32.xlu0 %v2691_v23, %s4281_s18 }
 0x489   : > { %2909 = vrot.lane.b32.xlu1 %v2825_v40, %s4286_s23  ;;  %2839 = vrot.lane.b32.xlu0 %v2822_v24, %s6346_s29 }
 0x48d   : > { %2644 = vrot.lane.b32.xlu1 %v2578_v36, %s6342_s20  ;;  %2642 = vrot.lane.b32.xlu0 %v5932_v15, %s6342_s20  ;;  %s3622_s20 = scalar_lea.sflag [#allocation6], %s512_s26 }
 0x491   : > { %2743 = vrot.lane.b32.xlu1 %v2691_v23, %s6343_s1  ;;  %2610 = vrot.lane.b32.xlu0 %v5932_v15, %s6341_s19  ;;  %v2830_v15 = vpop.permute.xlu1 %2829 }
 0x495   : > { %2907 = vrot.lane.b32.xlu1 %v2822_v24, %s4286_s23  ;;  %2782 = vrot.lane.b32.xlu0 %v2697_v44, %s6344_s30 }
 0x499   : > { %2873 = vrot.lane.b32.xlu1 %v2822_v24, %s6345_s27  ;;  %2712 = vrot.lane.b32.xlu0 %v2697_v44, %s4281_s18 }
 0x49d   : > { %2747 = vrot.lane.b32.xlu1 %v2697_v44, %s6343_s1  ;;  %2749 = vrot.lane.b32.xlu0 %v2734_v1, %s6343_s1  ;;  %s4289_s1 = smov [#allocation5]  }
 0x49e   : > { %s4214_s25 = sshll.u32 %s4289_s1, 4  ;;  %s4215_s25 = int_to_ptr.vmem [resolvable:$false] %s4214_s25 }
 0x4a1   : > { %2784 = vrot.lane.b32.xlu1 %v2734_v1, %s6344_s30  ;;  %2911 = vrot.lane.b32.xlu0 %v2828_v47, %s4286_s23 }
 0x4a5   : > { %2786 = vrot.lane.b32.xlu1 %v2771_v13, %s6344_s30  ;;  %2841 = vrot.lane.b32.xlu0 %v2825_v40, %s6346_s29  ;;  %s4216_s30 = scalar_lea.vmem %s4215_s25, 32 }
 0x4a9   : > { %2843 = vrot.lane.b32.xlu1 %v2828_v47, %s6346_s29  ;;  %2877 = vrot.lane.b32.xlu0 %v2828_v47, %s6345_s27 }
 0x4ab   : > { %v2633_v14 = vpop.permute.xlu0 %2632  ;;  %v2601_v28 = vpop.permute.xlu1 %2600 }
 0x4ac   : > { %2624 = vst.msk [vmem:[#allocation3 + $0x8] sm:$0xff] %vm2622_vm0, %v2601_v28 }
 0x4ad   : > { %2879 = vrot.lane.b32.xlu1 %v2864_v37, %s6345_s27  ;;  %2913 = vrot.lane.b32.xlu0 %v2864_v37, %s4286_s23  ;;  %s513_s27 = scalar_lea.vmem [#allocation5], %s512_s26 }
 0x4ae   : > { %s3634_s29 = sshll.u32 %s513_s27, 4  ;;  %s3635_s29 = int_to_ptr.vmem [resolvable:$true] %s3634_s29 }
 0x4af   : > { %v2773_v41 = vpop.permute.xlu1 %2772  ;;  %v2599_v35 = vpop.permute.xlu0 %2598  ;;  %s4210_s2 = scalar_lea.vmem %s3635_s29, 16  ;;  %p4217_p0 = scmp.lt.s32.totalorder %s3635_s29, %s4215_s25 }
 0x4b0   : > { %2623 = vst.msk [vmem:[#allocation3] sm:$0xff] %vm2622_vm0, %v2599_v35  ;;  %p4211_p11 = scmp.ne.s32.totalorder %s3635_s29, %s4210_s2  ;;  %p4218_p1 = scmp.lt.s32.totalorder %s4216_s30, %s4210_s2 }
 0x4b1   : > { %2657 = vst.msk [vmem:[#allocation3] sm:$0xff] %vm2656_vm1, %v2633_v14  ;;  %2915 = vrot.lane.b32.xlu1 %v2900_v0, %s4286_s23  ;;  %s6242_s23 = scalar_lea.hbm %s6293_s16, %s3747_s28 }
 0x4b2   : > { %2723 = vst.msk [vmem:[#allocation3] sm:$0xff] %vm2722_vm3, %v2699_v11  ;;  %p4212_p12 = pnand %p4211_p11, %p4413_p5  ;;  %p4219_p2 = por %p4218_p1, %p4217_p0 }
 0x4b3   : > { %v2703_v21 = vpop.permute.xlu1 %2702  ;;  %v2738_v43 = vpop.permute.xlu0 %2737 }
 0x4b4   : > { %p4213_p13 = pneg %p4212_p12 }
 0x4b6   : > { %p4220_p3 = pnand %p4219_p2, %p4213_p13 }
 0x4b7   : > { %v2902_v45 = vpop.permute.xlu1 %2901  ;;  %v2868_v51 = vpop.permute.xlu0 %2867 }
 0x4bb   : > { %v2834_v5 = vpop.permute.xlu1 %2833  ;;  %v2605_v50 = vpop.permute.xlu0 %2604 }
 0x4bc   : > { %2626 = vst.msk [vmem:[#allocation3 + $0x18] sm:$0xff] %vm2622_vm0, %v2605_v50 }
 0x4bf   : > { %v2637_v2 = vpop.permute.xlu1 %2636  ;;  %v2736_v56 = vpop.permute.xlu0 %2735 }
 0x4c0   : > { %2760 = vst.msk [vmem:[#allocation3] sm:$0xff] %vm2759_vm2, %v2736_v56 }
 0x4c1   : > { %2797 = vst.msk [vmem:[#allocation3] sm:$0xff] %vm2796_vm4, %v2773_v41 }
 0x4c2   : > { %2854 = vst.msk [vmem:[#allocation3] sm:$0xff] %vm2853_vm5, %v2830_v15 }
 0x4c3   : > { %v2701_v53 = vpop.permute.xlu1 %2700  ;;  %v2832_v16 = vpop.permute.xlu0 %2831 }
 0x4c7   : > { %v2866_v49 = vpop.permute.xlu1 %2865  ;;  %v2777_v57 = vpop.permute.xlu0 %2776 }
 0x4c8   : > { %2890 = vst.msk [vmem:[#allocation3] sm:$0xff] %vm2889_vm6, %v2866_v49 }
 0x4c9   : > { %2926 = vst.msk [vmem:[#allocation3] sm:$0xff] %vm2925_vm7, %v2902_v45  ;;  %v3100_v45 = vld [vmem:[%s6288_s11] sm:$0xff] }
 0x4cb   : > { %v2872_v59 = vpop.permute.xlu0 %2871  ;;  %v2635_v63 = vpop.permute.xlu1 %2634 }
 0x4cc   : > { %2658 = vst.msk [vmem:[#allocation3 + $0x8] sm:$0xff] %vm2656_vm1, %v2635_v63 }
 0x4cd   : > { %2724 = vst.msk [vmem:[#allocation3 + $0x8] sm:$0xff] %vm2722_vm3, %v2701_v53 }
 0x4ce   : > { %2761 = vst.msk [vmem:[#allocation3 + $0x8] sm:$0xff] %vm2759_vm2, %v2738_v43 }
 0x4cf   : > { %v2603_v61 = vpop.permute.xlu1 %2602  ;;  %v2609_v10 = vpop.permute.xlu0 %2608 }
 0x4d0   : > { %2625 = vst.msk [vmem:[#allocation3 + $0x10] sm:$0xff] %vm2622_vm0, %v2603_v61  ;;  %2628 = vst.msk [vmem:[#allocation3 + $0x28] sm:$0xff] %vm2622_vm0, %v2609_v10  ;;  %v2934_v60 = vld [vmem:[#allocation3] sm:$0xff] }
 0x4d1   : > { %2659 = vst.msk [vmem:[#allocation3 + $0x10] sm:$0xff] %vm2656_vm1, %v2637_v2  ;;  %4051 = vmatprep.mubr.msk.f32.mxu0 %vm2958_vm8, %v2934_v60 }
 0x4d2   : > { %2725 = vst.msk [vmem:[#allocation3 + $0x10] sm:$0xff] %vm2722_vm3, %v2703_v21 }
 0x4d3   : > { %v2742_v18 = vpop.permute.xlu1 %2741  ;;  %v2775_v19 = vpop.permute.xlu0 %2774 }
 0x4d4   : > { %2798 = vst.msk [vmem:[#allocation3 + $0x8] sm:$0xff] %vm2796_vm4, %v2775_v19 }
 0x4d5   : > { %2855 = vst.msk [vmem:[#allocation3 + $0x8] sm:$0xff] %vm2853_vm5, %v2832_v16  ;;  %v3728_v16 = vld [vmem:[%s6281_s4] ss:$0 sm:$0xff] }
 0x4d6   : > { %2891 = vst.msk [vmem:[#allocation3 + $0x8] sm:$0xff] %vm2889_vm6, %v2868_v51 }
 0x4d7   : > { %v2707_v29 = vpop.permute.xlu1 %2706  ;;  %v2705_v22 = vpop.permute.xlu0 %2704 }
 0x4db   : > { %v2906_v46 = vpop.permute.xlu1 %2905  ;;  %v2836_v34 = vpop.permute.xlu0 %2835 }
 0x4df   : > { %v2838_v31 = vpop.permute.xlu1 %2837  ;;  %v2639_v54 = vpop.permute.xlu0 %2638 }
 0x4e0   : > { %2660 = vst.msk [vmem:[#allocation3 + $0x18] sm:$0xff] %vm2656_vm1, %v2639_v54 }
 0x4e1   : > { %2726 = vst.msk [vmem:[#allocation3 + $0x18] sm:$0xff] %vm2722_vm3, %v2705_v22 }
 0x4e2   : > { %2763 = vst.msk [vmem:[#allocation3 + $0x18] sm:$0xff] %vm2759_vm2, %v2742_v18 }
 0x4e3   : > { %v2641_v20 = vpop.permute.xlu1 %2640  ;;  %v2607_v40 = vpop.permute.xlu0 %2606 }
 0x4e4   : > { %2627 = vst.msk [vmem:[#allocation3 + $0x20] sm:$0xff] %vm2622_vm0, %v2607_v40 }
 0x4e5   : > { %2661 = vst.msk [vmem:[#allocation3 + $0x20] sm:$0xff] %vm2656_vm1, %v2641_v20 }
 0x4e6   : > { %2727 = vst.msk [vmem:[#allocation3 + $0x20] sm:$0xff] %vm2722_vm3, %v2707_v29 }
 0x4e7   : > { %v2740_v25 = vpop.permute.xlu1 %2739  ;;  %v2781_v36 = vpop.permute.xlu0 %2780 }
 0x4e8   : > { %2762 = vst.msk [vmem:[#allocation3 + $0x10] sm:$0xff] %vm2759_vm2, %v2740_v25 }
 0x4e9   : > { %2799 = vst.msk [vmem:[#allocation3 + $0x10] sm:$0xff] %vm2796_vm4, %v2777_v57 }
 0x4ea   : > { %2856 = vst.msk [vmem:[#allocation3 + $0x10] sm:$0xff] %vm2853_vm5, %v2834_v5 }
 0x4eb   : > { %v2904_v48 = vpop.permute.xlu1 %2903  ;;  %v2876_v26 = vpop.permute.xlu0 %2875 }
 0x4ec   : > { %2927 = vst.msk [vmem:[#allocation3 + $0x8] sm:$0xff] %vm2925_vm7, %v2904_v48 }
 0x4ef   : > { %v2870_v23 = vpop.permute.xlu1 %2869  ;;  %v2613_v27 = vpop.permute.xlu0 %2612 }
 0x4f0   : > { %2892 = vst.msk [vmem:[#allocation3 + $0x10] sm:$0xff] %vm2889_vm6, %v2870_v23 }
 0x4f1   : > { %2630 = vst.msk [vmem:[#allocation3 + $0x38] sm:$0xff] %vm2622_vm0, %v2613_v27  ;;  %v3101_v27 = vld [vmem:[%s6288_s11 + $0x8] sm:$0xff] }
 0x4f2   : > { %2928 = vst.msk [vmem:[#allocation3 + $0x10] sm:$0xff] %vm2925_vm7, %v2906_v46 }
 0x4f3   : > { %2664 = vst.msk [vmem:[#allocation3 + $0x38] sm:$0xff] %vm2656_vm1, %v6042_v39  ;;  %v2746_v52 = vpop.permute.xlu1 %2745  ;;  %v2779_v24 = vpop.permute.xlu0 %2778  ;;  %v2935_v32 = vld [vmem:[#allocation3 + $0x8] sm:$0xff] }
 0x4f4   : > { %2800 = vst.msk [vmem:[#allocation3 + $0x18] sm:$0xff] %vm2796_vm4, %v2779_v24  ;;  %4052 = vmatmul.mubr.msk.f32.vlgmr.msra.gmra.mxu0 %vm2958_vm8, %v2935_v32  ;;  %v3185_v24 = vld [vmem:[%s6289_s12 + $0x8] sm:$0xff]  ;;  %v3269_v32 = vld [vmem:[%s6282_s5] sm:$0xff] }
 0x4f5   : > { %2857 = vst.msk [vmem:[#allocation3 + $0x18] sm:$0xff] %vm2853_vm5, %v2836_v34 }
 0x4f6   : > { %2893 = vst.msk [vmem:[#allocation3 + $0x18] sm:$0xff] %vm2889_vm6, %v2872_v59 }
 0x4f7   : > { %v2711_v7 = vpop.permute.xlu1 %2710  ;;  %v2709_v55 = vpop.permute.xlu0 %2708 }
 0x4f9   : > { %v2936_v44 = vld [vmem:[#allocation3 + $0x10] sm:$0xff] }
 0x4fa   : > { %4054 = vmatprep.mubr.msk.f32.mxu0 %vm2958_vm8, %v2936_v44 }
 0x4fb   : > { %v2910_v30 = vpop.permute.xlu1 %2909  ;;  %v2840_v33 = vpop.permute.xlu0 %2839 }
 0x4ff   : > { %v2645_v62 = vpop.permute.xlu1 %2644  ;;  %v2643_v17 = vpop.permute.xlu0 %2642 }
 0x500   : > { %2662 = vst.msk [vmem:[#allocation3 + $0x28] sm:$0xff] %vm2656_vm1, %v2643_v17  ;;  %v3372_v17 = vld [vmem:[%s6290_s13] sm:$0xff] }
 0x501   : > { %2728 = vst.msk [vmem:[#allocation3 + $0x28] sm:$0xff] %vm2722_vm3, %v2709_v55  ;;  %4090 = vmatprep.subr.mxu1 %v3372_v17 }
 0x502   : > { %2765 = vst.msk [vmem:[#allocation3 + $0x28] sm:$0xff] %vm2759_vm2, %v2746_v52  ;;  %v3184_v52 = vld [vmem:[%s6289_s12] sm:$0xff]  ;;  %4091 = vmatpush3.msra.mxu1 %v3372_v17 }
 0x503   : > { %v2744_v1 = vpop.permute.xlu1 %2743  ;;  %v2611_v4 = vpop.permute.xlu0 %2610  ;;  %4102 = vmatprep.subr.mxu1 %v4280_v58 }
 0x504   : > { %2764 = vst.msk [vmem:[#allocation3 + $0x20] sm:$0xff] %vm2759_vm2, %v2744_v1  ;;  %v3741_v1 = vld [vmem:[%s6283_s6] ss:$0 sm:$0xff] }
 0x505   : > { %2629 = vst.msk [vmem:[#allocation3 + $0x30] sm:$0xff] %vm2622_vm0, %v2611_v4 }
 0x506   : > { %2801 = vst.msk [vmem:[#allocation3 + $0x20] sm:$0xff] %vm2796_vm4, %v2781_v36 }
 0x507   : > { %2663 = vst.msk [vmem:[#allocation3 + $0x30] sm:$0xff] %vm2656_vm1, %v2645_v62  ;;  %v2908_v38 = vpop.permute.xlu1 %2907  ;;  %v2783_v42 = vpop.permute.xlu0 %2782 }
 0x508   : > { %2858 = vst.msk [vmem:[#allocation3 + $0x20] sm:$0xff] %vm2853_vm5, %v2838_v31 }
 0x509   : > { %2729 = vst.msk [vmem:[#allocation3 + $0x30] sm:$0xff] %vm2722_vm3, %v2711_v7 }
 0x50a   : > { %2929 = vst.msk [vmem:[#allocation3 + $0x18] sm:$0xff] %vm2925_vm7, %v2908_v38 }
 0x50b   : > { %2802 = vst.msk [vmem:[#allocation3 + $0x28] sm:$0xff] %vm2796_vm4, %v2783_v42  ;;  %v2874_v3 = vpop.permute.xlu1 %2873  ;;  %v2713_v11 = vpop.permute.xlu0 %2712 }
 0x50c   : > { %2859 = vst.msk [vmem:[#allocation3 + $0x28] sm:$0xff] %vm2853_vm5, %v2840_v33 }
 0x50d   : > { %2895 = vst.msk [vmem:[#allocation3 + $0x28] sm:$0xff] %vm2889_vm6, %v2876_v26  ;;  %2894 = vst.msk [vmem:[#allocation3 + $0x20] sm:$0xff] %vm2889_vm6, %v2874_v3 }
 0x50e   : > { %2730 = vst.msk [vmem:[#allocation3 + $0x38] sm:$0xff] %vm2722_vm3, %v2713_v11 }
 0x50f   : > { %2930 = vst.msk [vmem:[#allocation3 + $0x20] sm:$0xff] %vm2925_vm7, %v2910_v30  ;;  %v2748_v47 = vpop.permute.xlu1 %2747  ;;  %v2750_v13 = vpop.permute.xlu0 %2749 }
 0x510   : > { %2766 = vst.msk [vmem:[#allocation3 + $0x30] sm:$0xff] %vm2759_vm2, %v2748_v47  ;;  %2767 = vst.msk [vmem:[#allocation3 + $0x38] sm:$0xff] %vm2759_vm2, %v2750_v13 }
 0x511   : > { %v2937_v39 = vld [vmem:[#allocation3 + $0x18] sm:$0xff] }
 0x512   : > { %4055 = vmatmul.mubr.msk.f32.gmra.mxu0 %vm2958_vm8, %v2937_v39 }
 0x513   : > { %v2785_v15 = vpop.permute.xlu1 %2784  ;;  %v2912_v8 = vpop.permute.xlu0 %2911 }
 0x514   : > { %2803 = vst.msk [vmem:[#allocation3 + $0x30] sm:$0xff] %vm2796_vm4, %v2785_v15 }
 0x515   : > { %2931 = vst.msk [vmem:[#allocation3 + $0x28] sm:$0xff] %vm2925_vm7, %v2912_v8 }
 0x516   : > { %v2938_v6 = vld [vmem:[#allocation3 + $0x20] sm:$0xff] }
 0x517   : > { %4057 = vmatprep.mubr.msk.f32.mxu0 %vm2958_vm8, %v2938_v6  ;;  %v2787_v9 = vpop.permute.xlu1 %2786  ;;  %v2842_v12 = vpop.permute.xlu0 %2841 }
 0x518   : > { %2804 = vst.msk [vmem:[#allocation3 + $0x38] sm:$0xff] %vm2796_vm4, %v2787_v9 }
 0x519   : > { %2860 = vst.msk [vmem:[#allocation3 + $0x30] sm:$0xff] %vm2853_vm5, %v2842_v12 }
 0x51b   : > { %v2844_v14 = vpop.permute.xlu1 %2843  ;;  %v2878_v28 = vpop.permute.xlu0 %2877 }
 0x51c   : > { %v2939_v37 = vld [vmem:[#allocation3 + $0x28] sm:$0xff]  ;;  %2861 = vst.msk [vmem:[#allocation3 + $0x38] sm:$0xff] %vm2853_vm5, %v2844_v14 }
 0x51d   : > { %2896 = vst.msk [vmem:[#allocation3 + $0x30] sm:$0xff] %vm2889_vm6, %v2878_v28  ;;  %4058 = vmatmul.mubr.msk.f32.gmra.mxu0 %vm2958_vm8, %v2939_v37 }
 0x51f   : > { %v2880_v0 = vpop.permute.xlu1 %2879  ;;  %v2914_v41 = vpop.permute.xlu0 %2913 }
 0x520   : > { %2897 = vst.msk [vmem:[#allocation3 + $0x38] sm:$0xff] %vm2889_vm6, %v2880_v0  ;;  %v3548_v0 = vld [vmem:[%s6284_s7 + $0x78] sm:$0xff] }
 0x521   : > { %2932 = vst.msk [vmem:[#allocation3 + $0x30] sm:$0xff] %vm2925_vm7, %v2914_v41  ;;  %v3547_v41 = vld [vmem:[%s6284_s7 + $0x70] sm:$0xff] }
 0x523   : > { %v2916_v35 = vpop.permute.xlu1 %2915 }
 0x524   : > { %2933 = vst.msk [vmem:[#allocation3 + $0x38] sm:$0xff] %vm2925_vm7, %v2916_v35  ;;  %v3546_v35 = vld [vmem:[%s6284_s7 + $0x68] sm:$0xff] }
 0x528   : > { %v2940_v21 = vld [vmem:[#allocation3 + $0x30] sm:$0xff] }
 0x529   : > { %4060 = vmatprep.mubr.msk.f32.mxu0 %vm2958_vm8, %v2940_v21  ;;  %v3545_v21 = vld [vmem:[%s6284_s7 + $0x60] sm:$0xff] }
 0x52b   : > { %v2941_v43 = vld [vmem:[#allocation3 + $0x38] sm:$0xff] }
 0x52c   : > { %4061 = vmatmul.mubr.msk.f32.gmra.mxu0 %vm2958_vm8, %v2941_v43  ;;  %v3544_v43 = vld [vmem:[%s6284_s7 + $0x58] sm:$0xff] }
 0x52d   : > { %4071 = vmatprep.mubr.msk.f32.mxu0 %vm3102_vm9, %v3100_v45  ;;  %v3543_v45 = vld [vmem:[%s6284_s7 + $0x50] sm:$0xff] }
 0x5b4   : > { %v4053_v51 = vpop.f32.mrf.mxu0 }
 0x5b5   : > { %v3055_v34 = vadd.f32 %v4053_v51, %v3728_v16  ;;  %v3542_v51 = vld [vmem:[%s6284_s7 + $0x48] sm:$0xff] }
 0x5b6   : > { %v3049_v5 = vpop.f32.mrf.mxu0 }
 0x5b7   : > { %v3050_v18 = vadd.f32 %v3728_v16, %v3049_v5  ;;  %v3089_v48 = vmax.f32 %v3055_v34, 0.0  ;;  %v3541_v5 = vld [vmem:[%s6284_s7 + $0x40] sm:$0xff] }
 0x5b8   : > { %v3549_v34 = vld [vmem:[%s6285_s8] sm:$0x1] }
 0x5b9   : > { %v3088_v40 = vmax.f32 %v3050_v18, 0.0 }
 0x5bb   : > { %v3096_v23 = vmax.f32 %v3088_v40, %v3089_v48 }
 0x5d2   : > { %v4056_v50 = vpop.f32.mrf.mxu0 }
 0x5d3   : > { %v3065_v19 = vadd.f32 %v4056_v50, %v3728_v16  ;;  %v3540_v50 = vld [vmem:[%s6284_s7 + $0x38] sm:$0xff] }
 0x5d4   : > { %v3059_v2 = vpop.f32.mrf.mxu0 }
 0x5d5   : > { %v3060_v61 = vadd.f32 %v3728_v16, %v3059_v2  ;;  %v3091_v25 = vmax.f32 %v3065_v19, 0.0  ;;  %v3539_v2 = vld [vmem:[%s6284_s7 + $0x30] sm:$0xff]  ;;  %v3454_v19 = vld [vmem:[%s6292_s15] sm:$0x1] }
 0x5d7   : > { %v3090_v31 = vmax.f32 %v3060_v61, 0.0  ;;  %v3455_v61 = vld [vmem:[%s6291_s14] sm:$0xff] }
 0x5d9   : > { %v3097_v26 = vmax.f32 %v3090_v31, %v3091_v25 }
 0x5dd   : > { %v4059_v56 = vpop.f32.mrf.mxu0 }
 0x5de   : > { %v3075_v10 = vadd.f32 %v4059_v56, %v3728_v16  ;;  %v3538_v56 = vld [vmem:[%s6284_s7 + $0x28] sm:$0xff] }
 0x5df   : > { %v3069_v53 = vpop.f32.mrf.mxu0 }
 0x5e0   : > { %v3070_v57 = vadd.f32 %v3728_v16, %v3069_v53  ;;  %v3093_v54 = vmax.f32 %v3075_v10, 0.0  ;;  %v3537_v53 = vld [vmem:[%s6284_s7 + $0x20] sm:$0xff] }
 0x5e2   : > { %v3092_v29 = vmax.f32 %v3070_v57, 0.0  ;;  %v3534_v57 = vld [vmem:[%s6284_s7 + $0x8] sm:$0xff] }
 0x5e4   : > { %v3098_v36 = vmax.f32 %v3092_v29, %v3093_v54  ;;  %v3533_v29 = vld [vmem:[%s6284_s7] sm:$0xff] }
 0x5ec   : > { %v4062_v49 = vpop.f32.mrf.mxu0 }
 0x5ed   : > { %v3085_v59 = vadd.f32 %v4062_v49, %v3728_v16  ;;  %v3535_v49 = vld [vmem:[%s6284_s7 + $0x10] sm:$0xff] }
 0x5ee   : > { %v3079_v63 = vpop.f32.mrf.mxu0 }
 0x5ef   : > { %v3080_v60 = vadd.f32 %v3728_v16, %v3079_v63  ;;  %v3095_v22 = vmax.f32 %v3085_v59, 0.0  ;;  %v3536_v16 = vld [vmem:[%s6284_s7 + $0x18] sm:$0xff]  ;;  %v3456_v59 = vld [vmem:[%s6291_s14 + $0x8] sm:$0xff] }
 0x5f1   : > { %v3094_v46 = vmax.f32 %v3080_v60, 0.0 }
 0x5f3   : > { %v3099_v20 = vmax.f32 %v3094_v46, %v3095_v22 }
 0x5f5   : > { %4063 = vmatprep.subr.mxu0 %v3099_v20 }
 0x5f6   : > { %4064 = vmatpush3.msra.mxu0 %v3099_v20 }
 0x5f7   : > { %4065 = vmatprep.subr.mxu0 %v3098_v36 }
 0x5f8   : > { %4066 = vmatpush3.msra.mxu0 %v3098_v36 }
 0x5f9   : > { %4067 = vmatprep.subr.mxu0 %v3097_v26 }
 0x5fa   : > { %4068 = vmatpush3.msra.mxu0 %v3097_v26 }
 0x5fb   : > { %4069 = vmatprep.subr.mxu0 %v3096_v23 }
 0x5fc   : > { %4070 = vmatpush3.msra.mxu0 %v3096_v23 }
 0x5fd   : > { %4074 = vmatprep.subr.mxu0 %v3099_v20  ;;  %4072 = vmatmul.mubr.msk.f32.vlgmr.msra.gmra.mxu0 %vm3102_vm9, %v3101_v27 }
 0x5fe   : > { %4075 = vmatpush3.msra.mxu0 %v3099_v20  ;;  %4082 = vmatprep.mubr.msk.f32.mxu0 %vm3102_vm9, %v3184_v52 }
 0x5ff   : > { %4076 = vmatprep.subr.mxu0 %v3098_v36 }
 0x600   : > { %4077 = vmatpush3.msra.mxu0 %v3098_v36 }
 0x601   : > { %4078 = vmatprep.subr.mxu0 %v3097_v26 }
 0x602   : > { %4079 = vmatpush3.msra.mxu0 %v3097_v26 }
 0x603   : > { %4080 = vmatprep.subr.mxu0 %v3096_v23 }
 0x604   : > { %4081 = vmatpush3.msra.mxu0 %v3096_v23 }
 0x605   : > { %4083 = vmatmul.mubr.msk.f32.vlgmr.msra.gmra.mxu0 %vm3102_vm9, %v3185_v24  ;;  %4085 = vmatprep.subr.mxu0 %v3269_v32 }
 0x606   : > { %4086 = vmatpush3.msra.mxu0 %v3269_v32 }
 0x607   : > { %4095 = vmatprep.subr.mxu0 %v4280_v58 }
 0x6bd   : > { %v4073_v7 = vpop.f32.mrf.mxu0 }
 0x6bf   : > { %v3175_v55 = vpop.f32.mrf.mxu0 }
 0x6c5   : > { %v4084_v44 = vpop.f32.mrf.mxu0 }
 0x6c6   : > { %v3268_v62 = vmax.f32 %v4073_v7, %v4084_v44 }
 0x6c7   : > { %v3258_v30 = vpop.f32.mrf.mxu0 }
 0x6c8   : > { %v3267_v33 = vmax.f32 %v3175_v55, %v3258_v30 }
 0x6ca   : > { %4087 = vmatprep.mubr.msk.f32.mxu0 %vm2525_vm13, %v3267_v33 }
 0x6cb   : > { %4088 = vmatmul.mubr.msk.f32.vlgmr.msra.gmra.mxu0 %vm2525_vm13, %v3268_v62 }
 0x6cc   : > { %4099 = vmatprep.mubr.msk.f32.mxu0 %vm4288_vm10, %v4280_v58 }
 0x78b   : > { %v4089_v4 = vpop.f32.mrf.mxu0 }
 0x78c   : > { %v3355_v38 = vadd.f32 %v4089_v4, %v3741_v1 }
 0x78d   : > { %v3349_v42 = vpop.f32.mrf.mxu0 }
 0x78e   : > { %v3359_v3 = vsub.f32 0.0, %v3355_v38  ;;  %v3350_v11 = vadd.f32 %v3741_v1, %v3349_v42 }
 0x790   : > { %v3362_v47 = vmul.f32 1.442695, %v3359_v3  ;;  %v3358_v13 = vsub.f32 0.0, %v3350_v11 }
 0x792   : > { %4202 = vpow2.f32 %v3362_v47  ;;  %v3360_v39 = vmul.f32 1.442695, %v3358_v13 }
 0x794   : > { %4204 = vpow2.f32 %v3360_v39 }
 0x79f   : > { %v4203_v15 = vpop.eup %4202 }
 0x7a0   : > { %v3365_v8 = vadd.f32 1.0, %v4203_v15 }
 0x7a1   : > { %v4205_v6 = vpop.eup %4204 }
 0x7a2   : > { %v3364_v9 = vadd.f32 1.0, %v4205_v6  ;;  %4206 = vrcp.f32 %v3365_v8 }
 0x7a4   : > { %4208 = vrcp.f32 %v3364_v9 }
 0x7af   : > { %v4207_v12 = vpop.eup %4206 }
 0x7b0   : > { %v3371_v37 = vmul.f32 %v4207_v12, %v3268_v62 }
 0x7b1   : > { %v4209_v14 = vpop.eup %4208 }
 0x7b2   : > { %v3370_v28 = vmul.f32 %v4209_v14, %v3267_v33 }
 0x7b4   : > { %4092 = vmatprep.mubr.msk.f32.mxu1 %vm2525_vm13, %v3370_v28 }
 0x7b5   : > { %4093 = vmatmul.mubr.msk.f32.vlgmr.msra.gmra.mxu1 %vm2525_vm13, %v3371_v37 }
 0x7b6   : > { %4134 = vmatprep.mubr.msk.f32.mxu1 %vm4288_vm10, %v4280_v58  ;;  %4103 = vmatpush3.msra.mxu1 %v3548_v0 }
 0x7b7   : > { %4104 = vmatprep.subr.mxu1 %v4280_v58 }
 0x7b8   : > { %4105 = vmatpush3.msra.mxu1 %v3547_v41 }
 0x7b9   : > { %4106 = vmatprep.subr.mxu1 %v4280_v58 }
 0x7ba   : > { %4107 = vmatpush3.msra.mxu1 %v3546_v35 }
 0x7bb   : > { %4108 = vmatprep.subr.mxu1 %v4280_v58 }
 0x7bc   : > { %4109 = vmatpush3.msra.mxu1 %v3545_v21 }
 0x7bd   : > { %4110 = vmatprep.subr.mxu1 %v4280_v58 }
 0x7be   : > { %4111 = vmatpush3.msra.mxu1 %v3544_v43 }
 0x7bf   : > { %4112 = vmatprep.subr.mxu1 %v4280_v58 }
 0x7c0   : > { %4113 = vmatpush3.msra.mxu1 %v3543_v45 }
 0x7c1   : > { %4114 = vmatprep.subr.mxu1 %v4280_v58 }
 0x7c2   : > { %4115 = vmatpush3.msra.mxu1 %v3542_v51 }
 0x7c3   : > { %4116 = vmatprep.subr.mxu1 %v4280_v58 }
 0x7c4   : > { %4117 = vmatpush3.msra.mxu1 %v3541_v5 }
 0x7c5   : > { %4118 = vmatprep.subr.mxu1 %v4280_v58 }
 0x7c6   : > { %4119 = vmatpush3.msra.mxu1 %v3540_v50 }
 0x7c7   : > { %4120 = vmatprep.subr.mxu1 %v4280_v58 }
 0x7c8   : > { %4121 = vmatpush3.msra.mxu1 %v3539_v2 }
 0x7c9   : > { %4122 = vmatprep.subr.mxu1 %v4280_v58 }
 0x7ca   : > { %4123 = vmatpush3.msra.mxu1 %v3538_v56 }
 0x7cb   : > { %4124 = vmatprep.subr.mxu1 %v4280_v58 }
 0x7cc   : > { %4125 = vmatpush3.msra.mxu1 %v3537_v53 }
 0x7cd   : > { %4126 = vmatprep.subr.mxu1 %v4280_v58 }
 0x7ce   : > { %4127 = vmatpush3.msra.mxu1 %v3536_v16 }
 0x7cf   : > { %4128 = vmatprep.subr.mxu1 %v4280_v58 }
 0x7d0   : > { %4129 = vmatpush3.msra.mxu1 %v3535_v49 }
 0x7d1   : > { %4130 = vmatprep.subr.mxu1 %v4280_v58 }
 0x7d2   : > { %4131 = vmatpush3.msra.mxu1 %v3534_v57 }
 0x7d3   : > { %4132 = vmatprep.subr.mxu1 %v4280_v58 }
 0x7d4   : > { %4133 = vmatpush3.msra.mxu1 %v3533_v29 }
 0x875   : > { %v4094_v63 = vpop.f32.mrf.mxu1 }
 0x876   : > { %v3458_v10 = vmul.f32 %v4094_v63, %v3456_v59 }
 0x877   : > { %v3445_v60 = vpop.f32.mrf.mxu1 }
 0x878   : > { %v3457_v18 = vmul.f32 %v3455_v61, %v3445_v60  ;;  %4096 = vmatpush3.msra.mxu0 %v3458_v10 }
 0x879   : > { %4097 = vmatprep.subr.mxu0 %v4280_v58 }
 0x87a   : > { %4098 = vmatpush3.msra.mxu0 %v3457_v18 }
 0x87b   : > { %4100 = vmatmul.mubr.msk.f32.vlgmr.msra.gmra.mxu0 %vm3459_vm11, %v3454_v19 }
 0x93b   : > { %v3529_v22 = vpop.f32.mrf.mxu0 }
 0x93c   : > { %4135 = vmatmul.mubr.f32.vlgmr.msra.gmra.mxu1 %v3529_v22 }
 0x93d   : > { %v4101_v46 = vpop.f32.mrf.mxu0 }
 0x9fc   : > { %v3616_v58 = vpop.f32.mrf.mxu1 }
 0x9fd   : > { %v3617_v31 = vadd.f32 %v3616_v58, %v3549_v34 }
 0x9fe   : > { %v4136_v54 = vpop.f32.mrf.mxu1 }
 0x9ff   : > { %3620 = vst [vmem:[%s513_s27] sm:$0x1] %v3617_v31 }
 0xa00   : > { %4223 = shalt.err (!%p4220_p3)
}
 0xa01   : > { %s4224_s28 = scalar_lea.hbm %s6242_s23, 16  ;;  %s4228_s18 = scalar_lea.hbm %s6293_s16, 32 }
 0xa02   : > { %p4225_p4 = scmp.ne.s32.totalorder %s6242_s23, %s4224_s28  ;;  %p4229_p9 = scmp.lt.s32.totalorder %s6242_s23, %s6293_s16 }
 0xa03   : > { %p4230_p10 = scmp.lt.s32.totalorder %s4228_s18, %s4224_s28 }
 0xa04   : > { %p4226_p7 = pnand %p4225_p4, %p4413_p5 }
 0xa05   : > { %p4231_p11 = por %p4230_p10, %p4229_p9 }
 0xa06   : > { %p4227_p8 = pneg %p4226_p7 }
 0xa08   : > { %p4232_p12 = pnand %p4231_p11, %p4227_p8 }
 0xa0a   : > { %4235 = shalt.err (!%p4232_p12)
}
 0xa0b   : > { %4146 = dma.vmem_to_hbm [thread:$0]  (%p4413_p5), %s3635_s29, 16, %s6242_s23, %s3622_s20  }
 0xa0c PF: > { %p4152_p13 = scmp.ge.s32.totalorder %s4270_s24, 2  ;;  %s3646_s2 = sand.u32 1, %s4258_s21  }
 0xa0d   : > { %s3647_s25 = scalar_lea.sflag [#allocation6], %s3646_s2 }
 0xa0e   : > { %p4149_p0 = pnand %p4152_p13, %p4417_p6 }
 0xa10   : > { %p4150_p1 = pneg %p4149_p0 }
 0xa12   : > { %4253 = dma.done.wait (%p4150_p1), %s3647_s25, 16  }
 0xa13   : > { %4255 = vsyncadd (%p4150_p1), %s3647_s25, 4294967280  ;;  %s6347_s24 = sld [smem:[#allocation9_spill]]  ;;  %s6350_s21 = smov %s4262_s22 }
 0xa14   : > { %s6348_s30 = sld [smem:[#allocation8_spill]] }
 0xa15   : > { %s6349_s23 = sld [smem:[#allocation10_spill]] }
 0xa19   : > { %p26_p2 = scmp.ge.s32.totalorder %s6347_s24, 4  }
 0xa1a   : > { %s6351_s22 = smov %s6348_s30 }
 0xa1b   :  { %28 = sbr.rel (!%p26_p2) target bundleno = 7 (0x7), region = 121 }
 0xa20   :  { %3651 = vsyncpa [#allocation6], 1 }
 0xa21   :  { %3653 = vsyncpa [#allocation6 + $0x1], 1 }

</bundles_post_ra>
